<compile_context>
chip_gen: v5e
topology: v5e:2x2
jax: 0.10.0
libtpu: 0.0.40
codegen_flags: <defaults>
</compile_context>

<pallas_src>
import jax
import jax.numpy as jnp
import numpy as np
from jax import lax
from jax.experimental import pallas as pl
from jax.experimental.pallas import tpu as pltpu

EPS = 1e-5
GN_GROUPS = 4
VMEM_LIMIT = 32 * 1024 * 1024  # conservative: fits v5e/v6e (128 MiB) and v7x (64 MiB)


# ----------------------------- Pallas kernels -----------------------------

def _gn_relu_kernel(x_ref, g_ref, b_ref, o_ref):
    """Fused GroupNorm(stats + affine) + ReLU on a (R, Cg, S) block.

    Each row r is one (sample, group) pair; the block always spans the full
    (Cg, S) reduction extent, so stats are exact regardless of row tiling.
    """
    x = x_ref[...]                                   # (R, Cg, S) f32
    inv_cnt = 1.0 / (x.shape[1] * x.shape[2])
    s = jnp.sum(jnp.sum(x, axis=2, keepdims=True), axis=1, keepdims=True)
    q = jnp.sum(jnp.sum(x * x, axis=2, keepdims=True), axis=1, keepdims=True)
    m = s * inv_cnt
    v = jnp.maximum(q * inv_cnt - m * m, 0.0)        # clamp: E[x^2]-E[x]^2 >= 0
    inv = lax.rsqrt(v + EPS)
    g = g_ref[...]                                   # (R, Cg, 1)
    b = b_ref[...]
    o_ref[...] = jnp.maximum((x - m) * inv * g + b, 0.0)


def _mm_kernel(a_ref, b_ref, o_ref, acc_ref):
    """bf16 x bf16 -> f32 tiled matmul with VMEM accumulator over the K axis."""
    @pl.when(pl.program_id(2) == 0)
    def _():
        acc_ref[...] = jnp.zeros_like(acc_ref)
    acc_ref[...] += jnp.dot(a_ref[...], b_ref[...],
                            preferred_element_type=jnp.float32)
    @pl.when(pl.program_id(2) == pl.num_programs(2) - 1)
    def _():
        o_ref[...] = acc_ref[...]


def _mm_res_kernel(a_ref, b_ref, r_ref, o_ref, acc_ref):
    """Same as _mm_kernel but fuses a residual add into the epilogue."""
    @pl.when(pl.program_id(2) == 0)
    def _():
        acc_ref[...] = jnp.zeros_like(acc_ref)
    acc_ref[...] += jnp.dot(a_ref[...], b_ref[...],
                            preferred_element_type=jnp.float32)
    @pl.when(pl.program_id(2) == pl.num_programs(2) - 1)
    def _():
        o_ref[...] = acc_ref[...] + r_ref[...]


# ----------------------------- helpers -----------------------------

def _round_up(x, m):
    return ((x + m - 1) // m) * m


def _pick_tile(total, candidates):
    for c in candidates:
        if total % c == 0:
            return c
    return 128


def _row_block(num_rows, row_bytes, budget=8 * 1024 * 1024):
    best = 1
    for r in range(1, num_rows + 1):
        if num_rows % r == 0 and r * row_bytes <= budget:
            best = r
    return best


# ----------------------------- Pallas wrappers -----------------------------

def pallas_matmul(a, b, residual=None, tm=256):
    """a:(M,K) @ b:(K,N) -> (M,N) f32.  Operands cast to bf16 (MXU-native),
    f32 accumulation, 3-axis tiled grid, optional fused residual add."""
    M, K = a.shape
    Kb, Nc = b.shape
    assert K == Kb
    Mp = _round_up(M, tm)
    Kp = _round_up(K, 128)
    Np = _round_up(Nc, 128)
    tk = Kp if Kp <= 512 else _pick_tile(Kp, (512, 256, 128))
    tn = Np if Np <= 256 else _pick_tile(Np, (256, 128))

    ap = jnp.pad(a.astype(jnp.bfloat16), ((0, Mp - M), (0, Kp - K)))
    bp = jnp.pad(b.astype(jnp.bfloat16), ((0, Kp - K), (0, Np - Nc)))

    in_specs = [pl.BlockSpec((tm, tk), lambda i, j, k: (i, k)),
                pl.BlockSpec((tk, tn), lambda i, j, k: (k, j))]
    args = [ap, bp]
    if residual is not None:
        rp = jnp.pad(residual.astype(jnp.float32), ((0, Mp - M), (0, Np - Nc)))
        in_specs.append(pl.BlockSpec((tm, tn), lambda i, j, k: (i, j)))
        args.append(rp)
        kernel = _mm_res_kernel
    else:
        kernel = _mm_kernel

    out = pl.pallas_call(
        kernel,
        out_shape=jax.ShapeDtypeStruct((Mp, Np), jnp.float32),
        grid=(Mp // tm, Np // tn, Kp // tk),
        in_specs=in_specs,
        out_specs=pl.BlockSpec((tm, tn), lambda i, j, k: (i, j)),
        scratch_shapes=[pltpu.VMEM((tm, tn), jnp.float32)],
        compiler_params=pltpu.CompilerParams(
            dimension_semantics=("parallel", "parallel", "arbitrary"),
            vmem_limit_bytes=VMEM_LIMIT),
    )(*args)
    return out[:M, :Nc]


def group_norm_relu(x, gamma, beta):
    """GroupNorm(4, C) + ReLU fused in a single pallas_call (nn.GroupNorm
    semantics: biased variance, eps=1e-5)."""
    N, C, D, H, W = x.shape
    S = D * H * W
    G = GN_GROUPS
    Cg = C // G
    NG = N * G

    xg = x.reshape(NG, Cg, S).astype(jnp.float32)
    g_rows = jnp.tile(gamma.astype(jnp.float32).reshape(G, Cg, 1), (N, 1, 1))
    b_rows = jnp.tile(beta.astype(jnp.float32).reshape(G, Cg, 1), (N, 1, 1))

    rb = _row_block(NG, Cg * S * 4)
    y = pl.pallas_call(
        _gn_relu_kernel,
        out_shape=jax.ShapeDtypeStruct((NG, Cg, S), jnp.float32),
        grid=(NG // rb,),
        in_specs=[pl.BlockSpec((rb, Cg, S), lambda i: (i, 0, 0)),
                  pl.BlockSpec((rb, Cg, 1), lambda i: (i, 0, 0)),
                  pl.BlockSpec((rb, Cg, 1), lambda i: (i, 0, 0))],
        out_specs=pl.BlockSpec((rb, Cg, S), lambda i: (i, 0, 0)),
        compiler_params=pltpu.CompilerParams(
            dimension_semantics=("parallel",),
            vmem_limit_bytes=VMEM_LIMIT),
    )(xg, g_rows, b_rows)
    return y.reshape(N, C, D, H, W)


def _im2col(h, ksize, dilation, padding):
    """stride-1 dilated im2col -> (N*D*H*W, C*T) in bf16 (JAX glue)."""
    N, C, D, H, W = h.shape
    kd, kh, kw = ksize
    dd, dh, dw = dilation
    pd, ph, pw = padding
    hb = h.astype(jnp.bfloat16)
    hp = jnp.pad(hb, ((0, 0), (0, 0), (pd, pd), (ph, ph), (pw, pw)))
    taps = []
    for i in range(kd):
        for j in range(kh):
            for k in range(kw):
                taps.append(hp[:, :, i * dd:i * dd + D,
                               j * dh:j * dh + H, k * dw:k * dw + W])
    T = kd * kh * kw
    p = jnp.stack(taps, axis=2).reshape(N, C * T, D * H * W)
    return jnp.transpose(p, (0, 2, 1)).reshape(N * D * H * W, C * T)


# ----------------------------- Parameters -----------------------------

def init_params(key, num_in, num_out, dilation=(1, 2, 3)):
    num_mid = num_in if num_in <= num_out else num_out
    c4 = num_in // 4
    ks = list(jax.random.split(key, 16))

    def gn(k, c):
        k1, k2 = jax.random.split(k)
        return (1.0 + 0.1 * jax.random.normal(k1, (c,), jnp.float32),
                0.1 * jax.random.normal(k2, (c,), jnp.float32))

    def cw(k, co, ci, kd, kh, kw):
        fan = ci * kd * kh * kw
        return jax.random.normal(k, (co, ci, kd, kh, kw), jnp.float32) / jnp.sqrt(fan)

    p = {'w123': jnp.ones((3,), jnp.float32)}            # weight1/2/3 = torch.ones(1)
    p['in1_gn'] = gn(ks[0], num_in)
    p['in1_w'] = cw(ks[1], c4, num_in, 1, 1, 1)
    for i, _d in enumerate(dilation):
        p[f'm1_{i}_gn'] = gn(ks[2 + 2 * i], c4)
        p[f'm1_{i}_w'] = cw(ks[3 + 2 * i], num_mid, c4, 3, 3, 3)
    p['m2_gn'] = gn(ks[8], num_mid)
    p['m2_w'] = cw(ks[9], num_out, num_mid, 3, 3, 1)
    p['in2_gn'] = gn(ks[10], num_out)
    p['in2_w'] = cw(ks[11], num_out, num_out, 1, 1, 1)
    if num_in != num_out:                                 # stride == 1 -> 1x1x1 shortcut
        p['sc_gn'] = gn(ks[12], num_in)
        p['sc_w'] = cw(ks[13], num_out, num_in, 1, 1, 1)
    return p


def prepare_params(p, dilation=(1, 2, 3)):
    """Hoist all weight preprocessing out of the hot path: reshape conv weights
    to (Cin*T, Cout) matmul matrices in bf16 and fold weight1/2/3 into the
    K-concatenated fused-branch weight."""
    def wmat(w):
        return w.reshape(w.shape[0], -1).T.astype(jnp.bfloat16)

    prep = {
        'in1_gn': p['in1_gn'], 'm2_gn': p['m2_gn'], 'in2_gn': p['in2_gn'],
        'in1_w': wmat(p['in1_w']),
        'm2_w': wmat(p['m2_w']),
        'in2_w': wmat(p['in2_w']),
        'c4': int(p['in1_w'].shape[0]),
        'num_mid': int(p['m2_w'].shape[1]),
        'num_out': int(p['m2_w'].shape[0]),
    }
    for i in range(len(dilation)):
        prep[f'm1_{i}_gn'] = p[f'm1_{i}_gn']
    # weight_i * conv(h_i, W_i) summed  ==  [A_1|A_2|A_3] @ concat_K(weight_i*W_i)
    prep['branch_w'] = jnp.concatenate(
        [(p['w123'][i] * p[f'm1_{i}_w'].reshape(p[f'm1_{i}_w'].shape[0], -1).T)
         for i in range(len(dilation))], axis=0).astype(jnp.bfloat16)
    if 'sc_w' in p:
        prep['sc_gn'] = p['sc_gn']
        prep['sc_w'] = wmat(p['sc_w'])
    return prep


# ----------------------------- forward -----------------------------

def mbd_res_block(x, prep, dilation=(1, 2, 3)):
    N, Cin, D, H, W = x.shape
    S = D * H * W

    def to_cl(h):    # NCDHW -> channels-last 2D (N*D*H*W, C)
        n, c = h.shape[0], h.shape[1]
        return jnp.transpose(h.reshape(n, c, S), (0, 2, 1)).reshape(n * S, c)

    def to_ncdhw(y2d, c):
        return jnp.transpose(y2d.reshape(N, S, c), (0, 2, 1)).reshape(N, c, D, H, W)

    # conv1x1x1_in1 : GN -> ReLU -> 1x1x1 conv
    h = group_norm_relu(x, *prep['in1_gn'])
    x1 = to_ncdhw(pallas_matmul(to_cl(h), prep['in1_w']), prep['c4'])

    # three dilated 3x3x3 branches + weighted sum, fused into ONE matmul
    patches = []
    for i, d in enumerate(dilation):
        hi = group_norm_relu(x1, *prep[f'm1_{i}_gn'])
        patches.append(_im2col(hi, (3, 3, 3), (d, d, d), (d, d, d)))
    a_cat = jnp.concatenate(patches, axis=1)                    # (M, 3*c4*27)
    x2 = to_ncdhw(pallas_matmul(a_cat, prep['branch_w']), prep['num_mid'])

    # conv3x3x3_m2 : 3x3x1, padding (1,1,0)
    h = group_norm_relu(x2, *prep['m2_gn'])
    a_m2 = _im2col(h, (3, 3, 1), (1, 1, 1), (1, 1, 0))
    x3 = to_ncdhw(pallas_matmul(a_m2, prep['m2_w']), prep['num_out'])

    # shortcut (kept channels-last so the residual add fuses into the in2 matmul)
    if 'sc_w' in prep:
        hs = group_norm_relu(x, *prep['sc_gn'])
        sc = pallas_matmul(to_cl(hs), prep['sc_w'])             # (M, num_out) f32
    else:
        sc = to_cl(x)

    # conv1x1x1_in2 with fused residual-add epilogue
    h = group_norm_relu(x3, *prep['in2_gn'])
    out = pallas_matmul(to_cl(h), prep['in2_w'], residual=sc)
    return to_ncdhw(out, prep['num_out'])


# ----------------------------- Pure-JAX reference -----------------------------

def _gn_relu_ref(x, gamma, beta):
    N, C, D, H, W = x.shape
    xg = x.reshape(N, GN_GROUPS, -1)
    m = xg.mean(axis=2, keepdims=True)
    v = xg.var(axis=2, keepdims=True)
    xn = ((xg - m) / jnp.sqrt(v + EPS)).reshape(N, C, D, H, W)
    return jnp.maximum(xn * gamma.reshape(1, C, 1, 1, 1)
                       + beta.reshape(1, C, 1, 1, 1), 0.0)


def _conv_ref(x, w, dilation, padding):
    return lax.conv_general_dilated(
        x, w, window_strides=(1, 1, 1),
        padding=[(padding[0], padding[0]), (padding[1], padding[1]),
                 (padding[2], padding[2])],
        rhs_dilation=dilation,
        dimension_numbers=('NCDHW', 'OIDHW', 'NCDHW'),
        precision=lax.Precision.HIGHEST)


def mbd_res_block_ref(x, p, dilation=(1, 2, 3)):
    def blk(h, gnp, w, dil=(1, 1, 1), pad=(0, 0, 0)):
        g, b = gnp
        return _conv_ref(_gn_relu_ref(h, g, b), w, dil, pad)
    x1 = blk(x, p['in1_gn'], p['in1_w'])
    br = [blk(x1, p[f'm1_{i}_gn'], p[f'm1_{i}_w'], (d, d, d), (d, d, d))
          for i, d in enumerate(dilation)]
    x2 = p['w123'][0] * br[0] + p['w123'][1] * br[1] + p['w123'][2] * br[2]
    x3 = blk(x2, p['m2_gn'], p['m2_w'], (1, 1, 1), (1, 1, 0))
    x4 = blk(x3, p['in2_gn'], p['in2_w'])
    sc = blk(x, p['sc_gn'], p['sc_w']) if 'sc_w' in p else x
    return x4 + sc


# ----------------------------- main -----------------------------

if __name__ == "__main__":
    key = jax.random.PRNGKey(0)
    kx, kp = jax.random.split(key)
    num_in, num_out = 16, 8
    x = jax.random.normal(kx, (2, num_in, 8, 8, 8), jnp.float32)
    params = init_params(kp, num_in, num_out)
    prep = prepare_params(params)

    fwd = jax.jit(lambda inp: mbd_res_block(inp, prep))
    out = jax.block_until_ready(fwd(x))

    assert out.shape == (2, num_out, 8, 8, 8)
    ref = mbd_res_block_ref(x, params)
    # bf16 MXU operands vs pure-f32 reference -> bf16-level tolerance
    np.testing.assert_allclose(np.asarray(out), np.asarray(ref),
                               rtol=2e-2, atol=3e-2)
    print("KERNEL_OK")
</pallas_src>

<mosaic_0001>
module attributes {stable_mosaic.version = 11 : i64} {
  func.func @_gn_relu_kernel(%arg0: i32, %arg1: memref<8x4x512xf32, #tpu.memory_space<vmem>>, %arg2: memref<8x4x1xf32, #tpu.memory_space<vmem>>, %arg3: memref<8x4x1xf32, #tpu.memory_space<vmem>>, %arg4: memref<8x4x512xf32, #tpu.memory_space<vmem>>) attributes {dimension_semantics = [#tpu.dimension_semantics<parallel>], iteration_bounds = array<i64: 1>, scalar_prefetch = 0 : i64, scratch_operands = 0 : i64, tpu.core_type = #tpu.core_type<tc>, window_params = [{transform_indices = @transform_0, window_bounds = array<i64: 8, 4, 512>}, {transform_indices = @transform_1, window_bounds = array<i64: 8, 4, 1>}, {transform_indices = @transform_2, window_bounds = array<i64: 8, 4, 1>}, {transform_indices = @transform_3, window_bounds = array<i64: 8, 4, 512>}]} {
    %c0 = arith.constant 0 : index
    %c0_0 = arith.constant 0 : index
    %c0_1 = arith.constant 0 : index
    %0 = vector.load %arg1[%c0, %c0_0, %c0_1] : memref<8x4x512xf32, #tpu.memory_space<vmem>>, vector<8x4x512xf32>
    %cst = arith.constant dense<0.000000e+00> : vector<8x4xf32>
    %1 = vector.multi_reduction <add>, %0, %cst [2] : vector<8x4x512xf32> to vector<8x4xf32>
    %2 = vector.shape_cast %1 : vector<8x4xf32> to vector<8x4x1xf32>
    %cst_2 = arith.constant dense<0.000000e+00> : vector<8x1xf32>
    %3 = vector.multi_reduction <add>, %2, %cst_2 [1] : vector<8x4x1xf32> to vector<8x1xf32>
    %4 = vector.shape_cast %3 : vector<8x1xf32> to vector<8x1x1xf32>
    %5 = arith.mulf %0, %0 : vector<8x4x512xf32>
    %cst_3 = arith.constant dense<0.000000e+00> : vector<8x4xf32>
    %6 = vector.multi_reduction <add>, %5, %cst_3 [2] : vector<8x4x512xf32> to vector<8x4xf32>
    %7 = vector.shape_cast %6 : vector<8x4xf32> to vector<8x4x1xf32>
    %cst_4 = arith.constant dense<0.000000e+00> : vector<8x1xf32>
    %8 = vector.multi_reduction <add>, %7, %cst_4 [1] : vector<8x4x1xf32> to vector<8x1xf32>
    %9 = vector.shape_cast %8 : vector<8x1xf32> to vector<8x1x1xf32>
    %cst_5 = arith.constant 4.8828125E-4 : f32
    %10 = vector.broadcast %cst_5 : f32 to vector<8x1x1xf32>
    %11 = arith.mulf %4, %10 : vector<8x1x1xf32>
    %cst_6 = arith.constant 4.8828125E-4 : f32
    %12 = vector.broadcast %cst_6 : f32 to vector<8x1x1xf32>
    %13 = arith.mulf %9, %12 : vector<8x1x1xf32>
    %14 = arith.mulf %11, %11 : vector<8x1x1xf32>
    %15 = arith.subf %13, %14 : vector<8x1x1xf32>
    %cst_7 = arith.constant 0.000000e+00 : f32
    %16 = vector.broadcast %cst_7 : f32 to vector<8x1x1xf32>
    %17 = arith.maximumf %15, %16 : vector<8x1x1xf32>
    %cst_8 = arith.constant 9.99999974E-6 : f32
    %18 = vector.broadcast %cst_8 : f32 to vector<8x1x1xf32>
    %19 = arith.addf %17, %18 : vector<8x1x1xf32>
    %20 = math.rsqrt %19 : vector<8x1x1xf32>
    %c0_9 = arith.constant 0 : index
    %c0_10 = arith.constant 0 : index
    %c0_11 = arith.constant 0 : index
    %21 = vector.load %arg2[%c0_9, %c0_10, %c0_11] : memref<8x4x1xf32, #tpu.memory_space<vmem>>, vector<8x4x1xf32>
    %c0_12 = arith.constant 0 : index
    %c0_13 = arith.constant 0 : index
    %c0_14 = arith.constant 0 : index
    %22 = vector.load %arg3[%c0_12, %c0_13, %c0_14] : memref<8x4x1xf32, #tpu.memory_space<vmem>>, vector<8x4x1xf32>
    %23 = vector.broadcast %11 : vector<8x1x1xf32> to vector<8x4x512xf32>
    %24 = arith.subf %0, %23 : vector<8x4x512xf32>
    %25 = vector.broadcast %20 : vector<8x1x1xf32> to vector<8x4x512xf32>
    %26 = arith.mulf %24, %25 : vector<8x4x512xf32>
    %27 = vector.broadcast %21 : vector<8x4x1xf32> to vector<8x4x512xf32>
    %28 = arith.mulf %26, %27 : vector<8x4x512xf32>
    %29 = vector.broadcast %22 : vector<8x4x1xf32> to vector<8x4x512xf32>
    %30 = arith.addf %28, %29 : vector<8x4x512xf32>
    %cst_15 = arith.constant 0.000000e+00 : f32
    %31 = vector.broadcast %cst_15 : f32 to vector<8x4x512xf32>
    %32 = arith.maximumf %30, %31 : vector<8x4x512xf32>
    %c0_16 = arith.constant 0 : index
    %c0_17 = arith.constant 0 : index
    %c0_18 = arith.constant 0 : index
    %33 = vector.load %arg4[%c0_16, %c0_17, %c0_18] : memref<8x4x512xf32, #tpu.memory_space<vmem>>, vector<8x4x512xf32>
    tpu.vector_store %arg4[%c0_16, %c0_17, %c0_18], %32 {strides = array<i32>} : memref<8x4x512xf32, #tpu.memory_space<vmem>>, vector<8x4x512xf32>,
    return
  }
  func.func @transform_0(%arg0: i32) -> (i32, i32, i32) {
    %c0_i32 = arith.constant 0 : i32
    %c0_i32_0 = arith.constant 0 : i32
    %c0_i32_1 = arith.constant 0 : i32
    return %arg0, %c0_i32, %c0_i32_0 : i32, i32, i32
  }
  func.func @transform_1(%arg0: i32) -> (i32, i32, i32) {
    %c0_i32 = arith.constant 0 : i32
    %c0_i32_0 = arith.constant 0 : i32
    %c0_i32_1 = arith.constant 0 : i32
    return %arg0, %c0_i32, %c0_i32_0 : i32, i32, i32
  }
  func.func @transform_2(%arg0: i32) -> (i32, i32, i32) {
    %c0_i32 = arith.constant 0 : i32
    %c0_i32_0 = arith.constant 0 : i32
    %c0_i32_1 = arith.constant 0 : i32
    return %arg0, %c0_i32, %c0_i32_0 : i32, i32, i32
  }
  func.func @transform_3(%arg0: i32) -> (i32, i32, i32) {
    %c0_i32 = arith.constant 0 : i32
    %c0_i32_0 = arith.constant 0 : i32
    %c0_i32_1 = arith.constant 0 : i32
    return %arg0, %c0_i32, %c0_i32_0 : i32, i32, i32
  }
}

module attributes {stable_mosaic.version = 11 : i64} {
  func.func @_mm_kernel(%arg0: i32, %arg1: i32, %arg2: i32, %arg3: memref<256x128xbf16, #tpu.memory_space<vmem>>, %arg4: memref<128x128xbf16, #tpu.memory_space<vmem>>, %arg5: memref<256x128xf32, #tpu.memory_space<vmem>>, %arg6: memref<256x128xf32, #tpu.memory_space<vmem>>) attributes {dimension_semantics = [#tpu.dimension_semantics<parallel>, #tpu.dimension_semantics<parallel>, #tpu.dimension_semantics<arbitrary>], iteration_bounds = array<i64: 4, 1, 1>, scalar_prefetch = 0 : i64, scratch_operands = 1 : i64, tpu.core_type = #tpu.core_type<tc>, window_params = [{transform_indices = @transform_0, window_bounds = array<i64: 256, 128>}, {transform_indices = @transform_1, window_bounds = array<i64: 128, 128>}, {transform_indices = @transform_2, window_bounds = array<i64: 256, 128>}]} {
    %c0_i32 = arith.constant 0 : i32
    %0 = arith.cmpi eq, %arg2, %c0_i32 : i32
    %1 = arith.extui %0 : i1 to i32
    %c0_i32_0 = arith.constant 0 : i32
    %2 = arith.cmpi ne, %1, %c0_i32_0 : i32
    scf.if %2 {
      %cst_10 = arith.constant 0.000000e+00 : f32
      %12 = vector.broadcast %cst_10 : f32 to vector<256x128xf32>
      %c0_11 = arith.constant 0 : index
      %c0_12 = arith.constant 0 : index
      %13 = vector.load %arg6[%c0_11, %c0_12] : memref<256x128xf32, #tpu.memory_space<vmem>>, vector<256x128xf32>
      tpu.vector_store %arg6[%c0_11, %c0_12], %12 {strides = array<i32>} : memref<256x128xf32, #tpu.memory_space<vmem>>, vector<256x128xf32>,
    } else {
    }
    %c0 = arith.constant 0 : index
    %c0_1 = arith.constant 0 : index
    %3 = vector.load %arg6[%c0, %c0_1] : memref<256x128xf32, #tpu.memory_space<vmem>>, vector<256x128xf32>
    %c0_2 = arith.constant 0 : index
    %c0_3 = arith.constant 0 : index
    %4 = vector.load %arg3[%c0_2, %c0_3] : memref<256x128xbf16, #tpu.memory_space<vmem>>, vector<256x128xbf16>
    %c0_4 = arith.constant 0 : index
    %c0_5 = arith.constant 0 : index
    %5 = vector.load %arg4[%c0_4, %c0_5] : memref<128x128xbf16, #tpu.memory_space<vmem>>, vector<128x128xbf16>
    %cst = arith.constant dense<0.000000e+00> : vector<256x128xf32>
    %6 = tpu.matmul %4, %5, %cst {dimension_numbers = #tpu.dot_dimension_numbers<[1], [0], [0], [1], [0, 0, 1, 1], [], []>} : vector<256x128xbf16>, vector<128x128xbf16>, vector<256x128xf32> -> vector<256x128xf32>
    %7 = arith.addf %3, %6 : vector<256x128xf32>
    %c0_6 = arith.constant 0 : index
    %c0_7 = arith.constant 0 : index
    %8 = vector.load %arg6[%c0_6, %c0_7] : memref<256x128xf32, #tpu.memory_space<vmem>>, vector<256x128xf32>
    tpu.vector_store %arg6[%c0_6, %c0_7], %7 {strides = array<i32>} : memref<256x128xf32, #tpu.memory_space<vmem>>, vector<256x128xf32>,
    %c0_i32_8 = arith.constant 0 : i32
    %9 = arith.cmpi eq, %arg2, %c0_i32_8 : i32
    %10 = arith.extui %9 : i1 to i32
    %c0_i32_9 = arith.constant 0 : i32
    %11 = arith.cmpi ne, %10, %c0_i32_9 : i32
    scf.if %11 {
      %c0_10 = arith.constant 0 : index
      %c0_11 = arith.constant 0 : index
      %12 = vector.load %arg6[%c0_10, %c0_11] : memref<256x128xf32, #tpu.memory_space<vmem>>, vector<256x128xf32>
      %c0_12 = arith.constant 0 : index
      %c0_13 = arith.constant 0 : index
      %13 = vector.load %arg5[%c0_12, %c0_13] : memref<256x128xf32, #tpu.memory_space<vmem>>, vector<256x128xf32>
      tpu.vector_store %arg5[%c0_12, %c0_13], %12 {strides = array<i32>} : memref<256x128xf32, #tpu.memory_space<vmem>>, vector<256x128xf32>,
    } else {
    }
    return
  }
  func.func @transform_0(%arg0: i32, %arg1: i32, %arg2: i32) -> (i32, i32) {
    %c0_i32 = arith.constant 0 : i32
    return %arg0, %arg2 : i32, i32
  }
  func.func @transform_1(%arg0: i32, %arg1: i32, %arg2: i32) -> (i32, i32) {
    %c0_i32 = arith.constant 0 : i32
    return %arg2, %arg1 : i32, i32
  }
  func.func @transform_2(%arg0: i32, %arg1: i32, %arg2: i32) -> (i32, i32) {
    %c0_i32 = arith.constant 0 : i32
    return %arg0, %arg1 : i32, i32
  }
}

module attributes {stable_mosaic.version = 11 : i64} {
  func.func @_gn_relu_kernel(%arg0: i32, %arg1: memref<8x1x512xf32, #tpu.memory_space<vmem>>, %arg2: memref<8x1x1xf32, #tpu.memory_space<vmem>>, %arg3: memref<8x1x1xf32, #tpu.memory_space<vmem>>, %arg4: memref<8x1x512xf32, #tpu.memory_space<vmem>>) attributes {dimension_semantics = [#tpu.dimension_semantics<parallel>], iteration_bounds = array<i64: 1>, scalar_prefetch = 0 : i64, scratch_operands = 0 : i64, tpu.core_type = #tpu.core_type<tc>, window_params = [{transform_indices = @transform_0, window_bounds = array<i64: 8, 1, 512>}, {transform_indices = @transform_1, window_bounds = array<i64: 8, 1, 1>}, {transform_indices = @transform_2, window_bounds = array<i64: 8, 1, 1>}, {transform_indices = @transform_3, window_bounds = array<i64: 8, 1, 512>}]} {
    %c0 = arith.constant 0 : index
    %c0_0 = arith.constant 0 : index
    %c0_1 = arith.constant 0 : index
    %0 = vector.load %arg1[%c0, %c0_0, %c0_1] : memref<8x1x512xf32, #tpu.memory_space<vmem>>, vector<8x1x512xf32>
    %cst = arith.constant dense<0.000000e+00> : vector<8x1xf32>
    %1 = vector.multi_reduction <add>, %0, %cst [2] : vector<8x1x512xf32> to vector<8x1xf32>
    %2 = vector.shape_cast %1 : vector<8x1xf32> to vector<8x1x1xf32>
    %cst_2 = arith.constant dense<0.000000e+00> : vector<8x1xf32>
    %3 = vector.multi_reduction <add>, %2, %cst_2 [1] : vector<8x1x1xf32> to vector<8x1xf32>
    %4 = vector.shape_cast %3 : vector<8x1xf32> to vector<8x1x1xf32>
    %5 = arith.mulf %0, %0 : vector<8x1x512xf32>
    %cst_3 = arith.constant dense<0.000000e+00> : vector<8x1xf32>
    %6 = vector.multi_reduction <add>, %5, %cst_3 [2] : vector<8x1x512xf32> to vector<8x1xf32>
    %7 = vector.shape_cast %6 : vector<8x1xf32> to vector<8x1x1xf32>
    %cst_4 = arith.constant dense<0.000000e+00> : vector<8x1xf32>
    %8 = vector.multi_reduction <add>, %7, %cst_4 [1] : vector<8x1x1xf32> to vector<8x1xf32>
    %9 = vector.shape_cast %8 : vector<8x1xf32> to vector<8x1x1xf32>
    %cst_5 = arith.constant 0.001953125 : f32
    %10 = vector.broadcast %cst_5 : f32 to vector<8x1x1xf32>
    %11 = arith.mulf %4, %10 : vector<8x1x1xf32>
    %cst_6 = arith.constant 0.001953125 : f32
    %12 = vector.broadcast %cst_6 : f32 to vector<8x1x1xf32>
    %13 = arith.mulf %9, %12 : vector<8x1x1xf32>
    %14 = arith.mulf %11, %11 : vector<8x1x1xf32>
    %15 = arith.subf %13, %14 : vector<8x1x1xf32>
    %cst_7 = arith.constant 0.000000e+00 : f32
    %16 = vector.broadcast %cst_7 : f32 to vector<8x1x1xf32>
    %17 = arith.maximumf %15, %16 : vector<8x1x1xf32>
    %cst_8 = arith.constant 9.99999974E-6 : f32
    %18 = vector.broadcast %cst_8 : f32 to vector<8x1x1xf32>
    %19 = arith.addf %17, %18 : vector<8x1x1xf32>
    %20 = math.rsqrt %19 : vector<8x1x1xf32>
    %c0_9 = arith.constant 0 : index
    %c0_10 = arith.constant 0 : index
    %c0_11 = arith.constant 0 : index
    %21 = vector.load %arg2[%c0_9, %c0_10, %c0_11] : memref<8x1x1xf32, #tpu.memory_space<vmem>>, vector<8x1x1xf32>
    %c0_12 = arith.constant 0 : index
    %c0_13 = arith.constant 0 : index
    %c0_14 = arith.constant 0 : index
    %22 = vector.load %arg3[%c0_12, %c0_13, %c0_14] : memref<8x1x1xf32, #tpu.memory_space<vmem>>, vector<8x1x1xf32>
    %23 = vector.broadcast %11 : vector<8x1x1xf32> to vector<8x1x512xf32>
    %24 = arith.subf %0, %23 : vector<8x1x512xf32>
    %25 = vector.broadcast %20 : vector<8x1x1xf32> to vector<8x1x512xf32>
    %26 = arith.mulf %24, %25 : vector<8x1x512xf32>
    %27 = vector.broadcast %21 : vector<8x1x1xf32> to vector<8x1x512xf32>
    %28 = arith.mulf %26, %27 : vector<8x1x512xf32>
    %29 = vector.broadcast %22 : vector<8x1x1xf32> to vector<8x1x512xf32>
    %30 = arith.addf %28, %29 : vector<8x1x512xf32>
    %cst_15 = arith.constant 0.000000e+00 : f32
    %31 = vector.broadcast %cst_15 : f32 to vector<8x1x512xf32>
    %32 = arith.maximumf %30, %31 : vector<8x1x512xf32>
    %c0_16 = arith.constant 0 : index
    %c0_17 = arith.constant 0 : index
    %c0_18 = arith.constant 0 : index
    %33 = vector.load %arg4[%c0_16, %c0_17, %c0_18] : memref<8x1x512xf32, #tpu.memory_space<vmem>>, vector<8x1x512xf32>
    tpu.vector_store %arg4[%c0_16, %c0_17, %c0_18], %32 {strides = array<i32>} : memref<8x1x512xf32, #tpu.memory_space<vmem>>, vector<8x1x512xf32>,
    return
  }
  func.func @transform_0(%arg0: i32) -> (i32, i32, i32) {
    %c0_i32 = arith.constant 0 : i32
    %c0_i32_0 = arith.constant 0 : i32
    %c0_i32_1 = arith.constant 0 : i32
    return %arg0, %c0_i32, %c0_i32_0 : i32, i32, i32
  }
  func.func @transform_1(%arg0: i32) -> (i32, i32, i32) {
    %c0_i32 = arith.constant 0 : i32
    %c0_i32_0 = arith.constant 0 : i32
    %c0_i32_1 = arith.constant 0 : i32
    return %arg0, %c0_i32, %c0_i32_0 : i32, i32, i32
  }
  func.func @transform_2(%arg0: i32) -> (i32, i32, i32) {
    %c0_i32 = arith.constant 0 : i32
    %c0_i32_0 = arith.constant 0 : i32
    %c0_i32_1 = arith.constant 0 : i32
    return %arg0, %c0_i32, %c0_i32_0 : i32, i32, i32
  }
  func.func @transform_3(%arg0: i32) -> (i32, i32, i32) {
    %c0_i32 = arith.constant 0 : i32
    %c0_i32_0 = arith.constant 0 : i32
    %c0_i32_1 = arith.constant 0 : i32
    return %arg0, %c0_i32, %c0_i32_0 : i32, i32, i32
  }
}

module attributes {stable_mosaic.version = 11 : i64} {
  func.func @_mm_kernel(%arg0: i32, %arg1: i32, %arg2: i32, %arg3: memref<256x384xbf16, #tpu.memory_space<vmem>>, %arg4: memref<384x128xbf16, #tpu.memory_space<vmem>>, %arg5: memref<256x128xf32, #tpu.memory_space<vmem>>, %arg6: memref<256x128xf32, #tpu.memory_space<vmem>>) attributes {dimension_semantics = [#tpu.dimension_semantics<parallel>, #tpu.dimension_semantics<parallel>, #tpu.dimension_semantics<arbitrary>], iteration_bounds = array<i64: 4, 1, 1>, scalar_prefetch = 0 : i64, scratch_operands = 1 : i64, tpu.core_type = #tpu.core_type<tc>, window_params = [{transform_indices = @transform_0, window_bounds = array<i64: 256, 384>}, {transform_indices = @transform_1, window_bounds = array<i64: 384, 128>}, {transform_indices = @transform_2, window_bounds = array<i64: 256, 128>}]} {
    %c0_i32 = arith.constant 0 : i32
    %0 = arith.cmpi eq, %arg2, %c0_i32 : i32
    %1 = arith.extui %0 : i1 to i32
    %c0_i32_0 = arith.constant 0 : i32
    %2 = arith.cmpi ne, %1, %c0_i32_0 : i32
    scf.if %2 {
      %cst_10 = arith.constant 0.000000e+00 : f32
      %12 = vector.broadcast %cst_10 : f32 to vector<256x128xf32>
      %c0_11 = arith.constant 0 : index
      %c0_12 = arith.constant 0 : index
      %13 = vector.load %arg6[%c0_11, %c0_12] : memref<256x128xf32, #tpu.memory_space<vmem>>, vector<256x128xf32>
      tpu.vector_store %arg6[%c0_11, %c0_12], %12 {strides = array<i32>} : memref<256x128xf32, #tpu.memory_space<vmem>>, vector<256x128xf32>,
    } else {
    }
    %c0 = arith.constant 0 : index
    %c0_1 = arith.constant 0 : index
    %3 = vector.load %arg6[%c0, %c0_1] : memref<256x128xf32, #tpu.memory_space<vmem>>, vector<256x128xf32>
    %c0_2 = arith.constant 0 : index
    %c0_3 = arith.constant 0 : index
    %4 = vector.load %arg3[%c0_2, %c0_3] : memref<256x384xbf16, #tpu.memory_space<vmem>>, vector<256x384xbf16>
    %c0_4 = arith.constant 0 : index
    %c0_5 = arith.constant 0 : index
    %5 = vector.load %arg4[%c0_4, %c0_5] : memref<384x128xbf16, #tpu.memory_space<vmem>>, vector<384x128xbf16>
    %cst = arith.constant dense<0.000000e+00> : vector<256x128xf32>
    %6 = tpu.matmul %4, %5, %cst {dimension_numbers = #tpu.dot_dimension_numbers<[1], [0], [0], [1], [0, 0, 1, 1], [], []>} : vector<256x384xbf16>, vector<384x128xbf16>, vector<256x128xf32> -> vector<256x128xf32>
    %7 = arith.addf %3, %6 : vector<256x128xf32>
    %c0_6 = arith.constant 0 : index
    %c0_7 = arith.constant 0 : index
    %8 = vector.load %arg6[%c0_6, %c0_7] : memref<256x128xf32, #tpu.memory_space<vmem>>, vector<256x128xf32>
    tpu.vector_store %arg6[%c0_6, %c0_7], %7 {strides = array<i32>} : memref<256x128xf32, #tpu.memory_space<vmem>>, vector<256x128xf32>,
    %c0_i32_8 = arith.constant 0 : i32
    %9 = arith.cmpi eq, %arg2, %c0_i32_8 : i32
    %10 = arith.extui %9 : i1 to i32
    %c0_i32_9 = arith.constant 0 : i32
    %11 = arith.cmpi ne, %10, %c0_i32_9 : i32
    scf.if %11 {
      %c0_10 = arith.constant 0 : index
      %c0_11 = arith.constant 0 : index
      %12 = vector.load %arg6[%c0_10, %c0_11] : memref<256x128xf32, #tpu.memory_space<vmem>>, vector<256x128xf32>
      %c0_12 = arith.constant 0 : index
      %c0_13 = arith.constant 0 : index
      %13 = vector.load %arg5[%c0_12, %c0_13] : memref<256x128xf32, #tpu.memory_space<vmem>>, vector<256x128xf32>
      tpu.vector_store %arg5[%c0_12, %c0_13], %12 {strides = array<i32>} : memref<256x128xf32, #tpu.memory_space<vmem>>, vector<256x128xf32>,
    } else {
    }
    return
  }
  func.func @transform_0(%arg0: i32, %arg1: i32, %arg2: i32) -> (i32, i32) {
    %c0_i32 = arith.constant 0 : i32
    return %arg0, %arg2 : i32, i32
  }
  func.func @transform_1(%arg0: i32, %arg1: i32, %arg2: i32) -> (i32, i32) {
    %c0_i32 = arith.constant 0 : i32
    return %arg2, %arg1 : i32, i32
  }
  func.func @transform_2(%arg0: i32, %arg1: i32, %arg2: i32) -> (i32, i32) {
    %c0_i32 = arith.constant 0 : i32
    return %arg0, %arg1 : i32, i32
  }
}

module attributes {stable_mosaic.version = 11 : i64} {
  func.func @_gn_relu_kernel(%arg0: i32, %arg1: memref<8x2x512xf32, #tpu.memory_space<vmem>>, %arg2: memref<8x2x1xf32, #tpu.memory_space<vmem>>, %arg3: memref<8x2x1xf32, #tpu.memory_space<vmem>>, %arg4: memref<8x2x512xf32, #tpu.memory_space<vmem>>) attributes {dimension_semantics = [#tpu.dimension_semantics<parallel>], iteration_bounds = array<i64: 1>, scalar_prefetch = 0 : i64, scratch_operands = 0 : i64, tpu.core_type = #tpu.core_type<tc>, window_params = [{transform_indices = @transform_0, window_bounds = array<i64: 8, 2, 512>}, {transform_indices = @transform_1, window_bounds = array<i64: 8, 2, 1>}, {transform_indices = @transform_2, window_bounds = array<i64: 8, 2, 1>}, {transform_indices = @transform_3, window_bounds = array<i64: 8, 2, 512>}]} {
    %c0 = arith.constant 0 : index
    %c0_0 = arith.constant 0 : index
    %c0_1 = arith.constant 0 : index
    %0 = vector.load %arg1[%c0, %c0_0, %c0_1] : memref<8x2x512xf32, #tpu.memory_space<vmem>>, vector<8x2x512xf32>
    %cst = arith.constant dense<0.000000e+00> : vector<8x2xf32>
    %1 = vector.multi_reduction <add>, %0, %cst [2] : vector<8x2x512xf32> to vector<8x2xf32>
    %2 = vector.shape_cast %1 : vector<8x2xf32> to vector<8x2x1xf32>
    %cst_2 = arith.constant dense<0.000000e+00> : vector<8x1xf32>
    %3 = vector.multi_reduction <add>, %2, %cst_2 [1] : vector<8x2x1xf32> to vector<8x1xf32>
    %4 = vector.shape_cast %3 : vector<8x1xf32> to vector<8x1x1xf32>
    %5 = arith.mulf %0, %0 : vector<8x2x512xf32>
    %cst_3 = arith.constant dense<0.000000e+00> : vector<8x2xf32>
    %6 = vector.multi_reduction <add>, %5, %cst_3 [2] : vector<8x2x512xf32> to vector<8x2xf32>
    %7 = vector.shape_cast %6 : vector<8x2xf32> to vector<8x2x1xf32>
    %cst_4 = arith.constant dense<0.000000e+00> : vector<8x1xf32>
    %8 = vector.multi_reduction <add>, %7, %cst_4 [1] : vector<8x2x1xf32> to vector<8x1xf32>
    %9 = vector.shape_cast %8 : vector<8x1xf32> to vector<8x1x1xf32>
    %cst_5 = arith.constant 9.765625E-4 : f32
    %10 = vector.broadcast %cst_5 : f32 to vector<8x1x1xf32>
    %11 = arith.mulf %4, %10 : vector<8x1x1xf32>
    %cst_6 = arith.constant 9.765625E-4 : f32
    %12 = vector.broadcast %cst_6 : f32 to vector<8x1x1xf32>
    %13 = arith.mulf %9, %12 : vector<8x1x1xf32>
    %14 = arith.mulf %11, %11 : vector<8x1x1xf32>
    %15 = arith.subf %13, %14 : vector<8x1x1xf32>
    %cst_7 = arith.constant 0.000000e+00 : f32
    %16 = vector.broadcast %cst_7 : f32 to vector<8x1x1xf32>
    %17 = arith.maximumf %15, %16 : vector<8x1x1xf32>
    %cst_8 = arith.constant 9.99999974E-6 : f32
    %18 = vector.broadcast %cst_8 : f32 to vector<8x1x1xf32>
    %19 = arith.addf %17, %18 : vector<8x1x1xf32>
    %20 = math.rsqrt %19 : vector<8x1x1xf32>
    %c0_9 = arith.constant 0 : index
    %c0_10 = arith.constant 0 : index
    %c0_11 = arith.constant 0 : index
    %21 = vector.load %arg2[%c0_9, %c0_10, %c0_11] : memref<8x2x1xf32, #tpu.memory_space<vmem>>, vector<8x2x1xf32>
    %c0_12 = arith.constant 0 : index
    %c0_13 = arith.constant 0 : index
    %c0_14 = arith.constant 0 : index
    %22 = vector.load %arg3[%c0_12, %c0_13, %c0_14] : memref<8x2x1xf32, #tpu.memory_space<vmem>>, vector<8x2x1xf32>
    %23 = vector.broadcast %11 : vector<8x1x1xf32> to vector<8x2x512xf32>
    %24 = arith.subf %0, %23 : vector<8x2x512xf32>
    %25 = vector.broadcast %20 : vector<8x1x1xf32> to vector<8x2x512xf32>
    %26 = arith.mulf %24, %25 : vector<8x2x512xf32>
    %27 = vector.broadcast %21 : vector<8x2x1xf32> to vector<8x2x512xf32>
    %28 = arith.mulf %26, %27 : vector<8x2x512xf32>
    %29 = vector.broadcast %22 : vector<8x2x1xf32> to vector<8x2x512xf32>
    %30 = arith.addf %28, %29 : vector<8x2x512xf32>
    %cst_15 = arith.constant 0.000000e+00 : f32
    %31 = vector.broadcast %cst_15 : f32 to vector<8x2x512xf32>
    %32 = arith.maximumf %30, %31 : vector<8x2x512xf32>
    %c0_16 = arith.constant 0 : index
    %c0_17 = arith.constant 0 : index
    %c0_18 = arith.constant 0 : index
    %33 = vector.load %arg4[%c0_16, %c0_17, %c0_18] : memref<8x2x512xf32, #tpu.memory_space<vmem>>, vector<8x2x512xf32>
    tpu.vector_store %arg4[%c0_16, %c0_17, %c0_18], %32 {strides = array<i32>} : memref<8x2x512xf32, #tpu.memory_space<vmem>>, vector<8x2x512xf32>,
    return
  }
  func.func @transform_0(%arg0: i32) -> (i32, i32, i32) {
    %c0_i32 = arith.constant 0 : i32
    %c0_i32_0 = arith.constant 0 : i32
    %c0_i32_1 = arith.constant 0 : i32
    return %arg0, %c0_i32, %c0_i32_0 : i32, i32, i32
  }
  func.func @transform_1(%arg0: i32) -> (i32, i32, i32) {
    %c0_i32 = arith.constant 0 : i32
    %c0_i32_0 = arith.constant 0 : i32
    %c0_i32_1 = arith.constant 0 : i32
    return %arg0, %c0_i32, %c0_i32_0 : i32, i32, i32
  }
  func.func @transform_2(%arg0: i32) -> (i32, i32, i32) {
    %c0_i32 = arith.constant 0 : i32
    %c0_i32_0 = arith.constant 0 : i32
    %c0_i32_1 = arith.constant 0 : i32
    return %arg0, %c0_i32, %c0_i32_0 : i32, i32, i32
  }
  func.func @transform_3(%arg0: i32) -> (i32, i32, i32) {
    %c0_i32 = arith.constant 0 : i32
    %c0_i32_0 = arith.constant 0 : i32
    %c0_i32_1 = arith.constant 0 : i32
    return %arg0, %c0_i32, %c0_i32_0 : i32, i32, i32
  }
}

module attributes {stable_mosaic.version = 11 : i64} {
  func.func @_mm_res_kernel(%arg0: i32, %arg1: i32, %arg2: i32, %arg3: memref<256x128xbf16, #tpu.memory_space<vmem>>, %arg4: memref<128x128xbf16, #tpu.memory_space<vmem>>, %arg5: memref<256x128xf32, #tpu.memory_space<vmem>>, %arg6: memref<256x128xf32, #tpu.memory_space<vmem>>, %arg7: memref<256x128xf32, #tpu.memory_space<vmem>>) attributes {dimension_semantics = [#tpu.dimension_semantics<parallel>, #tpu.dimension_semantics<parallel>, #tpu.dimension_semantics<arbitrary>], iteration_bounds = array<i64: 4, 1, 1>, scalar_prefetch = 0 : i64, scratch_operands = 1 : i64, tpu.core_type = #tpu.core_type<tc>, window_params = [{transform_indices = @transform_0, window_bounds = array<i64: 256, 128>}, {transform_indices = @transform_1, window_bounds = array<i64: 128, 128>}, {transform_indices = @transform_2, window_bounds = array<i64: 256, 128>}, {transform_indices = @transform_3, window_bounds = array<i64: 256, 128>}]} {
    %c0_i32 = arith.constant 0 : i32
    %0 = arith.cmpi eq, %arg2, %c0_i32 : i32
    %1 = arith.extui %0 : i1 to i32
    %c0_i32_0 = arith.constant 0 : i32
    %2 = arith.cmpi ne, %1, %c0_i32_0 : i32
    scf.if %2 {
      %cst_10 = arith.constant 0.000000e+00 : f32
      %12 = vector.broadcast %cst_10 : f32 to vector<256x128xf32>
      %c0_11 = arith.constant 0 : index
      %c0_12 = arith.constant 0 : index
      %13 = vector.load %arg7[%c0_11, %c0_12] : memref<256x128xf32, #tpu.memory_space<vmem>>, vector<256x128xf32>
      tpu.vector_store %arg7[%c0_11, %c0_12], %12 {strides = array<i32>} : memref<256x128xf32, #tpu.memory_space<vmem>>, vector<256x128xf32>,
    } else {
    }
    %c0 = arith.constant 0 : index
    %c0_1 = arith.constant 0 : index
    %3 = vector.load %arg7[%c0, %c0_1] : memref<256x128xf32, #tpu.memory_space<vmem>>, vector<256x128xf32>
    %c0_2 = arith.constant 0 : index
    %c0_3 = arith.constant 0 : index
    %4 = vector.load %arg3[%c0_2, %c0_3] : memref<256x128xbf16, #tpu.memory_space<vmem>>, vector<256x128xbf16>
    %c0_4 = arith.constant 0 : index
    %c0_5 = arith.constant 0 : index
    %5 = vector.load %arg4[%c0_4, %c0_5] : memref<128x128xbf16, #tpu.memory_space<vmem>>, vector<128x128xbf16>
    %cst = arith.constant dense<0.000000e+00> : vector<256x128xf32>
    %6 = tpu.matmul %4, %5, %cst {dimension_numbers = #tpu.dot_dimension_numbers<[1], [0], [0], [1], [0, 0, 1, 1], [], []>} : vector<256x128xbf16>, vector<128x128xbf16>, vector<256x128xf32> -> vector<256x128xf32>
    %7 = arith.addf %3, %6 : vector<256x128xf32>
    %c0_6 = arith.constant 0 : index
    %c0_7 = arith.constant 0 : index
    %8 = vector.load %arg7[%c0_6, %c0_7] : memref<256x128xf32, #tpu.memory_space<vmem>>, vector<256x128xf32>
    tpu.vector_store %arg7[%c0_6, %c0_7], %7 {strides = array<i32>} : memref<256x128xf32, #tpu.memory_space<vmem>>, vector<256x128xf32>,
    %c0_i32_8 = arith.constant 0 : i32
    %9 = arith.cmpi eq, %arg2, %c0_i32_8 : i32
    %10 = arith.extui %9 : i1 to i32
    %c0_i32_9 = arith.constant 0 : i32
    %11 = arith.cmpi ne, %10, %c0_i32_9 : i32
    scf.if %11 {
      %c0_10 = arith.constant 0 : index
      %c0_11 = arith.constant 0 : index
      %12 = vector.load %arg7[%c0_10, %c0_11] : memref<256x128xf32, #tpu.memory_space<vmem>>, vector<256x128xf32>
      %c0_12 = arith.constant 0 : index
      %c0_13 = arith.constant 0 : index
      %13 = vector.load %arg5[%c0_12, %c0_13] : memref<256x128xf32, #tpu.memory_space<vmem>>, vector<256x128xf32>
      %14 = arith.addf %12, %13 : vector<256x128xf32>
      %c0_14 = arith.constant 0 : index
      %c0_15 = arith.constant 0 : index
      %15 = vector.load %arg6[%c0_14, %c0_15] : memref<256x128xf32, #tpu.memory_space<vmem>>, vector<256x128xf32>
      tpu.vector_store %arg6[%c0_14, %c0_15], %14 {strides = array<i32>} : memref<256x128xf32, #tpu.memory_space<vmem>>, vector<256x128xf32>,
    } else {
    }
    return
  }
  func.func @transform_0(%arg0: i32, %arg1: i32, %arg2: i32) -> (i32, i32) {
    %c0_i32 = arith.constant 0 : i32
    return %arg0, %arg2 : i32, i32
  }
  func.func @transform_1(%arg0: i32, %arg1: i32, %arg2: i32) -> (i32, i32) {
    %c0_i32 = arith.constant 0 : i32
    return %arg2, %arg1 : i32, i32
  }
  func.func @transform_2(%arg0: i32, %arg1: i32, %arg2: i32) -> (i32, i32) {
    %c0_i32 = arith.constant 0 : i32
    return %arg0, %arg1 : i32, i32
  }
  func.func @transform_3(%arg0: i32, %arg1: i32, %arg2: i32) -> (i32, i32) {
    %c0_i32 = arith.constant 0 : i32
    return %arg0, %arg1 : i32, i32
  }
}

</mosaic_0001>

<bundles_post_ra>
// kernel: _lambda_.12
= control target key start
LH: loop header
LB: loop body
LE: loop exit
PB: predicated region body
PF: predicated region fallthrough
CT: control target
= control target key end

     0   :  { %v910_v0 = vmov 0   ;;  %vm129_vm0 = vcmask 1043456   ;;  %s1462_s1 = inlined_call_operand.vmem [shape: f32[8,4,1], index: 1, kind: input, shape index: {}]   ;;  %s1463_s0 = inlined_call_operand.vmem [shape: f32[8,4,512], index: 0, kind: input, shape index: {}]   ;;  %s1464_s2 = inlined_call_operand.vmem [shape: f32[8,4,1], index: 2, kind: input, shape index: {}]   ;;  %s1465_s3 = inlined_call_operand.vmem [shape: f32[8,4,512], index: 3, kind: output, shape index: {}]  }
   0x1   :  { %892 = vset.pattern.permute.xlu2 %v910_v0  ;;  %v630_v1 = vld [vmem:[%s1462_s1 + $0x4] sm:$0xf]  ;;  %v943_v3 = vld [vmem:[%s1463_s0 + $0x8] sm:$0xff]  ;;  %891 = vset.pattern.permute.xlu1 %v910_v0  ;;  %v950_v4 = vld [vmem:[%s1463_s0 + $0x10] sm:$0xff] }
   0x2   :  { %v938_v2 = vld [vmem:[%s1463_s0] sm:$0xff]  ;;  %683 = vperm.xlu2 %892, %v630_v1   ;;  %893 = vset.pattern.permute.xlu0 %v910_v0  ;;  %48 = vst [vmem:[#allocation1 + $0x10] ss:$2 sm:$0xff] %v943_v3  ;;  %v955_v5 = vld [vmem:[%s1463_s0 + $0x18] sm:$0xff]  ;;  %v967_v7 = vld [vmem:[%s1463_s0 + $0x28] sm:$0xff] }
   0x3   :  { %46 = vst [vmem:[#allocation1] ss:$2 sm:$0xff] %v938_v2  ;;  %v962_v6 = vld [vmem:[%s1463_s0 + $0x20] sm:$0xff]  ;;  %v972_v10 = vld [vmem:[%s1463_s0 + $0x30] sm:$0xff]  ;;  %v981_v16 = vld [vmem:[%s1463_s0 + $0x38] sm:$0xff] }
   0x4   :  { %54 = vst [vmem:[#allocation1 + $0x20] ss:$2 sm:$0xff] %v950_v4  ;;  %v993_v29 = vld [vmem:[%s1463_s0 + $0x40] sm:$0xff]  ;;  %v998_v30 = vld [vmem:[%s1463_s0 + $0x48] sm:$0xff]  ;;  %v1004_v35 = vld [vmem:[%s1463_s0 + $0x50] sm:$0xff] }
   0x5   :  { %56 = vst [vmem:[#allocation1 + $0x30] ss:$2 sm:$0xff] %v955_v5  ;;  %v1013_v41 = vld [vmem:[%s1463_s0 + $0x58] sm:$0xff]  ;;  %v1025_v53 = vld [vmem:[%s1463_s0 + $0x68] sm:$0xff]  ;;  %v1030_v56 = vld [vmem:[%s1463_s0 + $0x60] sm:$0xff] }
   0x6   :  { %v1037_v63 = vld [vmem:[%s1463_s0 + $0x70] sm:$0xff]  ;;  %v1042_v0 = vld [vmem:[%s1463_s0 + $0x78] sm:$0xff] }
   0x9   :  { %v51_v11 = vld.sshfl [vmem:[#allocation1 + $0x10] sm:$0xff pattern:$0x75316420]  ;;  %v52_v12 = vld.sshfl [vmem:[#allocation1 + $0x18] sm:$0xff pattern:$0x75316420] }
   0xa   :  { %v49_v8 = vld.sshfl [vmem:[#allocation1] sm:$0xff pattern:$0x75316420]  ;;  %v50_v9 = vld.sshfl [vmem:[#allocation1 + $0x8] sm:$0xff pattern:$0x75316420] }
   0xb   :  { %62 = vst [vmem:[#allocation1 + $0x10] ss:$2 sm:$0xff] %v967_v7  ;;  %v130_v13 = vsel %vm129_vm0, %v49_v8, 0.0  ;;  %v131_v14 = vsel %vm129_vm0, %v50_v9, 0.0  ;;  %v133_v15 = vsel %vm129_vm0, %v51_v11, 0.0  ;;  %v135_v18 = vsel %vm129_vm0, %v52_v12, 0.0 }
   0xc   :  { %v132_v17 = vadd.f32 %v131_v14, %v130_v13  ;;  %61 = vst [vmem:[#allocation1] ss:$2 sm:$0xff] %v962_v6  ;;  %v57_v19 = vld.sshfl [vmem:[#allocation1 + $0x20] sm:$0xff pattern:$0x75316420] }
   0xd   :  { %v58_v20 = vld.sshfl [vmem:[#allocation1 + $0x28] sm:$0xff pattern:$0x75316420]  ;;  %v59_v21 = vld.sshfl [vmem:[#allocation1 + $0x30] sm:$0xff pattern:$0x75316420] }
   0xe   :  { %v134_v22 = vadd.f32 %v133_v15, %v132_v17  ;;  %v60_v23 = vld.sshfl [vmem:[#allocation1 + $0x38] sm:$0xff pattern:$0x75316420]  ;;  %67 = vst [vmem:[#allocation1 + $0x20] ss:$2 sm:$0xff] %v972_v10  ;;  %v139_v24 = vsel %vm129_vm0, %v57_v19, 0.0  ;;  %v259_v15 = vmul.f32 %v943_v3, %v943_v3  ;;  %v258_v19 = vmul.f32 %v938_v2, %v938_v2 }
   0xf   :  { %68 = vst [vmem:[#allocation1 + $0x30] ss:$2 sm:$0xff] %v981_v16  ;;  %v140_v25 = vsel %vm129_vm0, %v58_v20, 0.0  ;;  %v142_v26 = vsel %vm129_vm0, %v59_v21, 0.0  ;;  %v144_v31 = vsel %vm129_vm0, %v60_v23, 0.0 }
  0x10   :  { %v136_v27 = vadd.f32 %v135_v18, %v134_v22  ;;  %v141_v28 = vadd.f32 %v140_v25, %v139_v24 }
  0x12   :  { %137 = vadd.xlane.f32.xlu0 %v136_v27  ;;  %v65_v32 = vld.sshfl [vmem:[#allocation1 + $0x10] sm:$0xff pattern:$0x75316420]  ;;  %v66_v33 = vld.sshfl [vmem:[#allocation1 + $0x18] sm:$0xff pattern:$0x75316420]  ;;  %v143_v34 = vadd.f32 %v142_v26, %v141_v28  ;;  %v260_v27 = vmul.f32 %v950_v4, %v950_v4  ;;  %v261_v28 = vmul.f32 %v955_v5, %v955_v5 }
  0x13   :  { %v63_v36 = vld.sshfl [vmem:[#allocation1] sm:$0xff pattern:$0x75316420]  ;;  %v64_v37 = vld.sshfl [vmem:[#allocation1 + $0x8] sm:$0xff pattern:$0x75316420] }
  0x14   :  { %74 = vst [vmem:[#allocation1 + $0x10] ss:$2 sm:$0xff] %v998_v30  ;;  %v148_v38 = vsel %vm129_vm0, %v63_v36, 0.0  ;;  %v149_v39 = vsel %vm129_vm0, %v64_v37, 0.0  ;;  %v151_v40 = vsel %vm129_vm0, %v65_v32, 0.0  ;;  %v153_v43 = vsel %vm129_vm0, %v66_v33, 0.0 }
  0x15   :  { %v150_v42 = vadd.f32 %v149_v39, %v148_v38  ;;  %73 = vst [vmem:[#allocation1] ss:$2 sm:$0xff] %v993_v29  ;;  %v69_v44 = vld.sshfl [vmem:[#allocation1 + $0x20] sm:$0xff pattern:$0x75316420]  ;;  %v145_v45 = vadd.f32 %v144_v31, %v143_v34 }
  0x16   :  { %v70_v46 = vld.sshfl [vmem:[#allocation1 + $0x28] sm:$0xff pattern:$0x75316420]  ;;  %v71_v47 = vld.sshfl [vmem:[#allocation1 + $0x30] sm:$0xff pattern:$0x75316420] }
  0x17   :  { %v152_v48 = vadd.f32 %v151_v40, %v150_v42  ;;  %v72_v49 = vld.sshfl [vmem:[#allocation1 + $0x38] sm:$0xff pattern:$0x75316420]  ;;  %79 = vst [vmem:[#allocation1 + $0x20] ss:$2 sm:$0xff] %v1004_v35  ;;  %v157_v50 = vsel %vm129_vm0, %v69_v44, 0.0  ;;  %v263_v44 = vmul.f32 %v967_v7, %v967_v7 }
  0x18   :  { %80 = vst [vmem:[#allocation1 + $0x30] ss:$2 sm:$0xff] %v1013_v41  ;;  %v158_v51 = vsel %vm129_vm0, %v70_v46, 0.0  ;;  %v160_v52 = vsel %vm129_vm0, %v71_v47, 0.0  ;;  %v162_v61 = vsel %vm129_vm0, %v72_v49, 0.0 }
  0x19   :  { %v154_v54 = vadd.f32 %v153_v43, %v152_v48  ;;  %v159_v55 = vadd.f32 %v158_v51, %v157_v50  ;;  %v262_v48 = vmul.f32 %v962_v6, %v962_v6 }
  0x1a   :  { %146 = vadd.xlane.f32.xlu0 %v145_v45 }
  0x1b   :  { %v77_v57 = vld.sshfl [vmem:[#allocation1 + $0x10] sm:$0xff pattern:$0x75316420]  ;;  %v78_v58 = vld.sshfl [vmem:[#allocation1 + $0x18] sm:$0xff pattern:$0x75316420]  ;;  %155 = vadd.xlane.f32.xlu1 %v154_v54  ;;  %v161_v59 = vadd.f32 %v160_v52, %v159_v55 }
  0x1c   :  { %86 = vst [vmem:[#allocation1 + $0x10] ss:$2 sm:$0xff] %v1025_v53  ;;  %v75_v60 = vld.sshfl [vmem:[#allocation1] sm:$0xff pattern:$0x75316420]  ;;  %v169_v18 = vsel %vm129_vm0, %v77_v57, 0.0 }
  0x1d   :  { %v76_v62 = vld.sshfl [vmem:[#allocation1 + $0x8] sm:$0xff pattern:$0x75316420]  ;;  %v166_v1 = vsel %vm129_vm0, %v75_v60, 0.0  ;;  %v163_v13 = vadd.f32 %v162_v61, %v161_v59  ;;  %v171_v23 = vsel %vm129_vm0, %v78_v58, 0.0  ;;  %v264_v58 = vmul.f32 %v972_v10, %v972_v10 }
  0x1e   :  { %85 = vst [vmem:[#allocation1] ss:$2 sm:$0xff] %v1030_v56  ;;  %v81_v8 = vld.sshfl [vmem:[#allocation1 + $0x20] sm:$0xff pattern:$0x75316420]  ;;  %v167_v9 = vsel %vm129_vm0, %v76_v62, 0.0  ;;  %v265_v61 = vmul.f32 %v981_v16, %v981_v16 }
  0x1f   :  { %v82_v11 = vld.sshfl [vmem:[#allocation1 + $0x28] sm:$0xff pattern:$0x75316420]  ;;  %v83_v12 = vld.sshfl [vmem:[#allocation1 + $0x30] sm:$0xff pattern:$0x75316420]  ;;  %v168_v14 = vadd.f32 %v167_v9, %v166_v1 }
  0x20   :  { %v84_v17 = vld.sshfl [vmem:[#allocation1 + $0x38] sm:$0xff pattern:$0x75316420]  ;;  %91 = vst [vmem:[#allocation1 + $0x20] ss:$2 sm:$0xff] %v1037_v63  ;;  %v175_v24 = vsel %vm129_vm0, %v81_v8, 0.0 }
  0x21   :  { %92 = vst [vmem:[#allocation1 + $0x30] ss:$2 sm:$0xff] %v1042_v0  ;;  %v170_v22 = vadd.f32 %v169_v18, %v168_v14  ;;  %v176_v25 = vsel %vm129_vm0, %v82_v11, 0.0  ;;  %v178_v26 = vsel %vm129_vm0, %v83_v12, 0.0  ;;  %v180_v54 = vsel %vm129_vm0, %v84_v17, 0.0 }
  0x22   :  { %v177_v43 = vadd.f32 %v176_v25, %v175_v24  ;;  %v266_v12 = vmul.f32 %v993_v29, %v993_v29 }
  0x23   :  { %164 = vadd.xlane.f32.xlu1 %v163_v13  ;;  %v89_v20 = vld.sshfl [vmem:[#allocation1 + $0x10] sm:$0xff pattern:$0x75316420]  ;;  %v90_v21 = vld.sshfl [vmem:[#allocation1 + $0x18] sm:$0xff pattern:$0x75316420]  ;;  %v172_v42 = vadd.f32 %v171_v23, %v170_v22 }
  0x24   :  { %292 = vst [vmem:[#allocation1 + $0x10] ss:$2 sm:$0xff] %v259_v15  ;;  %v187_v36 = vsel %vm129_vm0, %v89_v20, 0.0  ;;  %v189_v37 = vsel %vm129_vm0, %v90_v21, 0.0  ;;  %v179_v50 = vadd.f32 %v178_v26, %v177_v43  ;;  %v267_v15 = vmul.f32 %v998_v30, %v998_v30 }
  0x25   :  { %v87_v31 = vld.sshfl [vmem:[#allocation1] sm:$0xff pattern:$0x75316420]  ;;  %v88_v32 = vld.sshfl [vmem:[#allocation1 + $0x8] sm:$0xff pattern:$0x75316420] }
  0x26   :  { %v184_v33 = vsel %vm129_vm0, %v87_v31, 0.0  ;;  %v185_v34 = vsel %vm129_vm0, %v88_v32, 0.0  ;;  %290 = vst [vmem:[#allocation1] ss:$2 sm:$0xff] %v258_v19  ;;  %v181_v62 = vadd.f32 %v180_v54, %v179_v50  ;;  %v268_v31 = vmul.f32 %v1004_v35, %v1004_v35 }
  0x27   :  { %v1066_v38 = vld.sshfl [vmem:[#allocation1 + $0x20] sm:$0xff pattern:$0x75316420]  ;;  %v1068_v39 = vld.sshfl [vmem:[#allocation1 + $0x28] sm:$0xff pattern:$0x75316420]  ;;  %v186_v40 = vadd.f32 %v185_v34, %v184_v33  ;;  %v269_v34 = vmul.f32 %v1013_v41, %v1013_v41  ;;  %v271_v50 = vmul.f32 %v1025_v53, %v1025_v53 }
  0x28   :  { %v1072_v45 = vld.sshfl [vmem:[#allocation1 + $0x30] sm:$0xff pattern:$0x75316420]  ;;  %v1074_v46 = vld.sshfl [vmem:[#allocation1 + $0x38] sm:$0xff pattern:$0x75316420] }
  0x29   :  { %298 = vst [vmem:[#allocation1 + $0x20] ss:$2 sm:$0xff] %v260_v27  ;;  %v188_v47 = vadd.f32 %v187_v36, %v186_v40  ;;  %v629_v36 = vld [vmem:[%s1462_s1] sm:$0xf] }
  0x2a   :  { %300 = vst [vmem:[#allocation1 + $0x30] ss:$2 sm:$0xff] %v261_v28 }
  0x2b   :  { %v190_v49 = vadd.f32 %v189_v37, %v188_v47  ;;  %173 = vadd.xlane.f32.xlu2 %v172_v42  ;;  %v295_v51 = vld.sshfl [vmem:[#allocation1 + $0x10] sm:$0xff pattern:$0x75316420]  ;;  %v296_v52 = vld.sshfl [vmem:[#allocation1 + $0x18] sm:$0xff pattern:$0x75316420] }
  0x2c   :  { %306 = vst [vmem:[#allocation1 + $0x10] ss:$2 sm:$0xff] %v263_v44  ;;  %v376_v8 = vsel %vm129_vm0, %v295_v51, 0.0  ;;  %v378_v23 = vsel %vm129_vm0, %v296_v52, 0.0  ;;  %v270_v44 = vmul.f32 %v1030_v56, %v1030_v56 }
  0x2d   :  { %191 = vadd.xlane.f32.xlu0 %v190_v49  ;;  %v293_v55 = vld.sshfl [vmem:[#allocation1] sm:$0xff pattern:$0x75316420]  ;;  %v294_v57 = vld.sshfl [vmem:[#allocation1 + $0x8] sm:$0xff pattern:$0x75316420] }
  0x2e   :  { %v373_v59 = vsel %vm129_vm0, %v293_v55, 0.0  ;;  %v374_v60 = vsel %vm129_vm0, %v294_v57, 0.0  ;;  %305 = vst [vmem:[#allocation1] ss:$2 sm:$0xff] %v262_v48 }
  0x2f   :  { %v375_v1 = vadd.f32 %v374_v60, %v373_v59 }
  0x30   :  { %v301_v9 = vld.sshfl [vmem:[#allocation1 + $0x20] sm:$0xff pattern:$0x75316420]  ;;  %v302_v11 = vld.sshfl [vmem:[#allocation1 + $0x28] sm:$0xff pattern:$0x75316420] }
  0x31   :  { %v303_v13 = vld.sshfl [vmem:[#allocation1 + $0x30] sm:$0xff pattern:$0x75316420]  ;;  %v304_v14 = vld.sshfl [vmem:[#allocation1 + $0x38] sm:$0xff pattern:$0x75316420]  ;;  %v377_v22 = vadd.f32 %v376_v8, %v375_v1  ;;  %v272_v1 = vmul.f32 %v1037_v63, %v1037_v63 }
  0x32   :  { %v382_v17 = vsel %vm129_vm0, %v301_v9, 0.0  ;;  %v383_v18 = vsel %vm129_vm0, %v302_v11, 0.0  ;;  %v385_v19 = vsel %vm129_vm0, %v303_v13, 0.0  ;;  %311 = vst [vmem:[#allocation1 + $0x20] ss:$2 sm:$0xff] %v264_v58  ;;  %v387_v21 = vsel %vm129_vm0, %v304_v14, 0.0 }
  0x33   :  { %v384_v20 = vadd.f32 %v383_v18, %v382_v17  ;;  %312 = vst [vmem:[#allocation1 + $0x30] ss:$2 sm:$0xff] %v265_v61  ;;  %182 = vadd.xlane.f32.xlu2 %v181_v62  ;;  %v1095_v24 = vld.sshfl [vmem:[#allocation1 + $0x10] sm:$0xff pattern:$0x75316420]  ;;  %v379_v33 = vadd.f32 %v378_v23, %v377_v22  ;;  %v273_v11 = vmul.f32 %v1042_v0, %v1042_v0 }
  0x34   :  { %v1097_v25 = vld.sshfl [vmem:[#allocation1 + $0x18] sm:$0xff pattern:$0x75316420] }
  0x35   :  { %v386_v26 = vadd.f32 %v385_v19, %v384_v20  ;;  %v1099_v27 = vld.sshfl [vmem:[#allocation1] sm:$0xff pattern:$0x75316420]  ;;  %v1101_v28 = vld.sshfl [vmem:[#allocation1 + $0x8] sm:$0xff pattern:$0x75316420] }
  0x36   :  { %317 = vst [vmem:[#allocation1] ss:$2 sm:$0xff] %v266_v12 }
  0x37   :  { %v388_v32 = vadd.f32 %v387_v21, %v386_v26  ;;  %318 = vst [vmem:[#allocation1 + $0x10] ss:$2 sm:$0xff] %v267_v15 }
  0x39   :  { %389 = vadd.xlane.f32.xlu0 %v388_v32  ;;  %v313_v37 = vld.sshfl [vmem:[#allocation1 + $0x20] sm:$0xff pattern:$0x75316420]  ;;  %v314_v40 = vld.sshfl [vmem:[#allocation1 + $0x28] sm:$0xff pattern:$0x75316420] }
  0x3a   :  { %v315_v42 = vld.sshfl [vmem:[#allocation1 + $0x30] sm:$0xff pattern:$0x75316420]  ;;  %v316_v43 = vld.sshfl [vmem:[#allocation1 + $0x38] sm:$0xff pattern:$0x75316420] }
  0x3b   :  { %380 = vadd.xlane.f32.xlu2 %v379_v33  ;;  %323 = vst [vmem:[#allocation1 + $0x20] ss:$2 sm:$0xff] %v268_v31  ;;  %v400_v47 = vsel %vm129_vm0, %v313_v37, 0.0  ;;  %v401_v48 = vsel %vm129_vm0, %v314_v40, 0.0  ;;  %v403_v49 = vsel %vm129_vm0, %v315_v42, 0.0  ;;  %v405_v52 = vsel %vm129_vm0, %v316_v43, 0.0 }
  0x3c   :  { %679 = vperm.xlu1 %891, %v629_v36   ;;  %324 = vst [vmem:[#allocation1 + $0x30] ss:$2 sm:$0xff] %v269_v34  ;;  %v402_v51 = vadd.f32 %v401_v48, %v400_v47 }
  0x3d   :  { %v319_v54 = vld.sshfl [vmem:[#allocation1] sm:$0xff pattern:$0x75316420]  ;;  %v320_v55 = vld.sshfl [vmem:[#allocation1 + $0x8] sm:$0xff pattern:$0x75316420] }
  0x3e   :  { %v321_v57 = vld.sshfl [vmem:[#allocation1 + $0x10] sm:$0xff pattern:$0x75316420]  ;;  %v322_v58 = vld.sshfl [vmem:[#allocation1 + $0x18] sm:$0xff pattern:$0x75316420]  ;;  %v404_v59 = vadd.f32 %v403_v49, %v402_v51 }
  0x3f   :  { %v409_v60 = vsel %vm129_vm0, %v319_v54, 0.0  ;;  %v410_v61 = vsel %vm129_vm0, %v320_v55, 0.0  ;;  %v412_v62 = vsel %vm129_vm0, %v321_v57, 0.0  ;;  %329 = vst [vmem:[#allocation1] ss:$2 sm:$0xff] %v270_v44  ;;  %v414_v12 = vsel %vm129_vm0, %v322_v58, 0.0 }
  0x40   :  { %v411_v8 = vadd.f32 %v410_v61, %v409_v60  ;;  %330 = vst [vmem:[#allocation1 + $0x10] ss:$2 sm:$0xff] %v271_v50  ;;  %v406_v9 = vadd.f32 %v405_v52, %v404_v59  ;;  %v193_v55 = vsel %vm129_vm0, %v1066_v38, 0.0  ;;  %v194_v57 = vsel %vm129_vm0, %v1068_v39, 0.0  ;;  %v631_v39 = vld [vmem:[%s1462_s1 + $0x8] sm:$0xf] }
  0x41   :  { %v195_v58 = vadd.f32 %v194_v57, %v193_v55  ;;  %v196_v59 = vsel %vm129_vm0, %v1072_v45, 0.0  ;;  %v198_v61 = vsel %vm129_vm0, %v1074_v46, 0.0  ;;  %v394_v38 = vsel %vm129_vm0, %v1095_v24, 0.0  ;;  %v632_v45 = vld [vmem:[%s1462_s1 + $0xc] sm:$0xf] }
  0x42   :  { %v413_v13 = vadd.f32 %v412_v62, %v411_v8  ;;  %v325_v14 = vld.sshfl [vmem:[#allocation1 + $0x20] sm:$0xff pattern:$0x75316420]  ;;  %v326_v15 = vld.sshfl [vmem:[#allocation1 + $0x28] sm:$0xff pattern:$0x75316420] }
  0x43   :  { %v327_v17 = vld.sshfl [vmem:[#allocation1 + $0x30] sm:$0xff pattern:$0x75316420]  ;;  %v328_v18 = vld.sshfl [vmem:[#allocation1 + $0x38] sm:$0xff pattern:$0x75316420]  ;;  %407 = vadd.xlane.f32.xlu2 %v406_v9  ;;  %v197_v60 = vadd.f32 %v196_v59, %v195_v58 }
  0x44   :  { %v415_v19 = vadd.f32 %v414_v12, %v413_v13  ;;  %335 = vst [vmem:[#allocation1 + $0x20] ss:$2 sm:$0xff] %v272_v1  ;;  %v391_v62 = vsel %vm129_vm0, %v1099_v27, 0.0  ;;  %v392_v1 = vsel %vm129_vm0, %v1101_v28, 0.0  ;;  %v396_v27 = vsel %vm129_vm0, %v1097_v25, 0.0 }
  0x45   :  { %336 = vst [vmem:[#allocation1 + $0x30] ss:$2 sm:$0xff] %v273_v11  ;;  %v199_v8 = vadd.f32 %v198_v61, %v197_v60  ;;  %v393_v9 = vadd.f32 %v392_v1, %v391_v62  ;;  %v418_v28 = vsel %vm129_vm0, %v325_v14, 0.0  ;;  %v419_v11 = vsel %vm129_vm0, %v326_v15, 0.0 }
  0x46   :  { %416 = vadd.xlane.f32.xlu0 %v415_v19  ;;  %v331_v20 = vld.sshfl [vmem:[#allocation1] sm:$0xff pattern:$0x75316420]  ;;  %v332_v21 = vld.sshfl [vmem:[#allocation1 + $0x8] sm:$0xff pattern:$0x75316420]  ;;  %v420_v12 = vadd.f32 %v419_v11, %v418_v28 }
  0x47   :  { %v333_v22 = vld.sshfl [vmem:[#allocation1 + $0x10] sm:$0xff pattern:$0x75316420]  ;;  %v334_v23 = vld.sshfl [vmem:[#allocation1 + $0x18] sm:$0xff pattern:$0x75316420]  ;;  %v395_v46 = vadd.f32 %v394_v38, %v393_v9 }
  0x48   :  { %v427_v26 = vsel %vm129_vm0, %v331_v20, 0.0  ;;  %v428_v31 = vsel %vm129_vm0, %v332_v21, 0.0  ;;  %v430_v32 = vsel %vm129_vm0, %v333_v22, 0.0  ;;  %v432_v34 = vsel %vm129_vm0, %v334_v23, 0.0  ;;  %v638_v19 = vld [vmem:[%s1464_s2 + $0x4] sm:$0xf] }
  0x49   :  { %v429_v33 = vadd.f32 %v428_v31, %v427_v26  ;;  %v397_v24 = vadd.f32 %v396_v27, %v395_v46  ;;  %v421_v13 = vsel %vm129_vm0, %v327_v17, 0.0  ;;  %v634_v20 = vld [vmem:[%s1462_s1 + $0x14] sm:$0xf]  ;;  %v423_v14 = vsel %vm129_vm0, %v328_v18, 0.0  ;;  %v636_v21 = vld [vmem:[%s1462_s1 + $0x1c] sm:$0xf] }
  0x4a   :  { %v422_v25 = vadd.f32 %v421_v13, %v420_v12  ;;  %v641_v17 = vld [vmem:[%s1464_s2 + $0x10] sm:$0xf]  ;;  %v639_v22 = vld [vmem:[%s1464_s2 + $0x8] sm:$0xf]  ;;  %v644_v18 = vld [vmem:[%s1464_s2 + $0x1c] sm:$0xf] }
  0x4b   :  { %v337_v36 = vld.sshfl [vmem:[#allocation1 + $0x20] sm:$0xff pattern:$0x75316420]  ;;  %v338_v37 = vld.sshfl [vmem:[#allocation1 + $0x28] sm:$0xff pattern:$0x75316420]  ;;  %v431_v40 = vadd.f32 %v430_v32, %v429_v33 }
  0x4c   :  { %v339_v42 = vld.sshfl [vmem:[#allocation1 + $0x30] sm:$0xff pattern:$0x75316420]  ;;  %v340_v43 = vld.sshfl [vmem:[#allocation1 + $0x38] sm:$0xff pattern:$0x75316420]  ;;  %v424_v15 = vadd.f32 %v423_v14, %v422_v25 }
  0x4d   :  { %v436_v44 = vsel %vm129_vm0, %v337_v36, 0.0  ;;  %v437_v47 = vsel %vm129_vm0, %v338_v37, 0.0  ;;  %v439_v48 = vsel %vm129_vm0, %v339_v42, 0.0  ;;  %v433_v50 = vadd.f32 %v432_v34, %v431_v40  ;;  %v642_v23 = vld [vmem:[%s1464_s2 + $0x14] sm:$0xf] }
  0x4e   :  { %v438_v49 = vadd.f32 %v437_v47, %v436_v44  ;;  %v441_v51 = vsel %vm129_vm0, %v340_v43, 0.0  ;;  %v633_v26 = vld [vmem:[%s1462_s1 + $0x10] sm:$0xf]  ;;  %v635_v32 = vld [vmem:[%s1462_s1 + $0x18] sm:$0xf] }
  0x4f   :  { %434 = vadd.xlane.f32.xlu2 %v433_v50  ;;  %v637_v37 = vld [vmem:[%s1464_s2] sm:$0xf]  ;;  %v640_v47 = vld [vmem:[%s1464_s2 + $0xc] sm:$0xf] }
  0x50   :  { %v440_v52 = vadd.f32 %v439_v48, %v438_v49 }
  0x52   :  { %v442_v54 = vadd.f32 %v441_v51, %v440_v52  ;;  %v643_v52 = vld [vmem:[%s1464_s2 + $0x18] sm:$0xf] }
  0x54   :  { %443 = vadd.xlane.f32.xlu0 %v442_v54 }
  0x5c   :  { %v1191_v40 = vpop.permute.xlu2 %683 }
  0x66   :  { %200 = vadd.xlane.f32.xlu1 %v199_v8 }
  0x67   :  { %691 = vperm.xlu2 %892, %v632_v45  }
  0x68   :  { %687 = vperm.xlu0 %893, %v631_v39  }
  0x6e   :  { %398 = vadd.xlane.f32.xlu1 %v397_v24 }
  0x6f   :  { %699 = vperm.xlu2 %892, %v634_v20  }
  0x70   :  { %771 = vperm.xlu0 %893, %v638_v19  }
  0x76   :  { %425 = vadd.xlane.f32.xlu1 %v424_v15 }
  0x77   :  { %707 = vperm.xlu2 %892, %v636_v21  }
  0x78   :  { %783 = vperm.xlu0 %893, %v641_v17  }
  0x7f   :  { %775 = vperm.xlu2 %892, %v639_v22  }
  0x80   :  { %795 = vperm.xlu0 %893, %v644_v18  }
  0x85   :  { %v138_v31 = vpop.xlane.xlu0 %137 }
  0x86   :  { %v202_v46 = vsel %vm129_vm0, %v138_v31, 0.0 }
  0x87   :  { %787 = vperm.xlu2 %892, %v642_v23   ;;  %v203_v19 = vrot.slane %v202_v46, 4 }
  0x89   :  { %v204_v17 = vadd.f32 %v203_v19, %v202_v46 }
  0x8d   :  { %v147_v33 = vpop.xlane.xlu0 %146 }
  0x8e   :  { %v209_v34 = vsel %vm129_vm0, %v147_v33, 0.0  ;;  %v156_v38 = vpop.xlane.xlu1 %155 }
  0x8f   :  { %695 = vperm.xlu1 %891, %v633_v26   ;;  %v210_v36 = vrot.slane %v209_v34, 4 }
  0x91   :  { %v211_v42 = vadd.f32 %v210_v36, %v209_v34 }
  0x93   :  { %v212_v44 = vrot.slane %v211_v42, 2 }
  0x95   :  { %v213_v49 = vadd.f32 %v212_v44, %v211_v42 }
  0x96   :  { %v165_v31 = vpop.xlane.xlu1 %164 }
  0x97   :  { %703 = vperm.xlu1 %891, %v635_v32   ;;  %v214_v50 = vrot.slane %v213_v49, 1  ;;  %v205_v32 = vrot.slane %v204_v17, 2  ;;  %v223_v34 = vsel %vm129_vm0, %v165_v31, 0.0 }
  0x99   :  { %v215_v57 = vadd.f32 %v214_v50, %v213_v49  ;;  %v224_v49 = vrot.slane %v223_v34, 4 }
  0x9b   :  { %v1205_v62 = vmul.f32 0.00048828125, %v215_v57 }
  0x9d   :  { %v518_v39 = vmul.f32 %v1205_v62, %v1205_v62 }
  0x9e   :  { %v174_v48 = vpop.xlane.xlu2 %173 }
  0x9f   :  { %767 = vperm.xlu1 %891, %v637_v37   ;;  %v230_v60 = vsel %vm129_vm0, %v174_v48, 0.0  ;;  %v206_v48 = vadd.f32 %v205_v32, %v204_v17 }
  0xa0   :  { %v1193_v43 = vpop.xlane.xlu0 %191  ;;  %v231_v8 = vrot.slane %v230_v60, 4 }
  0xa2   :  { %v232_v27 = vadd.f32 %v231_v8, %v230_v60  ;;  %v207_v60 = vrot.slane %v206_v48, 1 }
  0xa4   :  { %v233_v25 = vrot.slane %v232_v27, 2 }
  0xa6   :  { %v1202_v59 = vpop.xlane.xlu2 %182  ;;  %v234_v18 = vadd.f32 %v233_v25, %v232_v27 }
  0xa7   :  { %779 = vperm.xlu1 %891, %v640_v47  }
  0xa8   :  { %v235_v36 = vrot.slane %v234_v18, 1 }
  0xaa   :  { %v236_v50 = vadd.f32 %v235_v36, %v234_v18 }
  0xac   :  { %v390_v51 = vpop.xlane.xlu0 %389 }
  0xad   :  { %v452_v54 = vsel %vm129_vm0, %v390_v51, 0.0 }
  0xae   :  { %v453_v55 = vrot.slane %v452_v54, 4  ;;  %v381_v24 = vpop.xlane.xlu2 %380  ;;  %v1228_v25 = vpop.permute.xlu1 %679 }
  0xaf   :  { %791 = vperm.xlu1 %891, %v643_v52   ;;  %v445_v21 = vsel %vm129_vm0, %v381_v24, 0.0 }
  0xb0   :  { %v454_v58 = vadd.f32 %v453_v55, %v452_v54  ;;  %v446_v23 = vrot.slane %v445_v21, 4 }
  0xb2   :  { %v455_v61 = vrot.slane %v454_v58, 2  ;;  %v447_v37 = vadd.f32 %v446_v23, %v445_v21 }
  0xb4   :  { %v456_v1 = vadd.f32 %v455_v61, %v454_v58  ;;  %v448_v52 = vrot.slane %v447_v37, 2  ;;  %v216_v61 = vsel %vm129_vm0, %v156_v38, 0.0 }
  0xb6   :  { %v457_v9 = vrot.slane %v456_v1, 1  ;;  %v408_v33 = vpop.xlane.xlu2 %407 }
  0xb7   :  { %v466_v44 = vsel %vm129_vm0, %v408_v33, 0.0 }
  0xb8   :  { %v458_v45 = vadd.f32 %v457_v9, %v456_v1  ;;  %v467_v55 = vrot.slane %v466_v44, 4  ;;  %v225_v1 = vadd.f32 %v224_v49, %v223_v34  ;;  %v244_v9 = vsel %vm129_vm0, %v1193_v43, 0.0 }
  0xb9   :  { %v417_v28 = vpop.xlane.xlu0 %416  ;;  %v245_v19 = vrot.slane %v244_v9, 4 }
  0xba   :  { %v510_v11 = vmul.f32 0.00048828125, %v458_v45  ;;  %v473_v12 = vsel %vm129_vm0, %v417_v28, 0.0  ;;  %v449_v45 = vadd.f32 %v448_v52, %v447_v37  ;;  %v468_v27 = vadd.f32 %v467_v55, %v466_v44 }
  0xbb   :  { %v474_v13 = vrot.slane %v473_v12, 4  ;;  %v246_v32 = vadd.f32 %v245_v19, %v244_v9  ;;  %v237_v37 = vsel %vm129_vm0, %v1202_v59, 0.0 }
  0xbc   :  { %v526_v20 = vsub.f32 %v510_v11, %v518_v39  ;;  %v1226_v39 = vmul.f32 0.00048828125, %v236_v50  ;;  %v217_v11 = vrot.slane %v216_v61, 4  ;;  %v450_v38 = vrot.slane %v449_v45, 1 }
  0xbd   :  { %v475_v14 = vadd.f32 %v474_v13, %v473_v12  ;;  %v208_v12 = vadd.f32 %v207_v60, %v206_v48  ;;  %v226_v13 = vrot.slane %v225_v1, 2  ;;  %v469_v21 = vrot.slane %v468_v27, 2 }
  0xbe   :  { %v534_v15 = vmax.f32 %v526_v20, 0.0  ;;  %v218_v18 = vadd.f32 %v217_v11, %v216_v61  ;;  %v451_v34 = vadd.f32 %v450_v38, %v449_v45  ;;  %v911_v48 = vmov 839922192  }
  0xbf   :  { %v476_v26 = vrot.slane %v475_v14, 2  ;;  %v227_v31 = vadd.f32 %v226_v13, %v225_v1  ;;  %v710_v49 = vunpack.c.l.s4 %v911_v48  ;;  %v647_v45 = vsub.f32 %v950_v4, %v1205_v62 }
  0xc0   :  { %v1212_v22 = vadd.f32 1e-05, %v534_v15  ;;  %v648_v11 = vsub.f32 %v955_v5, %v1205_v62 }
  0xc1   :  { %v477_v42 = vadd.f32 %v476_v26, %v475_v14  ;;  %v521_v14 = vmul.f32 %v1226_v39, %v1226_v39  ;;  %v1233_v26 = vmul.f32 0.00048828125, %v208_v12  ;;  %v228_v52 = vrot.slane %v227_v31, 1 }
  0xc2   :  { %894 = vrsqrt.f32 %v1212_v22  ;;  %v435_v20 = vpop.xlane.xlu2 %434  ;;  %vm565_vm1 = vweird.f32 %v1212_v22 }
  0xc3   :  { %v478_v54 = vrot.slane %v477_v42, 1  ;;  %v487_v43 = vsel %vm129_vm0, %v435_v20, 0.0  ;;  %v229_v12 = vadd.f32 %v228_v52, %v227_v31 }
  0xc4   :  { %v488_v33 = vrot.slane %v487_v43, 4 }
  0xc5   :  { %v479_v46 = vadd.f32 %v478_v54, %v477_v42  ;;  %v470_v42 = vadd.f32 %v469_v21, %v468_v27  ;;  %v247_v54 = vrot.slane %v246_v32, 2 }
  0xc6   :  { %v489_v55 = vadd.f32 %v488_v33, %v487_v43 }
  0xc7   :  { %v444_v57 = vpop.xlane.xlu0 %443  ;;  %v513_v15 = vmul.f32 0.00048828125, %v479_v46  ;;  %v471_v1 = vrot.slane %v470_v42, 1  ;;  %v1247_v46 = vunpack.c.0.s8 %v710_v49  ;;  %v248_v13 = vadd.f32 %v247_v54, %v246_v32 }
  0xc8   :  { %v1217_v47 = vpop.eup %894  ;;  %v494_v58 = vsel %vm129_vm0, %v444_v57, 0.0  ;;  %v238_v57 = vrot.slane %v237_v37, 4  ;;  %v490_v19 = vrot.slane %v489_v55, 2 }
  0xc9   :  { %v560_v51 = vmul.f32 %v1217_v47, %v1212_v22  ;;  %v495_v28 = vrot.slane %v494_v58, 4  ;;  %v529_v36 = vsub.f32 %v513_v15, %v521_v14  ;;  %vm566_vm2 = vweird.f32 %v1217_v47 }
  0xca   :  { %vm567_vm3 = vmor %vm565_vm1, %vm566_vm2  ;;  %v517_v22 = vmul.f32 %v1233_v26, %v1233_v26  ;;  %v239_v20 = vadd.f32 %v238_v57, %v237_v37  ;;  %v472_v43 = vadd.f32 %v471_v1, %v470_v42  ;;  %v249_v5 = vrot.slane %v248_v13, 1 }
  0xcb   :  { %v561_v8 = vmul.f32 %v1217_v47, %v560_v51  ;;  %v496_v17 = vadd.f32 %v495_v28, %v494_v58  ;;  %v219_v51 = vrot.slane %v218_v18, 2  ;;  %v509_v58 = vmul.f32 0.00048828125, %v451_v34 }
  0xcc   :  { %v537_v60 = vmax.f32 %v529_v36, 0.0  ;;  %v1256_v34 = vmul.f32 0.00048828125, %v229_v12  ;;  %v491_v62 = vadd.f32 %v490_v19, %v489_v55  ;;  %v512_v37 = vmul.f32 0.00048828125, %v472_v43 }
  0xcd   :  { %v562_v24 = vmul.f32 0.5, %v561_v8  ;;  %v497_v44 = vrot.slane %v496_v17, 2  ;;  %v525_v38 = vsub.f32 %v509_v58, %v517_v22  ;;  %v250_v57 = vadd.f32 %v249_v5, %v248_v13 }
  0xce   :  { %v1252_v14 = vadd.f32 1e-05, %v537_v60  ;;  %v520_v55 = vmul.f32 %v1256_v34, %v1256_v34  ;;  %v492_v22 = vrot.slane %v491_v62, 1 }
  0xcf   :  { %v563_v23 = vsub.f32 1.5, %v562_v24  ;;  %v498_v59 = vadd.f32 %v497_v44, %v496_v17  ;;  %v220_v24 = vadd.f32 %v219_v51, %v218_v18  ;;  %v716_v17 = vperm.slane %v1191_v40, %v1247_v46 }
  0xd0   :  { %v240_v18 = vrot.slane %v239_v20, 2  ;;  %v533_v31 = vmax.f32 %v525_v38, 0.0  ;;  %896 = vrsqrt.f32 %v1252_v14  ;;  %v1269_v19 = vmul.f32 0.00048828125, %v250_v57  ;;  %v1271_v38 = vpop.permute.xlu2 %691 }
  0xd1   :  { %v564_v50 = vmul.f32 %v1217_v47, %v563_v23  ;;  %v499_v21 = vrot.slane %v498_v59, 1  ;;  %v221_v33 = vrot.slane %v220_v24, 1  ;;  %v493_v43 = vadd.f32 %v492_v22, %v491_v62 }
  0xd2   :  { %vm595_vm4 = vweird.f32 %v1252_v14 }
  0xd3   :  { %v568_v28 = vsel %vm567_vm3, %v1217_v47, %v564_v50  ;;  %v500_v42 = vadd.f32 %v499_v21, %v498_v59  ;;  %v222_v54 = vadd.f32 %v221_v33, %v220_v24  ;;  %v241_v59 = vadd.f32 %v240_v18, %v239_v20 }
  0xd4   :  { %v663_v4 = vmul.f32 %v647_v45, %v568_v28  ;;  %v664_v47 = vmul.f32 %v648_v11, %v568_v28  ;;  %v528_v45 = vsub.f32 %v512_v37, %v520_v55 }
  0xd6   :  { %v751_v44 = vmul.f32 %v716_v17, %v663_v4  ;;  %v752_v50 = vmul.f32 %v716_v17, %v664_v47  ;;  %v1265_v28 = vpop.eup %896  ;;  %v242_v17 = vrot.slane %v241_v59, 1  ;;  %v536_v33 = vmax.f32 %v528_v45, 0.0 }
  0xd7   :  { %vm596_vm5 = vweird.f32 %v1265_v28 }
  0xd8   :  { %vm597_vm6 = vmor %vm595_vm4, %vm596_vm5 }
  0xd9   :  { %v201_v61 = vpop.xlane.xlu1 %200 }
  0xda   :  { %v1242_v8 = vpop.permute.xlu0 %687  ;;  %v251_v9 = vsel %vm129_vm0, %v201_v61, 0.0 }
  0xdb   :  { %v252_v27 = vrot.slane %v251_v9, 4 }
  0xdd   :  { %v253_v15 = vadd.f32 %v252_v27, %v251_v9  ;;  %v1263_v9 = vadd.f32 1e-05, %v533_v31  ;;  %v516_v27 = vmul.f32 0.00048828125, %v500_v42  ;;  %v523_v31 = vmul.f32 %v1269_v19, %v1269_v19 }
  0xdf   :  { %v254_v23 = vrot.slane %v253_v15, 2  ;;  %898 = vrsqrt.f32 %v1263_v9  ;;  %vm555_vm8 = vweird.f32 %v1263_v9 }
  0xe1   :  { %v255_v32 = vadd.f32 %v254_v23, %v253_v15  ;;  %v399_v36 = vpop.xlane.xlu1 %398  ;;  %v1273_v15 = vmul.f32 0.00048828125, %v222_v54  ;;  %v590_v23 = vmul.f32 %v1265_v28, %v1252_v14 }
  0xe2   :  { %v772_v48 = vpop.permute.xlu0 %771  ;;  %v459_v49 = vsel %vm129_vm0, %v399_v36, 0.0 }
  0xe3   :  { %v256_v40 = vrot.slane %v255_v32, 1  ;;  %v804_v51 = vperm.slane %v772_v48, %v1247_v46  ;;  %v460_v52 = vrot.slane %v459_v49, 4  ;;  %v519_v48 = vmul.f32 %v1273_v15, %v1273_v15 }
  0xe4   :  { %v650_v14 = vsub.f32 %v967_v7, %v1273_v15 }
  0xe5   :  { %v257_v58 = vadd.f32 %v256_v40, %v255_v32  ;;  %v839_v60 = vadd.f32 %v804_v51, %v751_v44  ;;  %v840_v61 = vadd.f32 %v804_v51, %v752_v50  ;;  %v461_v1 = vadd.f32 %v460_v52, %v459_v49  ;;  %v1296_v54 = vpop.eup %898 }
  0xe6   :  { %v515_v32 = vmul.f32 0.00048828125, %v493_v43  ;;  %v243_v44 = vadd.f32 %v242_v17, %v241_v59  ;;  %v591_v49 = vmul.f32 %v1265_v28, %v590_v23  ;;  %v1292_v40 = vadd.f32 1e-05, %v536_v33 }
  0xe7   :  { %v1267_v11 = vmul.f32 0.00048828125, %v257_v58  ;;  %v855_v12 = vmax.f32 %v839_v60, 0.0  ;;  %v856_v24 = vmax.f32 %v840_v61, 0.0  ;;  %v462_v13 = vrot.slane %v461_v1, 2  ;;  %v1301_v60 = vpop.permute.xlu2 %699 }
  0xe8   :  { %v531_v57 = vsub.f32 %v515_v32, %v523_v31  ;;  %v1299_v58 = vmul.f32 0.00048828125, %v243_v44  ;;  %v592_v61 = vmul.f32 0.5, %v591_v49  ;;  %v649_v31 = vsub.f32 %v962_v6, %v1273_v15 }
  0xe9   :  { %v524_v20 = vmul.f32 %v1267_v11, %v1267_v11  ;;  %871 = vst [vmem:[%s1465_s3 + $0x10] sm:$0xff] %v855_v12  ;;  %v463_v21 = vadd.f32 %v462_v13, %v461_v1  ;;  %v426_v4 = vpop.xlane.xlu1 %425  ;;  %v550_v1 = vmul.f32 %v1296_v54, %v1263_v9  ;;  %vm556_vm9 = vweird.f32 %v1296_v54 }
  0xea   :  { %872 = vst [vmem:[%s1465_s3 + $0x18] sm:$0xff] %v856_v24  ;;  %v480_v47 = vsel %vm129_vm0, %v426_v4, 0.0  ;;  %v784_v13 = vpop.permute.xlu0 %783  ;;  %v593_v43 = vsub.f32 1.5, %v592_v61  ;;  %vm1359_vm14 = vmor %vm555_vm8, %vm556_vm9  ;;  %v646_v6 = vsub.f32 %v943_v3, %v1233_v26  ;;  %v656_v3 = vsub.f32 %v1013_v41, %v1299_v58 }
  0xeb   :  { %v532_v5 = vsub.f32 %v516_v27, %v524_v20  ;;  %v464_v62 = vrot.slane %v463_v21, 1  ;;  %v481_v18 = vrot.slane %v480_v47, 4  ;;  %v539_v27 = vmax.f32 %v531_v57, 0.0 }
  0xec   :  { %v551_v17 = vmul.f32 %v1296_v54, %v550_v1  ;;  %v654_v57 = vsub.f32 %v998_v30, %v1226_v39  ;;  %vm585_vm4 = vweird.f32 %v1292_v40 }
  0xed   :  { %v540_v36 = vmax.f32 %v532_v5, 0.0  ;;  %v465_v37 = vadd.f32 %v464_v62, %v463_v21  ;;  %v482_v42 = vadd.f32 %v481_v18, %v480_v47  ;;  %v522_v21 = vmul.f32 %v1299_v58, %v1299_v58 }
  0xee   :  { %v1317_v33 = vadd.f32 1e-05, %v539_v27  ;;  %v594_v62 = vmul.f32 %v1265_v28, %v593_v43  ;;  %v660_v43 = vsub.f32 %v1042_v0, %v1267_v11 }
  0xef   :  { %v1294_v50 = vadd.f32 1e-05, %v540_v36  ;;  %v511_v51 = vmul.f32 0.00048828125, %v465_v37  ;;  %v483_v52 = vrot.slane %v482_v42, 2  ;;  %v552_v36 = vmul.f32 0.5, %v551_v17 }
  0xf1   :  { %900 = vrsqrt.f32 %v1294_v50  ;;  %v527_v55 = vsub.f32 %v511_v51, %v519_v48  ;;  %v484_v22 = vadd.f32 %v483_v52, %v482_v42  ;;  %v708_v42 = vpop.permute.xlu2 %707  ;;  %v645_v48 = vsub.f32 %v938_v2, %v1233_v26 }
  0xf2   :  { %902 = vrsqrt.f32 %v1292_v40  ;;  %v653_v52 = vsub.f32 %v993_v29, %v1226_v39  ;;  %v553_v1 = vsub.f32 1.5, %v552_v36  ;;  %vm625_vm10 = vweird.f32 %v1294_v50  ;;  %v796_v30 = vpop.permute.xlu0 %795 }
  0xf3   :  { %v535_v59 = vmax.f32 %v527_v55, 0.0  ;;  %v485_v45 = vrot.slane %v484_v22, 1  ;;  %v732_v2 = vperm.slane %v1301_v60, %v1247_v46 }
  0xf5   :  { %v1306_v12 = vadd.f32 1e-05, %v535_v59  ;;  %v486_v24 = vadd.f32 %v485_v45, %v484_v22  ;;  %v598_v22 = vsel %vm597_vm6, %v1265_v28, %v594_v62  ;;  %v659_v28 = vsub.f32 %v1037_v63, %v1267_v11 }
  0xf6   :  { %v669_v27 = vmul.f32 %v653_v52, %v598_v22  ;;  %vm615_vm6 = vweird.f32 %v1317_v33 }
  0xf7   :  { %v901_v20 = vpop.eup %900  ;;  %904 = vrsqrt.f32 %v1306_v12  ;;  %v514_v4 = vmul.f32 0.00048828125, %v486_v24  ;;  %v670_v24 = vmul.f32 %v654_v57, %v598_v22  ;;  %vm575_vm13 = vweird.f32 %v1306_v12 }
  0xf8   :  { %v620_v23 = vmul.f32 %v901_v20, %v1294_v50  ;;  %v1315_v47 = vpop.eup %902  ;;  %906 = vrsqrt.f32 %v1317_v33  ;;  %vm626_vm7 = vweird.f32 %v901_v20  ;;  %v740_v50 = vperm.slane %v708_v42, %v1247_v46 }
  0xf9   :  { %v530_v5 = vsub.f32 %v514_v4, %v522_v21  ;;  %v580_v37 = vmul.f32 %v1315_v47, %v1292_v40  ;;  %vm627_vm11 = vmor %vm625_vm10, %vm626_vm7  ;;  %v816_v4 = vperm.slane %v784_v13, %v1247_v46  ;;  %v554_v13 = vmul.f32 %v1296_v54, %v553_v1  ;;  %v776_v57 = vpop.permute.xlu2 %775 }
  0xfa   :  { %v621_v18 = vmul.f32 %v901_v20, %v620_v23  ;;  %v808_v7 = vperm.slane %v776_v57, %v1247_v46  ;;  %vm586_vm2 = vweird.f32 %v1315_v47  ;;  %v651_v57 = vsub.f32 %v972_v10, %v1256_v34 }
  0xfb   :  { %v538_v32 = vmax.f32 %v530_v5, 0.0  ;;  %v581_v59 = vmul.f32 %v1315_v47, %v580_v37  ;;  %vm587_vm5 = vmor %vm585_vm4, %vm586_vm2  ;;  %v724_v10 = vperm.slane %v1271_v38, %v1247_v46 }
  0xfc   :  { %v622_v44 = vmul.f32 0.5, %v621_v18 }
  0xfd   :  { %v905_v49 = vpop.eup %904  ;;  %v1329_v51 = vadd.f32 1e-05, %v538_v32  ;;  %v828_v32 = vperm.slane %v796_v30, %v1247_v46  ;;  %v582_v0 = vmul.f32 0.5, %v581_v59 }
  0xfe   :  { %v570_v55 = vmul.f32 %v905_v49, %v1306_v12  ;;  %v623_v61 = vsub.f32 1.5, %v622_v44  ;;  %v1348_v5 = vpop.eup %906  ;;  %vm576_vm12 = vweird.f32 %v905_v49 }
  0xff   :  { %908 = vrsqrt.f32 %v1329_v51  ;;  %vm577_vm15 = vmor %vm575_vm13, %vm576_vm12  ;;  %v610_v12 = vmul.f32 %v1348_v5, %v1317_v33  ;;  %vm605_vm1 = vweird.f32 %v1329_v51  ;;  %vm616_vm7 = vweird.f32 %v1348_v5 }
 0x100   :  { %v571_v45 = vmul.f32 %v905_v49, %v570_v55  ;;  %v624_v29 = vmul.f32 %v901_v20, %v623_v61  ;;  %v720_v61 = vperm.slane %v1242_v8, %v1247_v46  ;;  %vm617_vm8 = vmor %vm615_vm6, %vm616_vm7 }
 0x101   :  { %v696_v39 = vpop.permute.xlu1 %695 }
 0x102   :  { %v572_v21 = vmul.f32 0.5, %v571_v45  ;;  %v728_v17 = vperm.slane %v696_v39, %v1247_v46  ;;  %v628_v23 = vsel %vm627_vm11, %v901_v20, %v624_v29 }
 0x103   :  { %v675_v62 = vmul.f32 %v659_v28, %v628_v23  ;;  %v676_v18 = vmul.f32 %v660_v43, %v628_v23 }
 0x104   :  { %v573_v36 = vsub.f32 1.5, %v572_v21  ;;  %v757_v63 = vmul.f32 %v728_v17, %v669_v27  ;;  %v758_v37 = vmul.f32 %v728_v17, %v670_v24  ;;  %v558_v21 = vsel %vm1359_vm14, %v1296_v54, %v554_v13 }
 0x105   :  { %v909_v44 = vpop.eup %908  ;;  %v763_v11 = vmul.f32 %v740_v50, %v675_v62  ;;  %v764_v52 = vmul.f32 %v740_v50, %v676_v18  ;;  %v611_v50 = vmul.f32 %v1348_v5, %v610_v12  ;;  %v662_v18 = vmul.f32 %v646_v6, %v558_v21 }
 0x106   :  { %v574_v20 = vmul.f32 %v905_v49, %v573_v36  ;;  %v600_v42 = vmul.f32 %v909_v44, %v1329_v51  ;;  %v845_v55 = vadd.f32 %v816_v4, %v757_v63  ;;  %v846_v1 = vadd.f32 %v816_v4, %v758_v37  ;;  %v788_v63 = vpop.permute.xlu2 %787 }
 0x107   :  { %v851_v59 = vadd.f32 %v828_v32, %v763_v11  ;;  %v852_v45 = vadd.f32 %v828_v32, %v764_v52  ;;  %v655_v4 = vsub.f32 %v1004_v35, %v1299_v58  ;;  %vm606_vm0 = vweird.f32 %v909_v44 }
 0x108   :  { %v578_v29 = vsel %vm577_vm15, %v905_v49, %v574_v20  ;;  %v601_v30 = vmul.f32 %v909_v44, %v600_v42  ;;  %v861_v39 = vmax.f32 %v845_v55, 0.0  ;;  %v862_v8 = vmax.f32 %v846_v1, 0.0  ;;  %vm607_vm3 = vmor %vm605_vm1, %vm606_vm0 }
 0x109   :  { %v665_v9 = vmul.f32 %v649_v31, %v578_v29  ;;  %v666_v27 = vmul.f32 %v650_v14, %v578_v29  ;;  %v867_v24 = vmax.f32 %v851_v59, 0.0  ;;  %v1374_v28 = vpop.permute.xlu1 %703  ;;  %v868_v49 = vmax.f32 %v852_v45, 0.0 }
 0x10a   :  { %v602_v43 = vmul.f32 0.5, %v601_v30  ;;  %877 = vst [vmem:[%s1465_s3 + $0x40] sm:$0xff] %v861_v39  ;;  %v583_v31 = vsub.f32 1.5, %v582_v0  ;;  %v661_v35 = vmul.f32 %v645_v48, %v558_v21  ;;  %v712_v36 = vperm.slane %v1228_v25, %v1247_v46 }
 0x10b   :  { %v753_v15 = vmul.f32 %v720_v61, %v665_v9  ;;  %v754_v14 = vmul.f32 %v720_v61, %v666_v27  ;;  %878 = vst [vmem:[%s1465_s3 + $0x48] sm:$0xff] %v862_v8  ;;  %v612_v37 = vmul.f32 0.5, %v611_v50  ;;  %v820_v60 = vperm.slane %v788_v63, %v1247_v46 }
 0x10c   :  { %v603_v17 = vsub.f32 1.5, %v602_v43  ;;  %883 = vst [vmem:[%s1465_s3 + $0x70] sm:$0xff] %v867_v24  ;;  %v584_v32 = vmul.f32 %v1315_v47, %v583_v31  ;;  %v749_v25 = vmul.f32 %v712_v36, %v661_v35  ;;  %v750_v40 = vmul.f32 %v712_v36, %v662_v18 }
 0x10d   :  { %v841_v54 = vadd.f32 %v808_v7, %v753_v15  ;;  %v842_v23 = vadd.f32 %v808_v7, %v754_v14  ;;  %884 = vst [vmem:[%s1465_s3 + $0x78] sm:$0xff] %v868_v49  ;;  %v652_v20 = vsub.f32 %v981_v16, %v1256_v34  ;;  %v613_v1 = vsub.f32 1.5, %v612_v37 }
 0x10e   :  { %v604_v62 = vmul.f32 %v909_v44, %v603_v17  ;;  %v588_v11 = vsel %vm587_vm5, %v1315_v47, %v584_v32  ;;  %v657_v9 = vsub.f32 %v1030_v56, %v1269_v19  ;;  %v658_v27 = vsub.f32 %v1025_v53, %v1269_v19 }
 0x10f   :  { %v857_v41 = vmax.f32 %v841_v54, 0.0  ;;  %v858_v58 = vmax.f32 %v842_v23, 0.0  ;;  %v667_v59 = vmul.f32 %v651_v57, %v588_v11  ;;  %v668_v45 = vmul.f32 %v652_v20, %v588_v11 }
 0x110   :  { %v608_v51 = vsel %vm607_vm3, %v909_v44, %v604_v62  ;;  %v614_v16 = vmul.f32 %v1348_v5, %v613_v1  ;;  %v736_v49 = vperm.slane %v1374_v28, %v1247_v46 }
 0x111   :  { %873 = vst [vmem:[%s1465_s3 + $0x20] sm:$0xff] %v857_v41  ;;  %v671_v26 = vmul.f32 %v655_v4, %v608_v51  ;;  %v672_v48 = vmul.f32 %v656_v3, %v608_v51  ;;  %v768_v0 = vpop.permute.xlu1 %767  ;;  %v755_v33 = vmul.f32 %v724_v10, %v667_v59  ;;  %v756_v39 = vmul.f32 %v724_v10, %v668_v45 }
 0x112   :  { %874 = vst [vmem:[%s1465_s3 + $0x28] sm:$0xff] %v858_v58  ;;  %v800_v44 = vperm.slane %v768_v0, %v1247_v46  ;;  %v618_v43 = vsel %vm617_vm8, %v1348_v5, %v614_v16 }
 0x113   :  { %v759_v52 = vmul.f32 %v732_v2, %v671_v26  ;;  %v760_v13 = vmul.f32 %v732_v2, %v672_v48  ;;  %v673_v31 = vmul.f32 %v657_v9, %v618_v43  ;;  %v674_v7 = vmul.f32 %v658_v27, %v618_v43 }
 0x114   :  { %v837_v42 = vadd.f32 %v800_v44, %v749_v25  ;;  %v838_v55 = vadd.f32 %v800_v44, %v750_v40 }
 0x115   :  { %v847_v22 = vadd.f32 %v820_v60, %v759_v52  ;;  %v848_v61 = vadd.f32 %v820_v60, %v760_v13  ;;  %v761_v56 = vmul.f32 %v736_v49, %v673_v31  ;;  %v762_v19 = vmul.f32 %v736_v49, %v674_v7 }
 0x116   :  { %v853_v47 = vmax.f32 %v837_v42, 0.0  ;;  %v854_v30 = vmax.f32 %v838_v55, 0.0 }
 0x117   :  { %v863_v12 = vmax.f32 %v847_v22, 0.0  ;;  %v864_v29 = vmax.f32 %v848_v61, 0.0 }
 0x118   :  { %869 = vst [vmem:[%s1465_s3] sm:$0xff] %v853_v47 }
 0x119   :  { %879 = vst [vmem:[%s1465_s3 + $0x50] sm:$0xff] %v863_v12  ;;  %v780_v34 = vpop.permute.xlu1 %779 }
 0x11a   :  { %880 = vst [vmem:[%s1465_s3 + $0x58] sm:$0xff] %v864_v29  ;;  %v812_v38 = vperm.slane %v780_v34, %v1247_v46 }
 0x11b   :  { %870 = vst [vmem:[%s1465_s3 + $0x8] sm:$0xff] %v854_v30 }
 0x11c   :  { %v843_v8 = vadd.f32 %v812_v38, %v755_v33  ;;  %v844_v24 = vadd.f32 %v812_v38, %v756_v39 }
 0x11e   :  { %v859_v21 = vmax.f32 %v843_v8, 0.0  ;;  %v860_v6 = vmax.f32 %v844_v24, 0.0 }
 0x120   :  { %875 = vst [vmem:[%s1465_s3 + $0x30] sm:$0xff] %v859_v21 }
 0x121   :  { %876 = vst [vmem:[%s1465_s3 + $0x38] sm:$0xff] %v860_v6  ;;  %v792_v53 = vpop.permute.xlu1 %791 }
 0x122   :  { %v824_v5 = vperm.slane %v792_v53, %v1247_v46 }
 0x124   :  { %v849_v15 = vadd.f32 %v824_v5, %v761_v56  ;;  %v850_v14 = vadd.f32 %v824_v5, %v762_v19 }
 0x126   :  { %v865_v28 = vmax.f32 %v849_v15, 0.0  ;;  %v866_v4 = vmax.f32 %v850_v14, 0.0 }
 0x128   :  { %881 = vst [vmem:[%s1465_s3 + $0x60] sm:$0xff] %v865_v28 }
 0x129   :  { %882 = vst [vmem:[%s1465_s3 + $0x68] sm:$0xff] %v866_v4 }

// kernel: _lambda_.13
= control target key start
LH: loop header
LB: loop body
LE: loop exit
PB: predicated region body
PF: predicated region fallthrough
CT: control target
= control target key end

     0   :  { %s1016_s9 = smov 0   ;;  %s1018_s10 = smov 0   ;;  %s1132_s0 = inlined_call_operand.vmem [shape: bf16[1024,128], index: 0, kind: input, shape index: {}]   ;;  %s1133_s1 = inlined_call_operand.vmem [shape: bf16[128,128], index: 1, kind: input, shape index: {}]   ;;  %s1134_s2 = inlined_call_operand.vmem [shape: f32[1024,128], index: 2, kind: output, shape index: {}]  }
   0x1   :  { %s1020_s11 = smov 0  }
   0x2 LB: > { %s31_s12 = sadd.s32 1, %s995_s10  ;;  %p802_p0 = scmp.ge.s32.totalorder %s999_s11, 1  ;;  %s999_s11 = sphi %s1020_s11, %s12_s11   ;;  %s995_s10 = sphi %s1018_s10, %s1136_s10   ;;  %s991_s9 = sphi %s1016_s9, %s1135_s9  }
   0x3   : > { %p33_p1 = scmp.ge.s32.totalorder %s31_s12, 4  ;;  %p155_p2 = scmp.lt.s32.totalorder %s999_s11, 5 }
   0x5   : > { %s1138_s12 = smov (%p33_p1, %s31_s12), 0  ;;  %p156_p3 = pnand %p802_p0, %p155_p2 }
   0x6   : > { %s803_s21 = sshll.u32 (!%p156_p3), %s991_s9, 5 }
   0x7   : > { %159 = sbr.rel (%p156_p3) target bundleno = 235 (0xeb), region = 28  ;;  %p192_p4 = scmp.lt.s32.totalorder (!%p156_p3), %s803_s21, 127 }
   0xc   : > { %v928_v0 = vld [vmem:[%s1133_s1 + $0x38] sm:$0xff]  ;;  %v927_v1 = vld [vmem:[%s1133_s1 + $0x30] sm:$0xff]  ;;  %v926_v2 = vld [vmem:[%s1133_s1 + $0x28] sm:$0xff]  ;;  %s1140_s21 = smov (!%p192_p4, %s803_s21), 127 }
   0xd   : > { %478 = vmatpush.bf16.msra.mxu0 %v928_v0  ;;  %929 = vmatpush.bf16.msra.mxu1 %v928_v0  ;;  %v925_v3 = vld [vmem:[%s1133_s1 + $0x20] sm:$0xff]  ;;  %v924_v4 = vld [vmem:[%s1133_s1 + $0x18] sm:$0xff]  ;;  %v923_v5 = vld [vmem:[%s1133_s1 + $0x10] sm:$0xff]  ;;  %s804_s28 = sshll.u32 %s1140_s21, 2  ;;  %s806_s6 = sshll.u32 %s1140_s21, 3 }
   0xe   : > { %930 = vmatpush.bf16.msra.mxu2 %v928_v0  ;;  %931 = vmatpush.bf16.msra.mxu3 %v928_v0  ;;  %v922_v6 = vld [vmem:[%s1133_s1 + $0x8] sm:$0xff]  ;;  %v921_v7 = vld [vmem:[%s1133_s1] sm:$0xff]  ;;  %s1067_s5 = scalar_lea.vmem %s1132_s0, %s804_s28  ;;  %s1089_s9 = scalar_lea.vmem %s1134_s2, %s806_s6 }
   0xf   : > { %v905_v8 = vld [vmem:[%s1067_s5] sm:$0xff]  ;;  %v906_v12 = vld [vmem:[%s1067_s5 + $0x8] sm:$0xff]  ;;  %v907_v16 = vld [vmem:[%s1067_s5 + $0x10] sm:$0xff] }
  0x10   : > { %v909_v9 = vld [vmem:[%s1067_s5 + $0x20] sm:$0xff]  ;;  %v910_v13 = vld [vmem:[%s1067_s5 + $0x28] sm:$0xff]  ;;  %v911_v17 = vld [vmem:[%s1067_s5 + $0x30] sm:$0xff] }
  0x11   : > { %479 = vmatpush.bf16.msra.mxu0 %v927_v1  ;;  %932 = vmatpush.bf16.msra.mxu1 %v927_v1  ;;  %v913_v10 = vld [vmem:[%s1067_s5 + $0x40] sm:$0xff]  ;;  %v914_v14 = vld [vmem:[%s1067_s5 + $0x48] sm:$0xff]  ;;  %v915_v18 = vld [vmem:[%s1067_s5 + $0x50] sm:$0xff] }
  0x12   : > { %933 = vmatpush.bf16.msra.mxu2 %v927_v1  ;;  %934 = vmatpush.bf16.msra.mxu3 %v927_v1  ;;  %v917_v11 = vld [vmem:[%s1067_s5 + $0x60] sm:$0xff]  ;;  %v918_v15 = vld [vmem:[%s1067_s5 + $0x68] sm:$0xff]  ;;  %v919_v19 = vld [vmem:[%s1067_s5 + $0x70] sm:$0xff] }
  0x13   : > { %v908_v20 = vld [vmem:[%s1067_s5 + $0x18] sm:$0xff] }
  0x14   : > { %v912_v21 = vld [vmem:[%s1067_s5 + $0x38] sm:$0xff] }
  0x15   : > { %480 = vmatpush.bf16.msra.mxu0 %v926_v2  ;;  %935 = vmatpush.bf16.msra.mxu1 %v926_v2  ;;  %v916_v22 = vld [vmem:[%s1067_s5 + $0x58] sm:$0xff] }
  0x16   : > { %936 = vmatpush.bf16.msra.mxu2 %v926_v2  ;;  %937 = vmatpush.bf16.msra.mxu3 %v926_v2  ;;  %v920_v23 = vld [vmem:[%s1067_s5 + $0x78] sm:$0xff] }
  0x19   : > { %481 = vmatpush.bf16.msra.mxu0 %v925_v3  ;;  %938 = vmatpush.bf16.msra.mxu1 %v925_v3 }
  0x1a   : > { %939 = vmatpush.bf16.msra.mxu2 %v925_v3  ;;  %940 = vmatpush.bf16.msra.mxu3 %v925_v3 }
  0x1d   : > { %482 = vmatpush.bf16.msra.mxu0 %v924_v4  ;;  %941 = vmatpush.bf16.msra.mxu1 %v924_v4 }
  0x1e   : > { %942 = vmatpush.bf16.msra.mxu2 %v924_v4  ;;  %943 = vmatpush.bf16.msra.mxu3 %v924_v4 }
  0x21   : > { %483 = vmatpush.bf16.msra.mxu0 %v923_v5  ;;  %944 = vmatpush.bf16.msra.mxu1 %v923_v5 }
  0x22   : > { %945 = vmatpush.bf16.msra.mxu2 %v923_v5  ;;  %946 = vmatpush.bf16.msra.mxu3 %v923_v5 }
  0x25   : > { %484 = vmatpush.bf16.msra.mxu0 %v922_v6  ;;  %947 = vmatpush.bf16.msra.mxu1 %v922_v6 }
  0x26   : > { %948 = vmatpush.bf16.msra.mxu2 %v922_v6  ;;  %949 = vmatpush.bf16.msra.mxu3 %v922_v6 }
  0x29   : > { %485 = vmatpush.bf16.msra.mxu0 %v921_v7  ;;  %950 = vmatpush.bf16.msra.mxu1 %v921_v7 }
  0x2a   : > { %951 = vmatpush.bf16.msra.mxu2 %v921_v7  ;;  %952 = vmatpush.bf16.msra.mxu3 %v921_v7 }
  0x2c   : > { %486 = vmatmul.bf16.vlgmr.msra.gmra.mxu0 %v905_v8  ;;  %506 = vmatmul.bf16.vlgmr.msra.gmra.mxu1 %v909_v9 }
  0x2d   : > { %526 = vmatmul.bf16.vlgmr.msra.gmra.mxu2 %v913_v10  ;;  %546 = vmatmul.bf16.vlgmr.msra.gmra.mxu3 %v917_v11 }
  0x3c   : > { %491 = vmatmul.bf16.gmra.mxu0 %v906_v12  ;;  %511 = vmatmul.bf16.gmra.mxu1 %v910_v13 }
  0x3d   : > { %531 = vmatmul.bf16.gmra.mxu2 %v914_v14  ;;  %551 = vmatmul.bf16.gmra.mxu3 %v918_v15 }
  0x4c   : > { %496 = vmatmul.bf16.gmra.mxu0 %v907_v16  ;;  %516 = vmatmul.bf16.gmra.mxu1 %v911_v17 }
  0x4d   : > { %536 = vmatmul.bf16.gmra.mxu2 %v915_v18  ;;  %556 = vmatmul.bf16.gmra.mxu3 %v919_v19 }
  0x5c   : > { %501 = vmatmul.bf16.gmra.mxu0 %v908_v20  ;;  %521 = vmatmul.bf16.gmra.mxu1 %v912_v21 }
  0x5d   : > { %541 = vmatmul.bf16.gmra.mxu2 %v916_v22  ;;  %561 = vmatmul.bf16.gmra.mxu3 %v920_v23 }
  0xa9   : > { %v487_v24 = vpop.f32.mrf.mxu0  ;;  %v507_v25 = vpop.f32.mrf.mxu1 }
  0xaa   : > { %666 = vst [vmem:[%s1089_s9] sm:$0xff] %v487_v24 }
  0xab   : > { %674 = vst [vmem:[%s1089_s9 + $0x40] sm:$0xff] %v507_v25 }
  0xb0   : > { %v527_v26 = vpop.f32.mrf.mxu2  ;;  %v547_v27 = vpop.f32.mrf.mxu3 }
  0xb1   : > { %682 = vst [vmem:[%s1089_s9 + $0x80] sm:$0xff] %v527_v26  ;;  %v489_v28 = vpop.f32.mrf.mxu0  ;;  %v509_v29 = vpop.f32.mrf.mxu1 }
  0xb2   : > { %690 = vst [vmem:[%s1089_s9 + $0xc0] sm:$0xff] %v547_v27 }
  0xb3   : > { %667 = vst [vmem:[%s1089_s9 + $0x8] sm:$0xff] %v489_v28 }
  0xb4   : > { %675 = vst [vmem:[%s1089_s9 + $0x48] sm:$0xff] %v509_v29 }
  0xb8   : > { %v529_v30 = vpop.f32.mrf.mxu2  ;;  %v549_v31 = vpop.f32.mrf.mxu3 }
  0xb9   : > { %683 = vst [vmem:[%s1089_s9 + $0x88] sm:$0xff] %v529_v30  ;;  %v492_v32 = vpop.f32.mrf.mxu0  ;;  %v512_v33 = vpop.f32.mrf.mxu1 }
  0xba   : > { %691 = vst [vmem:[%s1089_s9 + $0xc8] sm:$0xff] %v549_v31 }
  0xbb   : > { %668 = vst [vmem:[%s1089_s9 + $0x10] sm:$0xff] %v492_v32 }
  0xbc   : > { %676 = vst [vmem:[%s1089_s9 + $0x50] sm:$0xff] %v512_v33 }
  0xc0   : > { %v532_v34 = vpop.f32.mrf.mxu2  ;;  %v552_v35 = vpop.f32.mrf.mxu3 }
  0xc1   : > { %684 = vst [vmem:[%s1089_s9 + $0x90] sm:$0xff] %v532_v34  ;;  %v494_v36 = vpop.f32.mrf.mxu0  ;;  %v514_v37 = vpop.f32.mrf.mxu1 }
  0xc2   : > { %692 = vst [vmem:[%s1089_s9 + $0xd0] sm:$0xff] %v552_v35 }
  0xc3   : > { %669 = vst [vmem:[%s1089_s9 + $0x18] sm:$0xff] %v494_v36 }
  0xc4   : > { %677 = vst [vmem:[%s1089_s9 + $0x58] sm:$0xff] %v514_v37 }
  0xc8   : > { %v534_v38 = vpop.f32.mrf.mxu2  ;;  %v554_v39 = vpop.f32.mrf.mxu3 }
  0xc9   : > { %685 = vst [vmem:[%s1089_s9 + $0x98] sm:$0xff] %v534_v38  ;;  %v497_v40 = vpop.f32.mrf.mxu0  ;;  %v517_v41 = vpop.f32.mrf.mxu1 }
  0xca   : > { %693 = vst [vmem:[%s1089_s9 + $0xd8] sm:$0xff] %v554_v39 }
  0xcb   : > { %670 = vst [vmem:[%s1089_s9 + $0x20] sm:$0xff] %v497_v40 }
  0xcc   : > { %678 = vst [vmem:[%s1089_s9 + $0x60] sm:$0xff] %v517_v41 }
  0xd0   : > { %v537_v42 = vpop.f32.mrf.mxu2  ;;  %v557_v43 = vpop.f32.mrf.mxu3 }
  0xd1   : > { %686 = vst [vmem:[%s1089_s9 + $0xa0] sm:$0xff] %v537_v42  ;;  %v499_v44 = vpop.f32.mrf.mxu0  ;;  %v519_v45 = vpop.f32.mrf.mxu1 }
  0xd2   : > { %694 = vst [vmem:[%s1089_s9 + $0xe0] sm:$0xff] %v557_v43 }
  0xd3   : > { %671 = vst [vmem:[%s1089_s9 + $0x28] sm:$0xff] %v499_v44 }
  0xd4   : > { %679 = vst [vmem:[%s1089_s9 + $0x68] sm:$0xff] %v519_v45 }
  0xd8   : > { %v539_v46 = vpop.f32.mrf.mxu2  ;;  %v559_v47 = vpop.f32.mrf.mxu3 }
  0xd9   : > { %687 = vst [vmem:[%s1089_s9 + $0xa8] sm:$0xff] %v539_v46  ;;  %v502_v48 = vpop.f32.mrf.mxu0  ;;  %v522_v49 = vpop.f32.mrf.mxu1 }
  0xda   : > { %695 = vst [vmem:[%s1089_s9 + $0xe8] sm:$0xff] %v559_v47 }
  0xdb   : > { %672 = vst [vmem:[%s1089_s9 + $0x30] sm:$0xff] %v502_v48 }
  0xdc   : > { %680 = vst [vmem:[%s1089_s9 + $0x70] sm:$0xff] %v522_v49 }
  0xe0   : > { %v542_v50 = vpop.f32.mrf.mxu2  ;;  %v562_v51 = vpop.f32.mrf.mxu3 }
  0xe1   : > { %688 = vst [vmem:[%s1089_s9 + $0xb0] sm:$0xff] %v542_v50  ;;  %v504_v52 = vpop.f32.mrf.mxu0  ;;  %v524_v53 = vpop.f32.mrf.mxu1 }
  0xe2   : > { %696 = vst [vmem:[%s1089_s9 + $0xf0] sm:$0xff] %v562_v51 }
  0xe3   : > { %673 = vst [vmem:[%s1089_s9 + $0x38] sm:$0xff] %v504_v52 }
  0xe4   : > { %681 = vst [vmem:[%s1089_s9 + $0x78] sm:$0xff] %v524_v53 }
  0xe8   : > { %v544_v54 = vpop.f32.mrf.mxu2  ;;  %v564_v55 = vpop.f32.mrf.mxu3 }
  0xe9   : > { %689 = vst [vmem:[%s1089_s9 + $0xb8] sm:$0xff] %v544_v54 }
  0xea   : > { %697 = vst [vmem:[%s1089_s9 + $0xf8] sm:$0xff] %v564_v55 }
  0xeb PF: > { %s12_s11 = sadd.s32 1, %s999_s11   ;;  %s1135_s9 = smov %s995_s10 }
  0xec   : > { %p9_p5 = scmp.ge.s32.totalorder %s12_s11, 6   ;;  %s1136_s10 = smov %s1138_s12 }
  0xee   :  { %11 = sbr.rel (!%p9_p5) target bundleno = 2 (0x2), region = 69 }

// kernel: _lambda_.14
= control target key start
LH: loop header
LB: loop body
LE: loop exit
PB: predicated region body
PF: predicated region fallthrough
CT: control target
= control target key end

     0   :  { %vm94_vm0 = vcmask 1040384   ;;  %s1182_s0 = inlined_call_operand.vmem [shape: f32[8,1,512], index: 0, kind: input, shape index: {}]   ;;  %s1183_s1 = inlined_call_operand.vmem [shape: f32[8,1,1], index: 1, kind: input, shape index: {}]   ;;  %s1184_s2 = inlined_call_operand.vmem [shape: f32[8,1,1], index: 2, kind: input, shape index: {}]   ;;  %s1185_s3 = inlined_call_operand.vmem [shape: f32[8,1,512], index: 3, kind: output, shape index: {}]  }
   0x1   :  { %v723_v0 = vld [vmem:[%s1182_s0 + $0x10] sm:$0xf]  ;;  %v728_v1 = vld [vmem:[%s1182_s0 + $0x8] sm:$0xf]  ;;  %v741_v10 = vld [vmem:[%s1182_s0] sm:$0xf] }
   0x2   :  { %v46_v2 = vperm.slane %v723_v0, 0  ;;  %v47_v3 = vperm.slane %v723_v0, 1  ;;  %v48_v4 = vperm.slane %v723_v0, 2  ;;  %v49_v5 = vperm.slane %v723_v0, 3  ;;  %v750_v15 = vld [vmem:[%s1182_s0 + $0x14] sm:$0xf] }
   0x3   :  { %v38_v6 = vperm.slane %v728_v1, 0  ;;  %v39_v7 = vperm.slane %v728_v1, 1  ;;  %v40_v8 = vperm.slane %v728_v1, 2  ;;  %v41_v9 = vperm.slane %v728_v1, 3  ;;  %v767_v32 = vld [vmem:[%s1182_s0 + $0xc] sm:$0xf] }
   0x4   :  { %v131_v11 = vsel %vm94_vm0, %v46_v2, 0.0  ;;  %v132_v12 = vsel %vm94_vm0, %v47_v3, 0.0  ;;  %v134_v13 = vsel %vm94_vm0, %v48_v4, 0.0  ;;  %v136_v14 = vsel %vm94_vm0, %v49_v5, 0.0  ;;  %v780_v45 = vld [vmem:[%s1182_s0 + $0x4] sm:$0xf] }
   0x5   :  { %v133_v16 = vadd.f32 %v132_v12, %v131_v11  ;;  %v113_v17 = vsel %vm94_vm0, %v38_v6, 0.0  ;;  %v114_v18 = vsel %vm94_vm0, %v39_v7, 0.0  ;;  %v116_v19 = vsel %vm94_vm0, %v40_v8, 0.0  ;;  %v791_v54 = vld [vmem:[%s1182_s0 + $0x1c] sm:$0xf] }
   0x6   :  { %v115_v20 = vadd.f32 %v114_v18, %v113_v17  ;;  %v118_v21 = vsel %vm94_vm0, %v41_v9, 0.0  ;;  %v30_v22 = vperm.slane %v741_v10, 0  ;;  %v31_v23 = vperm.slane %v741_v10, 1  ;;  %v804_v5 = vld [vmem:[%s1182_s0 + $0x18] sm:$0xf] }
   0x7   :  { %v135_v24 = vadd.f32 %v134_v13, %v133_v16  ;;  %v32_v25 = vperm.slane %v741_v10, 2  ;;  %v33_v26 = vperm.slane %v741_v10, 3  ;;  %v50_v27 = vperm.slane %v750_v15, 0 }
   0x8   :  { %v117_v28 = vadd.f32 %v116_v19, %v115_v20  ;;  %v95_v29 = vsel %vm94_vm0, %v30_v22, 0.0  ;;  %v96_v30 = vsel %vm94_vm0, %v31_v23, 0.0  ;;  %v51_v31 = vperm.slane %v750_v15, 1 }
   0x9   :  { %v137_v33 = vadd.f32 %v136_v14, %v135_v24  ;;  %v97_v34 = vadd.f32 %v96_v30, %v95_v29  ;;  %v98_v35 = vsel %vm94_vm0, %v32_v25, 0.0  ;;  %v100_v36 = vsel %vm94_vm0, %v33_v26, 0.0 }
   0xa   :  { %v119_v37 = vadd.f32 %v118_v21, %v117_v28  ;;  %v52_v38 = vperm.slane %v750_v15, 2  ;;  %v53_v39 = vperm.slane %v750_v15, 3  ;;  %v140_v40 = vsel %vm94_vm0, %v50_v27, 0.0 }
   0xb   :  { %138 = vadd.xlane.f32.xlu2 %v137_v33  ;;  %v99_v41 = vadd.f32 %v98_v35, %v97_v34  ;;  %v141_v42 = vsel %vm94_vm0, %v51_v31, 0.0  ;;  %v42_v43 = vperm.slane %v767_v32, 0  ;;  %v43_v44 = vperm.slane %v767_v32, 1 }
   0xc   :  { %120 = vadd.xlane.f32.xlu1 %v119_v37  ;;  %v142_v46 = vadd.f32 %v141_v42, %v140_v40  ;;  %v143_v47 = vsel %vm94_vm0, %v52_v38, 0.0  ;;  %v145_v48 = vsel %vm94_vm0, %v53_v39, 0.0  ;;  %v44_v49 = vperm.slane %v767_v32, 2 }
   0xd   :  { %v101_v50 = vadd.f32 %v100_v36, %v99_v41  ;;  %v45_v51 = vperm.slane %v767_v32, 3  ;;  %v122_v52 = vsel %vm94_vm0, %v42_v43, 0.0  ;;  %v123_v53 = vsel %vm94_vm0, %v43_v44, 0.0 }
   0xe   :  { %v144_v55 = vadd.f32 %v143_v47, %v142_v46  ;;  %v124_v56 = vadd.f32 %v123_v53, %v122_v52  ;;  %v125_v57 = vsel %vm94_vm0, %v44_v49, 0.0  ;;  %v34_v58 = vperm.slane %v780_v45, 0 }
   0xf   :  { %102 = vadd.xlane.f32.xlu0 %v101_v50  ;;  %v127_v59 = vsel %vm94_vm0, %v45_v51, 0.0  ;;  %v35_v60 = vperm.slane %v780_v45, 1  ;;  %v36_v61 = vperm.slane %v780_v45, 2  ;;  %v37_v62 = vperm.slane %v780_v45, 3 }
  0x10   :  { %v146_v63 = vadd.f32 %v145_v48, %v144_v55  ;;  %v126_v2 = vadd.f32 %v125_v57, %v124_v56  ;;  %v104_v3 = vsel %vm94_vm0, %v34_v58, 0.0  ;;  %v58_v4 = vperm.slane %v791_v54, 0 }
  0x11   :  { %v105_v6 = vsel %vm94_vm0, %v35_v60, 0.0  ;;  %v107_v7 = vsel %vm94_vm0, %v36_v61, 0.0  ;;  %v109_v8 = vsel %vm94_vm0, %v37_v62, 0.0  ;;  %v59_v9 = vperm.slane %v791_v54, 1 }
  0x12   :  { %v128_v11 = vadd.f32 %v127_v59, %v126_v2  ;;  %v106_v12 = vadd.f32 %v105_v6, %v104_v3  ;;  %v60_v13 = vperm.slane %v791_v54, 2  ;;  %v61_v14 = vperm.slane %v791_v54, 3 }
  0x13   :  { %147 = vadd.xlane.f32.xlu2 %v146_v63  ;;  %v158_v16 = vsel %vm94_vm0, %v58_v4, 0.0  ;;  %v159_v17 = vsel %vm94_vm0, %v59_v9, 0.0  ;;  %v175_v18 = vmul.f32 %v741_v10, %v741_v10  ;;  %v54_v19 = vperm.slane %v804_v5, 0 }
  0x14   :  { %129 = vadd.xlane.f32.xlu1 %v128_v11  ;;  %v108_v20 = vadd.f32 %v107_v7, %v106_v12  ;;  %v160_v21 = vadd.f32 %v159_v17, %v158_v16  ;;  %v161_v22 = vsel %vm94_vm0, %v60_v13, 0.0  ;;  %v163_v23 = vsel %vm94_vm0, %v61_v14, 0.0 }
  0x15   :  { %v191_v24 = vperm.slane %v175_v18, 0  ;;  %v192_v25 = vperm.slane %v175_v18, 1  ;;  %v193_v26 = vperm.slane %v175_v18, 2  ;;  %v194_v27 = vperm.slane %v175_v18, 3 }
  0x16   :  { %v110_v28 = vadd.f32 %v109_v8, %v108_v20  ;;  %v162_v29 = vadd.f32 %v161_v22, %v160_v21  ;;  %v55_v30 = vperm.slane %v804_v5, 1  ;;  %v56_v31 = vperm.slane %v804_v5, 2 }
  0x17   :  { %v255_v33 = vsel %vm94_vm0, %v191_v24, 0.0  ;;  %v256_v34 = vsel %vm94_vm0, %v192_v25, 0.0  ;;  %v258_v35 = vsel %vm94_vm0, %v193_v26, 0.0  ;;  %v260_v36 = vsel %vm94_vm0, %v194_v27, 0.0 }
  0x18   :  { %111 = vadd.xlane.f32.xlu0 %v110_v28  ;;  %v164_v37 = vadd.f32 %v163_v23, %v162_v29  ;;  %v257_v38 = vadd.f32 %v256_v34, %v255_v33  ;;  %v57_v39 = vperm.slane %v804_v5, 3  ;;  %v149_v40 = vsel %vm94_vm0, %v54_v19, 0.0 }
  0x19   :  { %v150_v41 = vsel %vm94_vm0, %v55_v30, 0.0  ;;  %v152_v42 = vsel %vm94_vm0, %v56_v31, 0.0  ;;  %v177_v43 = vmul.f32 %v728_v1, %v728_v1  ;;  %v178_v44 = vmul.f32 %v767_v32, %v767_v32 }
  0x1a   :  { %v259_v46 = vadd.f32 %v258_v35, %v257_v38  ;;  %v151_v47 = vadd.f32 %v150_v41, %v149_v40  ;;  %v154_v48 = vsel %vm94_vm0, %v57_v39, 0.0  ;;  %v176_v49 = vmul.f32 %v780_v45, %v780_v45 }
  0x1b   :  { %v199_v50 = vperm.slane %v177_v43, 0  ;;  %v200_v51 = vperm.slane %v177_v43, 1  ;;  %v201_v52 = vperm.slane %v177_v43, 2  ;;  %v202_v53 = vperm.slane %v177_v43, 3 }
  0x1c   :  { %165 = vadd.xlane.f32.xlu1 %v164_v37  ;;  %v261_v55 = vadd.f32 %v260_v36, %v259_v46  ;;  %v153_v56 = vadd.f32 %v152_v42, %v151_v47  ;;  %v203_v57 = vperm.slane %v178_v44, 0  ;;  %v204_v58 = vperm.slane %v178_v44, 1 }
  0x1d   :  { %v273_v59 = vsel %vm94_vm0, %v199_v50, 0.0  ;;  %v274_v60 = vsel %vm94_vm0, %v200_v51, 0.0  ;;  %v276_v61 = vsel %vm94_vm0, %v201_v52, 0.0  ;;  %v278_v62 = vsel %vm94_vm0, %v202_v53, 0.0 }
  0x1e   :  { %262 = vadd.xlane.f32.xlu2 %v261_v55  ;;  %v155_v63 = vadd.f32 %v154_v48, %v153_v56  ;;  %v275_v2 = vadd.f32 %v274_v60, %v273_v59  ;;  %v205_v3 = vperm.slane %v178_v44, 2  ;;  %v206_v4 = vperm.slane %v178_v44, 3 }
  0x1f   :  { %v282_v6 = vsel %vm94_vm0, %v203_v57, 0.0  ;;  %v283_v7 = vsel %vm94_vm0, %v204_v58, 0.0  ;;  %v195_v8 = vperm.slane %v176_v49, 0  ;;  %v196_v9 = vperm.slane %v176_v49, 1 }
  0x20   :  { %156 = vadd.xlane.f32.xlu0 %v155_v63  ;;  %v277_v11 = vadd.f32 %v276_v61, %v275_v2  ;;  %v284_v12 = vadd.f32 %v283_v7, %v282_v6  ;;  %v285_v13 = vsel %vm94_vm0, %v205_v3, 0.0  ;;  %v287_v14 = vsel %vm94_vm0, %v206_v4, 0.0 }
  0x21   :  { %v197_v16 = vperm.slane %v176_v49, 2  ;;  %v198_v17 = vperm.slane %v176_v49, 3  ;;  %v264_v18 = vsel %vm94_vm0, %v195_v8, 0.0  ;;  %v265_v19 = vsel %vm94_vm0, %v196_v9, 0.0 }
  0x22   :  { %v279_v20 = vadd.f32 %v278_v62, %v277_v11  ;;  %v286_v21 = vadd.f32 %v285_v13, %v284_v12  ;;  %v266_v22 = vadd.f32 %v265_v19, %v264_v18  ;;  %v180_v23 = vmul.f32 %v750_v15, %v750_v15 }
  0x23   :  { %v267_v24 = vsel %vm94_vm0, %v197_v16, 0.0  ;;  %v269_v25 = vsel %vm94_vm0, %v198_v17, 0.0  ;;  %v181_v26 = vmul.f32 %v804_v5, %v804_v5  ;;  %v179_v27 = vmul.f32 %v723_v0, %v723_v0 }
  0x24   :  { %280 = vadd.xlane.f32.xlu1 %v279_v20  ;;  %v288_v28 = vadd.f32 %v287_v14, %v286_v21  ;;  %v268_v29 = vadd.f32 %v267_v24, %v266_v22  ;;  %v211_v30 = vperm.slane %v180_v23, 0  ;;  %v212_v31 = vperm.slane %v180_v23, 1  ;;  %v463_v21 = vld [vmem:[%s1183_s1] sm:$0x1]  ;;  %v464_v22 = vld [vmem:[%s1183_s1 + $0x1] sm:$0x1] }
  0x25   :  { %v213_v33 = vperm.slane %v180_v23, 2  ;;  %v214_v34 = vperm.slane %v180_v23, 3  ;;  %v215_v35 = vperm.slane %v181_v26, 0  ;;  %v216_v36 = vperm.slane %v181_v26, 1  ;;  %v465_v23 = vld [vmem:[%s1183_s1 + $0x2] sm:$0x1] }
  0x26   :  { %289 = vadd.xlane.f32.xlu2 %v288_v28  ;;  %v270_v37 = vadd.f32 %v269_v25, %v268_v29  ;;  %v300_v38 = vsel %vm94_vm0, %v211_v30, 0.0  ;;  %v301_v39 = vsel %vm94_vm0, %v212_v31, 0.0  ;;  %v217_v40 = vperm.slane %v181_v26, 2  ;;  %v467_v24 = vld [vmem:[%s1183_s1 + $0x4] sm:$0x1] }
  0x27   :  { %v302_v41 = vadd.f32 %v301_v39, %v300_v38  ;;  %v303_v42 = vsel %vm94_vm0, %v213_v33, 0.0  ;;  %v305_v43 = vsel %vm94_vm0, %v214_v34, 0.0  ;;  %v218_v44 = vperm.slane %v181_v26, 3  ;;  %v466_v25 = vld [vmem:[%s1183_s1 + $0x3] sm:$0x1] }
  0x28   :  { %271 = vadd.xlane.f32.xlu0 %v270_v37  ;;  %v309_v46 = vsel %vm94_vm0, %v215_v35, 0.0  ;;  %v310_v47 = vsel %vm94_vm0, %v216_v36, 0.0  ;;  %v312_v48 = vsel %vm94_vm0, %v217_v40, 0.0  ;;  %v207_v49 = vperm.slane %v179_v27, 0  ;;  %v472_v26 = vld [vmem:[%s1184_s2 + $0x1] sm:$0x1] }
  0x29   :  { %v304_v50 = vadd.f32 %v303_v42, %v302_v41  ;;  %v311_v51 = vadd.f32 %v310_v47, %v309_v46  ;;  %v314_v52 = vsel %vm94_vm0, %v218_v44, 0.0  ;;  %v208_v53 = vperm.slane %v179_v27, 1  ;;  %v468_v28 = vld [vmem:[%s1183_s1 + $0x5] sm:$0x1]  ;;  %v475_v29 = vld [vmem:[%s1184_s2 + $0x4] sm:$0x1] }
  0x2a   :  { %v209_v55 = vperm.slane %v179_v27, 2  ;;  %v210_v56 = vperm.slane %v179_v27, 3  ;;  %v291_v57 = vsel %vm94_vm0, %v207_v49, 0.0  ;;  %v182_v58 = vmul.f32 %v791_v54, %v791_v54  ;;  %v469_v27 = vld [vmem:[%s1183_s1 + $0x6] sm:$0x1] }
  0x2b   :  { %v306_v59 = vadd.f32 %v305_v43, %v304_v50  ;;  %v313_v60 = vadd.f32 %v312_v48, %v311_v51  ;;  %v292_v61 = vsel %vm94_vm0, %v208_v53, 0.0  ;;  %v699_v3 = vmov 0   ;;  %v471_v30 = vld [vmem:[%s1184_s2] sm:$0x1]  ;;  %v470_v31 = vld [vmem:[%s1183_s1 + $0x7] sm:$0x1] }
  0x2c   :  { %v293_v62 = vadd.f32 %v292_v61, %v291_v57  ;;  %v294_v63 = vsel %vm94_vm0, %v209_v55, 0.0  ;;  %v219_v2 = vperm.slane %v182_v58, 0  ;;  %681 = vset.pattern.permute.xlu2 %v699_v3  ;;  %680 = vset.pattern.permute.xlu1 %v699_v3  ;;  %v296_v6 = vsel %vm94_vm0, %v210_v56, 0.0  ;;  %v478_v33 = vld [vmem:[%s1184_s2 + $0x7] sm:$0x1] }
  0x2d   :  { %307 = vadd.xlane.f32.xlu1 %v306_v59  ;;  %v315_v4 = vadd.f32 %v314_v52, %v313_v60  ;;  %v220_v7 = vperm.slane %v182_v58, 1  ;;  %v221_v8 = vperm.slane %v182_v58, 2  ;;  %682 = vset.pattern.permute.xlu0 %v699_v3  ;;  %v222_v12 = vperm.slane %v182_v58, 3  ;;  %v474_v34 = vld [vmem:[%s1184_s2 + $0x3] sm:$0x1] }
  0x2e   :  { %v295_v9 = vadd.f32 %v294_v63, %v293_v62  ;;  %v318_v11 = vsel %vm94_vm0, %v219_v2, 0.0  ;;  %v473_v35 = vld [vmem:[%s1184_s2 + $0x2] sm:$0x1]  ;;  %v477_v36 = vld [vmem:[%s1184_s2 + $0x6] sm:$0x1] }
  0x2f   :  { %316 = vadd.xlane.f32.xlu2 %v315_v4  ;;  %v319_v13 = vsel %vm94_vm0, %v220_v7, 0.0  ;;  %v321_v14 = vsel %vm94_vm0, %v221_v8, 0.0  ;;  %v323_v19 = vsel %vm94_vm0, %v222_v12, 0.0  ;;  %v476_v37 = vld [vmem:[%s1184_s2 + $0x5] sm:$0x1] }
  0x30   :  { %v297_v16 = vadd.f32 %v296_v6, %v295_v9  ;;  %v320_v17 = vadd.f32 %v319_v13, %v318_v11 }
  0x32   :  { %298 = vadd.xlane.f32.xlu0 %v297_v16  ;;  %v322_v18 = vadd.f32 %v321_v14, %v320_v17 }
  0x34   :  { %v324_v20 = vadd.f32 %v323_v19, %v322_v18 }
  0x3a   :  { %325 = vadd.xlane.f32.xlu0 %v324_v20 }
  0x46   :  { %545 = vperm.xlu1 %680, %v463_v21  }
  0x47   :  { %551 = vperm.xlu2 %681, %v464_v22  }
  0x4e   :  { %557 = vperm.xlu0 %682, %v465_v23   ;;  %569 = vperm.xlu1 %680, %v467_v24  }
  0x4f   :  { %563 = vperm.xlu2 %681, %v466_v25  }
  0x56   :  { %607 = vperm.xlu0 %682, %v472_v26   ;;  %581 = vperm.xlu1 %680, %v469_v27  }
  0x57   :  { %575 = vperm.xlu2 %681, %v468_v28  }
  0x5e   :  { %625 = vperm.xlu0 %682, %v475_v29   ;;  %601 = vperm.xlu1 %680, %v471_v30  }
  0x5f   :  { %587 = vperm.xlu2 %681, %v470_v31  }
  0x66   :  { %643 = vperm.xlu0 %682, %v478_v33   ;;  %619 = vperm.xlu1 %680, %v474_v34  }
  0x67   :  { %613 = vperm.xlu2 %681, %v473_v35  }
  0x6e   :  { %637 = vperm.xlu1 %680, %v477_v36  }
  0x6f   :  { %631 = vperm.xlu2 %681, %v476_v37  }
  0x7e   :  { %v139_v38 = vpop.xlane.xlu2 %138 }
  0x7f   :  { %v121_v39 = vpop.xlane.xlu1 %120  ;;  %v940_v14 = vmul.f32 0.001953125, %v139_v38 }
  0x80   :  { %v920_v48 = vmul.f32 0.001953125, %v121_v39 }
  0x81   :  { %v355_v24 = vmul.f32 %v940_v14, %v940_v14 }
  0x82   :  { %v103_v40 = vpop.xlane.xlu0 %102  ;;  %v353_v52 = vmul.f32 %v920_v48, %v920_v48 }
  0x83   :  { %v922_v49 = vmul.f32 0.001953125, %v103_v40 }
  0x85   :  { %v351_v55 = vmul.f32 %v922_v49, %v922_v49 }
  0x86   :  { %v148_v41 = vpop.xlane.xlu2 %147 }
  0x87   :  { %v130_v42 = vpop.xlane.xlu1 %129  ;;  %v932_v62 = vmul.f32 0.001953125, %v148_v41 }
  0x88   :  { %v934_v3 = vmul.f32 0.001953125, %v130_v42 }
  0x89   :  { %v356_v9 = vmul.f32 %v932_v62, %v932_v62 }
  0x8a   :  { %v354_v16 = vmul.f32 %v934_v3, %v934_v3 }
  0x8b   :  { %v112_v43 = vpop.xlane.xlu0 %111 }
  0x8c   :  { %v924_v50 = vmul.f32 0.001953125, %v112_v43 }
  0x8e   :  { %v352_v58 = vmul.f32 %v924_v50, %v924_v50 }
  0x8f   :  { %v166_v44 = vpop.xlane.xlu1 %165 }
  0x90   :  { %v956_v30 = vmul.f32 0.001953125, %v166_v44 }
  0x91   :  { %v263_v46 = vpop.xlane.xlu2 %262 }
  0x92   :  { %v343_v56 = vmul.f32 0.001953125, %v263_v46  ;;  %v358_v41 = vmul.f32 %v956_v30, %v956_v30 }
  0x93   :  { %v157_v47 = vpop.xlane.xlu0 %156 }
  0x94   :  { %v359_v63 = vsub.f32 %v343_v56, %v351_v55  ;;  %v952_v26 = vmul.f32 0.001953125, %v157_v47 }
  0x96   :  { %v367_v11 = vmax.f32 %v359_v63, 0.0  ;;  %v357_v36 = vmul.f32 %v952_v26, %v952_v26 }
  0x97   :  { %v281_v51 = vpop.xlane.xlu1 %280 }
  0x98   :  { %v345_v53 = vmul.f32 0.001953125, %v281_v51  ;;  %v947_v21 = vadd.f32 1e-05, %v367_v11 }
  0x99   :  { %v290_v57 = vpop.xlane.xlu2 %289 }
  0x9a   :  { %v361_v59 = vsub.f32 %v345_v53, %v353_v52  ;;  %v346_v6 = vmul.f32 0.001953125, %v290_v57  ;;  %vm389_vm8 = vweird.f32 %v947_v21 }
  0x9b   :  { %v272_v60 = vpop.xlane.xlu0 %271 }
  0x9c   :  { %v344_v61 = vmul.f32 0.001953125, %v272_v60  ;;  %v369_v2 = vmax.f32 %v361_v59, 0.0  ;;  %v362_v20 = vsub.f32 %v346_v6, %v354_v16 }
  0x9e   :  { %v360_v4 = vsub.f32 %v344_v61, %v352_v58  ;;  %v938_v12 = vadd.f32 1e-05, %v369_v2  ;;  %v370_v28 = vmax.f32 %v362_v20, 0.0 }
  0xa0   :  { %v368_v7 = vmax.f32 %v360_v4, 0.0  ;;  %v308_v8 = vpop.xlane.xlu1 %307  ;;  %v970_v39 = vadd.f32 1e-05, %v370_v28  ;;  %vm409_vm5 = vweird.f32 %v938_v12 }
  0xa1   :  { %v348_v13 = vmul.f32 0.001953125, %v308_v8 }
  0xa2   :  { %v944_v17 = vadd.f32 1e-05, %v368_v7  ;;  %v317_v18 = vpop.xlane.xlu2 %316  ;;  %vm419_vm15 = vweird.f32 %v970_v39 }
  0xa3   :  { %v364_v19 = vsub.f32 %v348_v13, %v356_v9  ;;  %v349_v38 = vmul.f32 0.001953125, %v317_v18 }
  0xa4   :  { %683 = vrsqrt.f32 %v944_v17  ;;  %vm399_vm2 = vweird.f32 %v944_v17 }
  0xa5   :  { %685 = vrsqrt.f32 %v938_v12  ;;  %v372_v22 = vmax.f32 %v364_v19, 0.0  ;;  %v299_v23 = vpop.xlane.xlu0 %298  ;;  %v365_v51 = vsub.f32 %v349_v38, %v357_v36 }
  0xa6   :  { %v347_v25 = vmul.f32 0.001953125, %v299_v23  ;;  %687 = vrsqrt.f32 %v947_v21 }
  0xa7   :  { %v954_v27 = vadd.f32 1e-05, %v372_v22  ;;  %v373_v61 = vmax.f32 %v365_v51, 0.0 }
  0xa8   :  { %v363_v29 = vsub.f32 %v347_v25, %v355_v24 }
  0xa9   :  { %689 = vrsqrt.f32 %v954_v27  ;;  %v1003_v13 = vadd.f32 1e-05, %v373_v61  ;;  %vm439_vm10 = vweird.f32 %v954_v27 }
  0xaa   :  { %v959_v31 = vpop.eup %683  ;;  %v371_v33 = vmax.f32 %v363_v29, 0.0  ;;  %v962_v34 = vpop.permute.xlu2 %551  ;;  %v491_v29 = vperm.slane %v940_v14, 0 }
  0xab   :  { %v964_v35 = vpop.eup %685  ;;  %v394_v37 = vmul.f32 %v959_v31, %v944_v17  ;;  %vm400_vm1 = vweird.f32 %v959_v31 }
  0xac   :  { %v972_v40 = vadd.f32 1e-05, %v371_v33  ;;  %v404_v43 = vmul.f32 %v964_v35, %v938_v12  ;;  %v980_v47 = vpop.eup %687  ;;  %v489_v33 = vperm.slane %v920_v48, 0  ;;  %vm1021_vm3 = vmor %vm399_vm2, %vm400_vm1  ;;  %vm410_vm4 = vweird.f32 %v964_v35 }
  0xad   :  { %v326_v42 = vpop.xlane.xlu0 %325  ;;  %v395_v44 = vmul.f32 %v959_v31, %v394_v37  ;;  %v384_v59 = vmul.f32 %v980_v47, %v947_v21  ;;  %vm1047_vm6 = vmor %vm409_vm5, %vm410_vm4  ;;  %vm390_vm7 = vweird.f32 %v980_v47 }
  0xae   :  { %691 = vrsqrt.f32 %v972_v40  ;;  %v350_v46 = vmul.f32 0.001953125, %v326_v42  ;;  %v405_v55 = vmul.f32 %v964_v35, %v404_v43  ;;  %v488_v42 = vperm.slane %v924_v50, 0  ;;  %vm1068_vm12 = vmor %vm389_vm8, %vm390_vm7 }
  0xaf   :  { %v982_v52 = vpop.eup %689  ;;  %693 = vrsqrt.f32 %v970_v39  ;;  %v396_v56 = vmul.f32 0.5, %v395_v44  ;;  %v385_v9 = vmul.f32 %v980_v47, %v384_v59  ;;  %v505_v51 = vsub.f32 %v728_v1, %v489_v33 }
  0xb0   :  { %v366_v53 = vsub.f32 %v350_v46, %v358_v41  ;;  %v434_v60 = vmul.f32 %v982_v52, %v954_v27  ;;  %v406_v7 = vmul.f32 0.5, %v405_v55  ;;  %v1035_v46 = vsub.f32 %v723_v0, %v491_v29 }
  0xb1   :  { %v397_v8 = vsub.f32 1.5, %v396_v56  ;;  %v386_v24 = vmul.f32 0.5, %v385_v9  ;;  %v487_v56 = vperm.slane %v922_v49, 0  ;;  %v504_v1 = vsub.f32 %v780_v45, %v488_v42 }
  0xb2   :  { %v374_v57 = vmax.f32 %v366_v53, 0.0  ;;  %v986_v58 = vpop.permute.xlu2 %563  ;;  %v435_v11 = vmul.f32 %v982_v52, %v434_v60  ;;  %v407_v20 = vsub.f32 1.5, %v406_v7  ;;  %vm440_vm9 = vweird.f32 %v982_v52 }
  0xb3   :  { %v398_v22 = vmul.f32 %v959_v31, %v397_v8  ;;  %v387_v17 = vsub.f32 1.5, %v386_v24  ;;  %v554_v9 = vperm.slane %v962_v34, 0  ;;  %vm429_vm13 = vweird.f32 %v972_v40  ;;  %vm1075_vm14 = vmor %vm439_vm10, %vm440_vm9 }
  0xb4   :  { %v992_v63 = vpop.eup %691  ;;  %v994_v2 = vadd.f32 1e-05, %v374_v57  ;;  %v436_v25 = vmul.f32 0.5, %v435_v11  ;;  %v408_v48 = vmul.f32 %v964_v35, %v407_v20  ;;  %v492_v57 = vperm.slane %v932_v62, 0 }
  0xb5   :  { %v424_v4 = vmul.f32 %v992_v63, %v972_v40  ;;  %v998_v6 = vpop.eup %693  ;;  %v402_v14 = vsel %vm1021_vm3, %v959_v31, %v398_v22  ;;  %v388_v62 = vmul.f32 %v980_v47, %v387_v17  ;;  %vm430_vm11 = vweird.f32 %v992_v63 }
  0xb6   :  { %695 = vrsqrt.f32 %v994_v2  ;;  %v414_v19 = vmul.f32 %v998_v6, %v970_v39  ;;  %v437_v43 = vsub.f32 1.5, %v436_v25  ;;  %v520_v60 = vperm.slane %v402_v14, 0  ;;  %vm1088_vm0 = vmor %vm429_vm13, %vm430_vm11 }
  0xb7   :  { %v425_v16 = vmul.f32 %v992_v63, %v424_v4  ;;  %697 = vrsqrt.f32 %v1003_v13  ;;  %v412_v61 = vsel %vm1047_vm6, %v964_v35, %v408_v48  ;;  %v508_v27 = vsub.f32 %v750_v15, %v492_v57 }
  0xb8   :  { %v1006_v18 = vpop.permute.xlu1 %545  ;;  %v415_v37 = vmul.f32 %v998_v6, %v414_v19  ;;  %v438_v4 = vmul.f32 %v982_v52, %v437_v43  ;;  %v536_v8 = vmul.f32 %v520_v60, %v504_v1  ;;  %v521_v11 = vperm.slane %v412_v61, 0 }
  0xb9   :  { %v426_v36 = vmul.f32 0.5, %v425_v16  ;;  %v503_v16 = vsub.f32 %v741_v10, %v487_v56  ;;  %v392_v34 = vsel %vm1068_vm12, %v980_v47, %v388_v62  ;;  %vm420_vm1 = vweird.f32 %v998_v6 }
  0xba   :  { %v1012_v23 = vpop.permute.xlu2 %575  ;;  %v416_v59 = vmul.f32 0.5, %v415_v37  ;;  %v442_v22 = vsel %vm1075_vm14, %v982_v52, %v438_v4  ;;  %v663_v47 = vlaneseq  ;;  %v592_v52 = vmul.f32 %v554_v9, %v536_v8  ;;  %vm1107_vm4 = vmor %vm419_vm15, %vm420_vm1 }
  0xbb   :  { %v427_v50 = vsub.f32 1.5, %v426_v36  ;;  %v537_v36 = vmul.f32 %v521_v11, %v505_v51  ;;  %v519_v38 = vperm.slane %v392_v34, 0  ;;  %vm459_vm3 = vweird.f32 %v994_v2 }
  0xbc   :  { %v1015_v28 = vpop.eup %695  ;;  %v417_v35 = vsub.f32 1.5, %v416_v59  ;;  %vm1112_vm5 = vcmp.lt.s32.totalorder %v663_v47, 512  ;;  %v490_v60 = vperm.slane %v934_v3, 0  ;;  %v566_v20 = vperm.slane %v986_v58, 0 }
  0xbd   :  { %v454_v41 = vmul.f32 %v1015_v28, %v994_v2  ;;  %v1041_v31 = vpop.eup %697  ;;  %v428_v7 = vmul.f32 %v992_v63, %v427_v50  ;;  %vm460_vm2 = vweird.f32 %v1015_v28  ;;  %v548_v50 = vperm.slane %v1006_v18, 0 }
  0xbe   :  { %v444_v45 = vmul.f32 %v1041_v31, %v1003_v13  ;;  %v418_v33 = vmul.f32 %v998_v6, %v417_v35  ;;  %vm1120_vm6 = vmor %vm459_vm3, %vm460_vm2  ;;  %v494_v18 = vperm.slane %v956_v30, 0  ;;  %v535_v0 = vmul.f32 %v519_v38, %v503_v16 }
  0xbf   :  { %v455_v44 = vmul.f32 %v1015_v28, %v454_v41  ;;  %v432_v24 = vsel %vm1088_vm0, %v992_v63, %v428_v7  ;;  %v524_v41 = vperm.slane %v442_v22, 0  ;;  %v578_v30 = vperm.slane %v1012_v23, 0 }
  0xc0   :  { %v558_v53 = vpop.permute.xlu0 %557  ;;  %v1039_v55 = vpop.permute.xlu1 %569  ;;  %v445_v40 = vmul.f32 %v1041_v31, %v444_v45  ;;  %v523_v17 = vperm.slane %v432_v24, 0  ;;  %v422_v56 = vsel %vm1107_vm4, %v998_v6, %v418_v33  ;;  %v591_v3 = vmul.f32 %v548_v50, %v535_v0 }
  0xc1   :  { %v456_v12 = vmul.f32 0.5, %v455_v44  ;;  %v560_v10 = vperm.slane %v558_v53, 0  ;;  %v572_v2 = vperm.slane %v1039_v55, 0  ;;  %v522_v62 = vperm.slane %v422_v56, 0 }
  0xc2   :  { %v1056_v49 = vpop.permute.xlu2 %587  ;;  %v446_v44 = vmul.f32 0.5, %v445_v40  ;;  %v539_v6 = vmul.f32 %v523_v17, %v1035_v46  ;;  %v506_v8 = vsub.f32 %v767_v32, %v490_v60  ;;  %v510_v9 = vsub.f32 %v791_v54, %v494_v18 }
  0xc3   :  { %v457_v19 = vsub.f32 1.5, %v456_v12  ;;  %v593_v48 = vmul.f32 %v560_v10, %v537_v36  ;;  %v540_v12 = vmul.f32 %v524_v41, %v508_v27  ;;  %vm450_vm7 = vweird.f32 %v1041_v31 }
  0xc4   :  { %v447_v61 = vsub.f32 1.5, %v446_v44  ;;  %v595_v7 = vmul.f32 %v572_v2, %v539_v6  ;;  %vm449_vm8 = vweird.f32 %v1003_v13  ;;  %v590_v32 = vperm.slane %v1056_v49, 0 }
  0xc5   :  { %v458_v42 = vmul.f32 %v1015_v28, %v457_v19  ;;  %v596_v11 = vmul.f32 %v578_v30, %v540_v12  ;;  %v538_v19 = vmul.f32 %v522_v62, %v506_v8  ;;  %vm451_vm9 = vmor %vm449_vm8, %vm450_vm7  ;;  %v493_v58 = vperm.slane %v952_v26, 0 }
  0xc6   :  { %v448_v34 = vmul.f32 %v1041_v31, %v447_v61 }
  0xc7   :  { %v462_v1 = vsel %vm1120_vm6, %v1015_v28, %v458_v42  ;;  %v594_v47 = vmul.f32 %v566_v20, %v538_v19 }
  0xc8   :  { %v608_v25 = vpop.permute.xlu0 %607  ;;  %v1097_v29 = vpop.permute.xlu1 %581  ;;  %v526_v35 = vperm.slane %v462_v1, 0  ;;  %v452_v24 = vsel %vm451_vm9, %v1041_v31, %v448_v34 }
  0xc9   :  { %v610_v37 = vperm.slane %v608_v25, 0  ;;  %v525_v33 = vperm.slane %v452_v24, 0  ;;  %v584_v38 = vperm.slane %v1097_v29, 0 }
  0xca   :  { %v614_v14 = vpop.permute.xlu2 %613  ;;  %v542_v22 = vmul.f32 %v526_v35, %v510_v9 }
  0xcb   :  { %v648_v43 = vadd.f32 %v610_v37, %v592_v52  ;;  %v616_v63 = vperm.slane %v614_v14, 0  ;;  %v509_v37 = vsub.f32 %v804_v5, %v493_v58 }
  0xcc   :  { %v598_v25 = vmul.f32 %v590_v32, %v542_v22 }
  0xcd   :  { %v656_v39 = vmax.f32 %v648_v43, 0.0  ;;  %v649_v59 = vadd.f32 %v616_v63, %v593_v48  ;;  %v541_v14 = vmul.f32 %v525_v33, %v509_v37 }
  0xcf   :  { %668 = vst.msk [vmem:[%s1185_s3 + $0x4] sm:$0xf] %vm1112_vm5, %v656_v39  ;;  %v657_v55 = vmax.f32 %v649_v59, 0.0  ;;  %v597_v17 = vmul.f32 %v584_v38, %v541_v14 }
  0xd0   :  { %v626_v4 = vpop.permute.xlu0 %625  ;;  %v602_v45 = vpop.permute.xlu1 %601 }
  0xd1   :  { %669 = vst.msk [vmem:[%s1185_s3 + $0x8] sm:$0xf] %vm1112_vm5, %v657_v55  ;;  %v628_v28 = vperm.slane %v626_v4, 0  ;;  %v604_v46 = vperm.slane %v602_v45, 0 }
  0xd2   :  { %v632_v21 = vpop.permute.xlu2 %631 }
  0xd3   :  { %v651_v16 = vadd.f32 %v628_v28, %v595_v7  ;;  %v647_v23 = vadd.f32 %v604_v46, %v591_v3  ;;  %v634_v27 = vperm.slane %v632_v21, 0 }
  0xd5   :  { %v659_v10 = vmax.f32 %v651_v16, 0.0  ;;  %v655_v15 = vmax.f32 %v647_v23, 0.0  ;;  %v652_v40 = vadd.f32 %v634_v27, %v596_v11 }
  0xd7   :  { %671 = vst.msk [vmem:[%s1185_s3 + $0x10] sm:$0xf] %vm1112_vm5, %v659_v10  ;;  %v660_v54 = vmax.f32 %v652_v40, 0.0 }
  0xd8   :  { %667 = vst.msk [vmem:[%s1185_s3] sm:$0xf] %vm1112_vm5, %v655_v15  ;;  %v644_v13 = vpop.permute.xlu0 %643  ;;  %v620_v49 = vpop.permute.xlu1 %619 }
  0xd9   :  { %672 = vst.msk [vmem:[%s1185_s3 + $0x14] sm:$0xf] %vm1112_vm5, %v660_v54  ;;  %v646_v52 = vperm.slane %v644_v13, 0  ;;  %v622_v26 = vperm.slane %v620_v49, 0 }
  0xdb   :  { %v654_v31 = vadd.f32 %v646_v52, %v598_v25  ;;  %v650_v36 = vadd.f32 %v622_v26, %v594_v47 }
  0xdd   :  { %v662_v41 = vmax.f32 %v654_v31, 0.0  ;;  %v658_v42 = vmax.f32 %v650_v36, 0.0 }
  0xdf   :  { %674 = vst.msk [vmem:[%s1185_s3 + $0x1c] sm:$0xf] %vm1112_vm5, %v662_v41 }
  0xe0   :  { %670 = vst.msk [vmem:[%s1185_s3 + $0xc] sm:$0xf] %vm1112_vm5, %v658_v42  ;;  %v638_v48 = vpop.permute.xlu1 %637 }
  0xe1   :  { %v640_v5 = vperm.slane %v638_v48, 0 }
  0xe3   :  { %v653_v43 = vadd.f32 %v640_v5, %v597_v17 }
  0xe5   :  { %v661_v29 = vmax.f32 %v653_v43, 0.0 }
  0xe7   :  { %673 = vst.msk [vmem:[%s1185_s3 + $0x18] sm:$0xf] %vm1112_vm5, %v661_v29 }

// kernel: _lambda_.17
= control target key start
LH: loop header
LB: loop body
LE: loop exit
PB: predicated region body
PF: predicated region fallthrough
CT: control target
= control target key end

     0   :  { %s1766_s9 = smov 0   ;;  %s1768_s10 = smov 0   ;;  %s2097_s0 = inlined_call_operand.vmem [shape: bf16[1024,384], index: 0, kind: input, shape index: {}]   ;;  %s2098_s1 = inlined_call_operand.vmem [shape: bf16[384,128], index: 1, kind: input, shape index: {}]   ;;  %s2099_s2 = inlined_call_operand.vmem [shape: f32[1024,128], index: 2, kind: output, shape index: {}]  }
   0x1   :  { %s1770_s11 = smov 0  }
   0x2 LB: > { %s31_s12 = sadd.s32 1, %s1745_s10  ;;  %p1311_p0 = scmp.ge.s32.totalorder %s1749_s11, 1  ;;  %s1749_s11 = sphi %s1770_s11, %s12_s11   ;;  %s1745_s10 = sphi %s1768_s10, %s2101_s10   ;;  %s1741_s9 = sphi %s1766_s9, %s2100_s9  }
   0x3   : > { %p33_p1 = scmp.ge.s32.totalorder %s31_s12, 4  ;;  %p158_p2 = scmp.lt.s32.totalorder %s1749_s11, 5 }
   0x5   : > { %s2103_s12 = smov (%p33_p1, %s31_s12), 0  ;;  %p159_p3 = pnand %p1311_p0, %p158_p2 }
   0x6   : > { %s1312_s3 = sshll.u32 (!%p159_p3), %s1741_s9, 5 }
   0x7   : > { %162 = sbr.rel (%p159_p3) target bundleno = 365 (0x16d), region = 28  ;;  %p198_p4 = scmp.lt.s32.totalorder (!%p159_p3), %s1312_s3, 127 }
   0xc   : > { %v1661_v0 = vld [vmem:[%s2098_s1 + $0x38] sm:$0xff]  ;;  %v1660_v3 = vld [vmem:[%s2098_s1 + $0x30] sm:$0xff]  ;;  %v1659_v6 = vld [vmem:[%s2098_s1 + $0x28] sm:$0xff]  ;;  %s2105_s3 = smov (!%p198_p4, %s1312_s3), 127 }
   0xd   : > { %v1792_v1 = vld [vmem:[%s2098_s1 + $0x78] sm:$0xff]  ;;  %806 = vmatpush.bf16.msra.mxu0 %v1661_v0  ;;  %1678 = vmatpush.bf16.msra.mxu3 %v1661_v0  ;;  %v1807_v4 = vld [vmem:[%s2098_s1 + $0x70] sm:$0xff]  ;;  %v1822_v7 = vld [vmem:[%s2098_s1 + $0x68] sm:$0xff]  ;;  %s1702_s21 = smul.u32 12, %s2105_s3  ;;  %s1315_s17 = sshll.u32 %s2105_s3, 3 }
   0xe   : > { %v1797_v2 = vld [vmem:[%s2098_s1 + $0xb8] sm:$0xff]  ;;  %895 = vmatpush.bf16.msra.mxu1 %v1792_v1  ;;  %v1812_v5 = vld [vmem:[%s2098_s1 + $0xb0] sm:$0xff]  ;;  %v1827_v8 = vld [vmem:[%s2098_s1 + $0xa8] sm:$0xff]  ;;  %s1993_s20 = scalar_lea.vmem %s2099_s2, %s1315_s17 }
   0xf   : > { %984 = vmatpush.bf16.msra.mxu2 %v1797_v2  ;;  %v1658_v9 = vld [vmem:[%s2098_s1 + $0x20] sm:$0xff]  ;;  %v1657_v12 = vld [vmem:[%s2098_s1 + $0x18] sm:$0xff]  ;;  %v1656_v15 = vld [vmem:[%s2098_s1 + $0x10] sm:$0xff]  ;;  %s1879_s30 = scalar_lea.vmem %s2097_s0, %s1702_s21 }
  0x10   : > { %v1838_v10 = vld [vmem:[%s2098_s1 + $0x60] sm:$0xff]  ;;  %v1665_v13 = vld [vmem:[%s2098_s1 + $0x58] sm:$0xff]  ;;  %v1664_v16 = vld [vmem:[%s2098_s1 + $0x50] sm:$0xff] }
  0x11   : > { %807 = vmatpush.bf16.msra.mxu0 %v1660_v3  ;;  %1679 = vmatpush.bf16.msra.mxu3 %v1660_v3  ;;  %v1843_v11 = vld [vmem:[%s2098_s1 + $0xa0] sm:$0xff]  ;;  %v1858_v14 = vld [vmem:[%s2098_s1 + $0x98] sm:$0xff]  ;;  %v1871_v17 = vld [vmem:[%s2098_s1 + $0x90] sm:$0xff] }
  0x12   : > { %896 = vmatpush.bf16.msra.mxu1 %v1807_v4  ;;  %v1655_v18 = vld [vmem:[%s2098_s1 + $0x8] sm:$0xff]  ;;  %v1654_v21 = vld [vmem:[%s2098_s1] sm:$0xff]  ;;  %v1320_v29 = vld [vmem:[%s1879_s30 + $0xc] sm:$0xf0] }
  0x13   : > { %985 = vmatpush.bf16.msra.mxu2 %v1812_v5  ;;  %v1663_v19 = vld [vmem:[%s2098_s1 + $0x48] sm:$0xff]  ;;  %v1662_v22 = vld [vmem:[%s2098_s1 + $0x40] sm:$0xff]  ;;  %v1608_v31 = vld [vmem:[%s1879_s30 + $0x10] sm:$0xf0] }
  0x14   : > { %v1888_v20 = vld [vmem:[%s2098_s1 + $0x88] sm:$0xff]  ;;  %v1899_v23 = vld [vmem:[%s2098_s1 + $0x80] sm:$0xff]  ;;  %v1330_v36 = vld [vmem:[%s1879_s30 + $0x18] sm:$0xf] }
  0x15   : > { %808 = vmatpush.bf16.msra.mxu0 %v1659_v6  ;;  %1680 = vmatpush.bf16.msra.mxu3 %v1659_v6  ;;  %v1318_v24 = vld [vmem:[%s1879_s30] sm:$0xf]  ;;  %v1607_v25 = vld [vmem:[%s1879_s30 + $0x8] sm:$0xf0]  ;;  %v1606_v28 = vld [vmem:[%s1879_s30 + $0x4] sm:$0xf] }
  0x16   : > { %897 = vmatpush.bf16.msra.mxu1 %v1822_v7  ;;  %v1462_v26 = vld [vmem:[%s1879_s30 + $0x120] sm:$0xf]  ;;  %v1643_v27 = vld [vmem:[%s1879_s30 + $0x128] sm:$0xf0]  ;;  %v1326_v30 = vld [vmem:[%s1879_s30 + $0x8] sm:$0xf]  ;;  %v1319_v32 = vor.u32 %v1607_v25, %v1318_v24  ;;  %v1323_v34 = vor.u32 %v1606_v28, %v1320_v29 }
  0x17   : > { %986 = vmatpush.bf16.msra.mxu2 %v1827_v8  ;;  %v1463_v33 = vor.u32 %v1643_v27, %v1462_v26  ;;  %v1327_v35 = vor.u32 %v1608_v31, %v1326_v30  ;;  %v1610_v37 = vld [vmem:[%s1879_s30 + $0x20] sm:$0xf0]  ;;  %v1474_v38 = vld [vmem:[%s1879_s30 + $0x138] sm:$0xf]  ;;  %v1609_v40 = vld [vmem:[%s1879_s30 + $0x1c] sm:$0xf] }
  0x18   : > { %v1646_v39 = vld [vmem:[%s1879_s30 + $0x140] sm:$0xf0]  ;;  %v1332_v41 = vld [vmem:[%s1879_s30 + $0x24] sm:$0xf0]  ;;  %v1338_v42 = vld [vmem:[%s1879_s30 + $0x20] sm:$0xf]  ;;  %v1331_v44 = vor.u32 %v1610_v37, %v1330_v36 }
  0x19   : > { %809 = vmatpush.bf16.msra.mxu0 %v1658_v9  ;;  %1681 = vmatpush.bf16.msra.mxu3 %v1658_v9  ;;  %v1611_v43 = vld [vmem:[%s1879_s30 + $0x28] sm:$0xf0]  ;;  %v1475_v45 = vor.u32 %v1646_v39, %v1474_v38  ;;  %v1335_v46 = vor.u32 %v1609_v40, %v1332_v41  ;;  %v1342_v48 = vld [vmem:[%s1879_s30 + $0x30] sm:$0xf]  ;;  %v1613_v49 = vld [vmem:[%s1879_s30 + $0x38] sm:$0xf0] }
  0x1a   : > { %898 = vmatpush.bf16.msra.mxu1 %v1838_v10  ;;  %v1339_v47 = vor.u32 %v1611_v43, %v1338_v42  ;;  %v1486_v50 = vld [vmem:[%s1879_s30 + $0x150] sm:$0xf]  ;;  %v1649_v51 = vld [vmem:[%s1879_s30 + $0x158] sm:$0xf0]  ;;  %v1612_v52 = vld [vmem:[%s1879_s30 + $0x34] sm:$0xf]  ;;  %v1343_v56 = vor.u32 %v1613_v49, %v1342_v48 }
  0x1b   : > { %987 = vmatpush.bf16.msra.mxu2 %v1843_v11  ;;  %v1344_v53 = vld [vmem:[%s1879_s30 + $0x3c] sm:$0xf0]  ;;  %v1350_v54 = vld [vmem:[%s1879_s30 + $0x38] sm:$0xf]  ;;  %v1614_v55 = vld [vmem:[%s1879_s30 + $0x40] sm:$0xf0]  ;;  %v1487_v57 = vor.u32 %v1649_v51, %v1486_v50 }
  0x1c   : > { %v1347_v58 = vor.u32 %v1612_v52, %v1344_v53  ;;  %v1351_v59 = vor.u32 %v1614_v55, %v1350_v54  ;;  %v1354_v60 = vld [vmem:[%s1879_s30 + $0x48] sm:$0xf]  ;;  %v1616_v61 = vld [vmem:[%s1879_s30 + $0x50] sm:$0xf0]  ;;  %v1615_v0 = vld [vmem:[%s1879_s30 + $0x4c] sm:$0xf] }
  0x1d   : > { %810 = vmatpush.bf16.msra.mxu0 %v1657_v12  ;;  %1682 = vmatpush.bf16.msra.mxu3 %v1657_v12  ;;  %v1498_v62 = vld [vmem:[%s1879_s30 + $0x168] sm:$0xf]  ;;  %v1652_v63 = vld [vmem:[%s1879_s30 + $0x170] sm:$0xf0]  ;;  %v1617_v3 = vld [vmem:[%s1879_s30 + $0x58] sm:$0xf0] }
  0x1e   : > { %899 = vmatpush.bf16.msra.mxu1 %v1665_v13  ;;  %v1619_v9 = vld [vmem:[%s1879_s30 + $0x68] sm:$0xf0]  ;;  %v1464_v12 = vld [vmem:[%s1879_s30 + $0x12c] sm:$0xf0]  ;;  %v1645_v24 = vld [vmem:[%s1879_s30 + $0x13c] sm:$0xf] }
  0x1f   : > { %988 = vmatpush.bf16.msra.mxu2 %v1858_v14  ;;  %v1476_v25 = vld [vmem:[%s1879_s30 + $0x144] sm:$0xf0]  ;;  %v1386_v26 = vld [vmem:[%s1879_s30 + $0x80] sm:$0xf]  ;;  %v1623_v27 = vld [vmem:[%s1879_s30 + $0x88] sm:$0xf0] }
  0x20   : > { %v1479_v29 = vor.u32 %v1645_v24, %v1476_v25  ;;  %v1387_v31 = vor.u32 %v1623_v27, %v1386_v26  ;;  %v1488_v36 = vld [vmem:[%s1879_s30 + $0x15c] sm:$0xf0]  ;;  %v1398_v38 = vld [vmem:[%s1879_s30 + $0x98] sm:$0xf]  ;;  %v1626_v39 = vld [vmem:[%s1879_s30 + $0xa0] sm:$0xf0] }
  0x21   : > { %811 = vmatpush.bf16.msra.mxu0 %v1656_v15  ;;  %1683 = vmatpush.bf16.msra.mxu3 %v1656_v15  ;;  %v1620_v15 = vld [vmem:[%s1879_s30 + $0x70] sm:$0xf0]  ;;  %v1392_v37 = vld [vmem:[%s1879_s30 + $0x9c] sm:$0xf0]  ;;  %v1399_v43 = vor.u32 %v1626_v39, %v1398_v38  ;;  %v1500_v48 = vld [vmem:[%s1879_s30 + $0x174] sm:$0xf0] }
  0x22   : > { %900 = vmatpush.bf16.msra.mxu1 %v1664_v16  ;;  %v1404_v49 = vld [vmem:[%s1879_s30 + $0xb4] sm:$0xf0]  ;;  %v1410_v50 = vld [vmem:[%s1879_s30 + $0xb0] sm:$0xf]  ;;  %v1629_v51 = vld [vmem:[%s1879_s30 + $0xb8] sm:$0xf0] }
  0x23   : > { %989 = vmatpush.bf16.msra.mxu2 %v1871_v17  ;;  %v1411_v55 = vor.u32 %v1629_v51, %v1410_v50  ;;  %v1636_v38 = vld [vmem:[%s1879_s30 + $0xf4] sm:$0xf]  ;;  %v1494_v39 = vld [vmem:[%s1879_s30 + $0x158] sm:$0xf] }
  0x25   : > { %812 = vmatpush.bf16.msra.mxu0 %v1655_v18  ;;  %1684 = vmatpush.bf16.msra.mxu3 %v1655_v18 }
  0x26   : > { %901 = vmatpush.bf16.msra.mxu1 %v1663_v19 }
  0x27   : > { %990 = vmatpush.bf16.msra.mxu2 %v1888_v20 }
  0x29   : > { %813 = vmatpush.bf16.msra.mxu0 %v1654_v21  ;;  %1685 = vmatpush.bf16.msra.mxu3 %v1654_v21  ;;  %v1622_v21 = vld [vmem:[%s1879_s30 + $0x80] sm:$0xf0] }
  0x2a   : > { %902 = vmatpush.bf16.msra.mxu1 %v1662_v22 }
  0x2b   : > { %991 = vmatpush.bf16.msra.mxu2 %v1899_v23 }
  0x2c   : > { %814 = vmatmul.bf16.vlgmr.msra.gmra.mxu0 %v1319_v32  ;;  %874 = vmatmul.bf16.vlgmr.msra.gmra.mxu3 %v1463_v33  ;;  %v1390_v32 = vld [vmem:[%s1879_s30 + $0x90] sm:$0xf]  ;;  %v1625_v33 = vld [vmem:[%s1879_s30 + $0x98] sm:$0xf0] }
  0x2d   : > { %1686 = vmatpush.bf16.msrb.mxu3 %v1792_v1  ;;  %903 = vmatmul.bf16.vlgmr.msra.gmra.mxu1 %v1323_v34  ;;  %v1356_v1 = vld [vmem:[%s1879_s30 + $0x54] sm:$0xf0]  ;;  %v1624_v34 = vld [vmem:[%s1879_s30 + $0x94] sm:$0xf]  ;;  %v1391_v40 = vor.u32 %v1625_v33, %v1390_v32 }
  0x2e   : > { %992 = vmatmul.bf16.vlgmr.msra.gmra.mxu2 %v1327_v35  ;;  %v1359_v6 = vor.u32 %v1615_v0, %v1356_v1  ;;  %v1648_v35 = vld [vmem:[%s1879_s30 + $0x154] sm:$0xf]  ;;  %v1395_v42 = vor.u32 %v1624_v34, %v1392_v37  ;;  %v1637_v37 = vld [vmem:[%s1879_s30 + $0xf8] sm:$0xf0] }
  0x2f   : > { %v1491_v41 = vor.u32 %v1648_v35, %v1488_v36  ;;  %v1438_v36 = vld [vmem:[%s1879_s30 + $0xf0] sm:$0xf] }
  0x31   : > { %1687 = vmatpush.bf16.msrb.mxu3 %v1807_v4  ;;  %v1355_v4 = vor.u32 %v1616_v61, %v1354_v60  ;;  %v1644_v60 = vld [vmem:[%s1879_s30 + $0x130] sm:$0xf0]  ;;  %v1416_v61 = vld [vmem:[%s1879_s30 + $0xcc] sm:$0xf0] }
  0x35   : > { %1688 = vmatpush.bf16.msrb.mxu3 %v1822_v7 }
  0x39   : > { %1689 = vmatpush.bf16.msrb.mxu3 %v1838_v10  ;;  %v1618_v10 = vld [vmem:[%s1879_s30 + $0x64] sm:$0xf] }
  0x3c   : > { %819 = vmatmul.bf16.gmra.mxu0 %v1331_v44  ;;  %879 = vmatmul.bf16.gmra.mxu3 %v1475_v45  ;;  %v1402_v44 = vld [vmem:[%s1879_s30 + $0xa8] sm:$0xf]  ;;  %v1628_v45 = vld [vmem:[%s1879_s30 + $0xb0] sm:$0xf0] }
  0x3d   : > { %1690 = vmatpush.bf16.msrb.mxu3 %v1665_v13  ;;  %908 = vmatmul.bf16.gmra.mxu1 %v1335_v46  ;;  %v1368_v13 = vld [vmem:[%s1879_s30 + $0x6c] sm:$0xf0]  ;;  %v1627_v46 = vld [vmem:[%s1879_s30 + $0xac] sm:$0xf]  ;;  %v1403_v52 = vor.u32 %v1628_v45, %v1402_v44 }
  0x3e   : > { %997 = vmatmul.bf16.gmra.mxu2 %v1339_v47  ;;  %v1371_v18 = vor.u32 %v1618_v10, %v1368_v13  ;;  %v1651_v47 = vld [vmem:[%s1879_s30 + $0x16c] sm:$0xf]  ;;  %v1407_v54 = vor.u32 %v1627_v46, %v1404_v49  ;;  %v1634_v13 = vld [vmem:[%s1879_s30 + $0xe0] sm:$0xf0] }
  0x3f   : > { %v1503_v53 = vor.u32 %v1651_v47, %v1500_v48  ;;  %v1439_v47 = vor.u32 %v1637_v37, %v1438_v36 }
  0x41   : > { %1691 = vmatpush.bf16.msrb.mxu3 %v1664_v16 }
  0x45   : > { %1692 = vmatpush.bf16.msrb.mxu3 %v1663_v19 }
  0x49   : > { %1693 = vmatpush.bf16.msrb.mxu3 %v1662_v22  ;;  %v1621_v22 = vld [vmem:[%s1879_s30 + $0x7c] sm:$0xf] }
  0x4c   : > { %824 = vmatmul.bf16.gmra.mxu0 %v1343_v56  ;;  %884 = vmatmul.bf16.gmra.mxu3 %v1487_v57  ;;  %v1414_v56 = vld [vmem:[%s1879_s30 + $0xc0] sm:$0xf]  ;;  %v1631_v57 = vld [vmem:[%s1879_s30 + $0xc8] sm:$0xf0] }
  0x4d   : > { %1694 = vmatpush.bf16.msra.mxu3 %v1797_v2  ;;  %913 = vmatmul.bf16.gmra.mxu1 %v1347_v58  ;;  %v1362_v2 = vld [vmem:[%s1879_s30 + $0x50] sm:$0xf]  ;;  %v1630_v58 = vld [vmem:[%s1879_s30 + $0xc4] sm:$0xf]  ;;  %v1415_v0 = vor.u32 %v1631_v57, %v1414_v56 }
  0x4e   : > { %1002 = vmatmul.bf16.gmra.mxu2 %v1351_v59  ;;  %v1363_v7 = vor.u32 %v1617_v3, %v1362_v2  ;;  %v1470_v59 = vld [vmem:[%s1879_s30 + $0x128] sm:$0xf]  ;;  %v1419_v3 = vor.u32 %v1630_v58, %v1416_v61  ;;  %v1640_v61 = vld [vmem:[%s1879_s30 + $0x110] sm:$0xf0] }
  0x4f   : > { %v1471_v1 = vor.u32 %v1644_v60, %v1470_v59  ;;  %v1450_v60 = vld [vmem:[%s1879_s30 + $0x108] sm:$0xf] }
  0x51   : > { %1695 = vmatpush.bf16.msra.mxu3 %v1812_v5  ;;  %v1499_v5 = vor.u32 %v1652_v63, %v1498_v62  ;;  %v1422_v62 = vld [vmem:[%s1879_s30 + $0xc8] sm:$0xf]  ;;  %v1632_v63 = vld [vmem:[%s1879_s30 + $0xd0] sm:$0xf0] }
  0x55   : > { %1696 = vmatpush.bf16.msra.mxu3 %v1827_v8  ;;  %v1366_v8 = vld [vmem:[%s1879_s30 + $0x60] sm:$0xf] }
  0x56   : > { %v1367_v16 = vor.u32 %v1619_v9, %v1366_v8 }
  0x59   : > { %1697 = vmatpush.bf16.msra.mxu3 %v1843_v11  ;;  %v1642_v11 = vld [vmem:[%s1879_s30 + $0x124] sm:$0xf] }
  0x5c   : > { %829 = vmatmul.bf16.gmra.mxu0 %v1355_v4  ;;  %889 = vmatmul.bf16.gmra.mxu3 %v1499_v5  ;;  %v1423_v4 = vor.u32 %v1632_v63, %v1422_v62  ;;  %v1639_v62 = vld [vmem:[%s1879_s30 + $0x10c] sm:$0xf]  ;;  %v1506_v63 = vld [vmem:[%s1879_s30 + $0x170] sm:$0xf] }
  0x5d   : > { %1698 = vmatpush.bf16.msra.mxu3 %v1858_v14  ;;  %918 = vmatmul.bf16.gmra.mxu1 %v1359_v6  ;;  %v1374_v14 = vld [vmem:[%s1879_s30 + $0x68] sm:$0xf] }
  0x5e   : > { %1007 = vmatmul.bf16.gmra.mxu2 %v1363_v7  ;;  %v1375_v19 = vor.u32 %v1620_v15, %v1374_v14  ;;  %v1633_v14 = vld [vmem:[%s1879_s30 + $0xdc] sm:$0xf]  ;;  %v1482_v15 = vld [vmem:[%s1879_s30 + $0x140] sm:$0xf] }
  0x61   : > { %1699 = vmatpush.bf16.msra.mxu3 %v1871_v17  ;;  %v1467_v17 = vor.u32 %v1642_v11, %v1464_v12  ;;  %v1426_v12 = vld [vmem:[%s1879_s30 + $0xd8] sm:$0xf] }
  0x62   : > { %v1427_v24 = vor.u32 %v1634_v13, %v1426_v12 }
  0x65   : > { %1700 = vmatpush.bf16.msra.mxu3 %v1888_v20  ;;  %v1378_v20 = vld [vmem:[%s1879_s30 + $0x78] sm:$0xf] }
  0x66   : > { %v1379_v28 = vor.u32 %v1622_v21, %v1378_v20 }
  0x69   : > { %1701 = vmatpush.bf16.msra.mxu3 %v1899_v23  ;;  %v1380_v23 = vld [vmem:[%s1879_s30 + $0x84] sm:$0xf0] }
  0x6a   : > { %v1383_v30 = vor.u32 %v1621_v22, %v1380_v23 }
  0x6c   : > { %834 = vmatmul.bf16.gmra.mxu0 %v1367_v16  ;;  %963 = vmatmul.bf16.vlgmr.msrb.gmra.mxu3 %v1467_v17  ;;  %v1647_v16 = vld [vmem:[%s1879_s30 + $0x148] sm:$0xf0]  ;;  %v1428_v17 = vld [vmem:[%s1879_s30 + $0xe4] sm:$0xf0] }
  0x6d   : > { %923 = vmatmul.bf16.gmra.mxu1 %v1371_v18  ;;  %v1434_v18 = vld [vmem:[%s1879_s30 + $0xe0] sm:$0xf]  ;;  %v1483_v25 = vor.u32 %v1647_v16, %v1482_v15  ;;  %v1431_v27 = vor.u32 %v1633_v14, %v1428_v17 }
  0x6e   : > { %1012 = vmatmul.bf16.gmra.mxu2 %v1375_v19  ;;  %v1635_v19 = vld [vmem:[%s1879_s30 + $0xe8] sm:$0xf0] }
  0x7c   : > { %839 = vmatmul.bf16.gmra.mxu0 %v1379_v28  ;;  %968 = vmatmul.bf16.gmra.mxu3 %v1479_v29  ;;  %v1435_v28 = vor.u32 %v1635_v19, %v1434_v18 }
  0x7d   : > { %928 = vmatmul.bf16.gmra.mxu1 %v1383_v30 }
  0x7e   : > { %1017 = vmatmul.bf16.gmra.mxu2 %v1387_v31 }
  0x8c   : > { %844 = vmatmul.bf16.gmra.mxu0 %v1391_v40  ;;  %973 = vmatmul.bf16.gmra.mxu3 %v1491_v41  ;;  %v1650_v40 = vld [vmem:[%s1879_s30 + $0x160] sm:$0xf0]  ;;  %v1440_v41 = vld [vmem:[%s1879_s30 + $0xfc] sm:$0xf0] }
  0x8d   : > { %933 = vmatmul.bf16.gmra.mxu1 %v1395_v42  ;;  %v1446_v42 = vld [vmem:[%s1879_s30 + $0xf8] sm:$0xf]  ;;  %v1495_v48 = vor.u32 %v1650_v40, %v1494_v39  ;;  %v1443_v51 = vor.u32 %v1636_v38, %v1440_v41 }
  0x8e   : > { %1022 = vmatmul.bf16.gmra.mxu2 %v1399_v43  ;;  %v1638_v43 = vld [vmem:[%s1879_s30 + $0x100] sm:$0xf0] }
  0x9c   : > { %849 = vmatmul.bf16.gmra.mxu0 %v1403_v52  ;;  %978 = vmatmul.bf16.gmra.mxu3 %v1503_v53  ;;  %v1447_v52 = vor.u32 %v1638_v43, %v1446_v42 }
  0x9d   : > { %938 = vmatmul.bf16.gmra.mxu1 %v1407_v54 }
  0x9e   : > { %1027 = vmatmul.bf16.gmra.mxu2 %v1411_v55 }
  0xa9   : > { %v815_v2 = vpop.f32.mrf.mxu0 }
  0xaa   : > { %v904_v5 = vpop.f32.mrf.mxu1 }
  0xab   : > { %v905_v6 = vadd.f32 %v904_v5, %v815_v2  ;;  %v1458_v2 = vld [vmem:[%s1879_s30 + $0x110] sm:$0xf] }
  0xac   : > { %854 = vmatmul.bf16.gmra.mxu0 %v1415_v0  ;;  %1052 = vmatmul.bf16.vlgmr.msra.gmra.mxu3 %v1471_v1  ;;  %v1653_v0 = vld [vmem:[%s1879_s30 + $0x178] sm:$0xf0]  ;;  %v1452_v1 = vld [vmem:[%s1879_s30 + $0x114] sm:$0xf0] }
  0xad   : > { %943 = vmatmul.bf16.gmra.mxu1 %v1419_v3  ;;  %v1641_v3 = vld [vmem:[%s1879_s30 + $0x118] sm:$0xf0]  ;;  %v1455_v12 = vor.u32 %v1639_v62, %v1452_v1 }
  0xae   : > { %1032 = vmatmul.bf16.gmra.mxu2 %v1423_v4  ;;  %v1459_v13 = vor.u32 %v1641_v3, %v1458_v2 }
  0xaf   : > { %v1988_v7 = vpop.f32.mrf.mxu3 }
  0xb1   : > { %v993_v8 = vpop.f32.mrf.mxu2  ;;  %v817_v10 = vpop.f32.mrf.mxu0 }
  0xb2   : > { %v994_v9 = vadd.f32 %v993_v8, %v905_v6  ;;  %v906_v11 = vpop.f32.mrf.mxu1  ;;  %v1451_v8 = vor.u32 %v1640_v61, %v1450_v60 }
  0xb3   : > { %v907_v20 = vadd.f32 %v906_v11, %v817_v10 }
  0xb4   : > { %1172 = vst [vmem:[%s1993_s20] sm:$0xff] %v994_v9  ;;  %v1507_v9 = vor.u32 %v1653_v0, %v1506_v63 }
  0xb7   : > { %v2004_v21 = vpop.f32.mrf.mxu3 }
  0xb9   : > { %v995_v22 = vpop.f32.mrf.mxu2  ;;  %v820_v26 = vpop.f32.mrf.mxu0 }
  0xba   : > { %v996_v23 = vadd.f32 %v995_v22, %v907_v20  ;;  %v909_v29 = vpop.f32.mrf.mxu1 }
  0xbb   : > { %v910_v30 = vadd.f32 %v909_v29, %v820_v26 }
  0xbc   : > { %1173 = vst [vmem:[%s1993_s20 + $0x8] sm:$0xff] %v996_v23  ;;  %859 = vmatmul.bf16.gmra.mxu0 %v1427_v24  ;;  %1057 = vmatmul.bf16.gmra.mxu3 %v1483_v25 }
  0xbd   : > { %948 = vmatmul.bf16.gmra.mxu1 %v1431_v27 }
  0xbe   : > { %1037 = vmatmul.bf16.gmra.mxu2 %v1435_v28 }
  0xbf   : > { %v2007_v31 = vpop.f32.mrf.mxu3 }
  0xc1   : > { %v998_v32 = vpop.f32.mrf.mxu2  ;;  %v822_v34 = vpop.f32.mrf.mxu0 }
  0xc2   : > { %v999_v33 = vadd.f32 %v998_v32, %v910_v30  ;;  %v911_v35 = vpop.f32.mrf.mxu1 }
  0xc3   : > { %v912_v44 = vadd.f32 %v911_v35, %v822_v34 }
  0xc4   : > { %1174 = vst [vmem:[%s1993_s20 + $0x10] sm:$0xff] %v999_v33 }
  0xc7   : > { %v2018_v45 = vpop.f32.mrf.mxu3 }
  0xc9   : > { %v1000_v46 = vpop.f32.mrf.mxu2  ;;  %v825_v50 = vpop.f32.mrf.mxu0 }
  0xca   : > { %v1001_v49 = vadd.f32 %v1000_v46, %v912_v44  ;;  %v914_v53 = vpop.f32.mrf.mxu1 }
  0xcb   : > { %v915_v54 = vadd.f32 %v914_v53, %v825_v50 }
  0xcc   : > { %1175 = vst [vmem:[%s1993_s20 + $0x18] sm:$0xff] %v1001_v49  ;;  %864 = vmatmul.bf16.gmra.mxu0 %v1439_v47  ;;  %1062 = vmatmul.bf16.gmra.mxu3 %v1495_v48 }
  0xcd   : > { %953 = vmatmul.bf16.gmra.mxu1 %v1443_v51 }
  0xce   : > { %1042 = vmatmul.bf16.gmra.mxu2 %v1447_v52 }
  0xcf   : > { %v2021_v55 = vpop.f32.mrf.mxu3 }
  0xd1   : > { %v1003_v56 = vpop.f32.mrf.mxu2  ;;  %v827_v58 = vpop.f32.mrf.mxu0 }
  0xd2   : > { %v1004_v57 = vadd.f32 %v1003_v56, %v915_v54  ;;  %v916_v59 = vpop.f32.mrf.mxu1 }
  0xd3   : > { %v917_v4 = vadd.f32 %v916_v59, %v827_v58 }
  0xd4   : > { %1176 = vst [vmem:[%s1993_s20 + $0x20] sm:$0xff] %v1004_v57 }
  0xd7   : > { %v2032_v5 = vpop.f32.mrf.mxu3 }
  0xd9   : > { %v1005_v6 = vpop.f32.mrf.mxu2  ;;  %v830_v11 = vpop.f32.mrf.mxu0 }
  0xda   : > { %v1006_v10 = vadd.f32 %v1005_v6, %v917_v4  ;;  %v919_v14 = vpop.f32.mrf.mxu1 }
  0xdb   : > { %v920_v15 = vadd.f32 %v919_v14, %v830_v11 }
  0xdc   : > { %1177 = vst [vmem:[%s1993_s20 + $0x28] sm:$0xff] %v1006_v10  ;;  %869 = vmatmul.bf16.gmra.mxu0 %v1451_v8  ;;  %1067 = vmatmul.bf16.gmra.mxu3 %v1507_v9 }
  0xdd   : > { %958 = vmatmul.bf16.gmra.mxu1 %v1455_v12 }
  0xde   : > { %1047 = vmatmul.bf16.gmra.mxu2 %v1459_v13 }
  0xdf   : > { %v2035_v16 = vpop.f32.mrf.mxu3 }
  0xe1   : > { %v1008_v17 = vpop.f32.mrf.mxu2  ;;  %v832_v19 = vpop.f32.mrf.mxu0 }
  0xe2   : > { %v1009_v18 = vadd.f32 %v1008_v17, %v920_v15  ;;  %v921_v20 = vpop.f32.mrf.mxu1 }
  0xe3   : > { %v922_v22 = vadd.f32 %v921_v20, %v832_v19 }
  0xe4   : > { %1178 = vst [vmem:[%s1993_s20 + $0x30] sm:$0xff] %v1009_v18 }
  0xe7   : > { %v2038_v24 = vpop.f32.mrf.mxu3 }
  0xe9   : > { %v1010_v25 = vpop.f32.mrf.mxu2  ;;  %v835_v26 = vpop.f32.mrf.mxu0 }
  0xea   : > { %v1011_v23 = vadd.f32 %v1010_v25, %v922_v22  ;;  %v924_v27 = vpop.f32.mrf.mxu1 }
  0xeb   : > { %v925_v28 = vadd.f32 %v924_v27, %v835_v26 }
  0xec   : > { %1179 = vst [vmem:[%s1993_s20 + $0x38] sm:$0xff] %v1011_v23 }
  0xef   : > { %v964_v29 = vpop.f32.mrf.mxu3 }
  0xf0   : > { %v965_v19 = vadd.f32 %v964_v29, %v1988_v7 }
  0xf1   : > { %v1013_v30 = vpop.f32.mrf.mxu2  ;;  %v837_v33 = vpop.f32.mrf.mxu0 }
  0xf2   : > { %v1014_v32 = vadd.f32 %v1013_v30, %v925_v28  ;;  %v926_v34 = vpop.f32.mrf.mxu1 }
  0xf3   : > { %v927_v35 = vadd.f32 %v926_v34, %v837_v33 }
  0xf4   : > { %1180 = vst [vmem:[%s1993_s20 + $0x40] sm:$0xff] %v1014_v32 }
  0xf7   : > { %v966_v36 = vpop.f32.mrf.mxu3 }
  0xf8   : > { %v967_v28 = vadd.f32 %v966_v36, %v2004_v21 }
  0xf9   : > { %v1015_v37 = vpop.f32.mrf.mxu2  ;;  %v840_v39 = vpop.f32.mrf.mxu0 }
  0xfa   : > { %v1016_v38 = vadd.f32 %v1015_v37, %v927_v35  ;;  %v929_v40 = vpop.f32.mrf.mxu1 }
  0xfb   : > { %v930_v41 = vadd.f32 %v929_v40, %v840_v39 }
  0xfc   : > { %1181 = vst [vmem:[%s1993_s20 + $0x48] sm:$0xff] %v1016_v38 }
  0xff   : > { %v969_v42 = vpop.f32.mrf.mxu3 }
 0x100   : > { %v970_v38 = vadd.f32 %v969_v42, %v2007_v31 }
 0x101   : > { %v1018_v43 = vpop.f32.mrf.mxu2  ;;  %v842_v46 = vpop.f32.mrf.mxu0 }
 0x102   : > { %v1019_v44 = vadd.f32 %v1018_v43, %v930_v41  ;;  %v931_v47 = vpop.f32.mrf.mxu1 }
 0x103   : > { %v932_v48 = vadd.f32 %v931_v47, %v842_v46 }
 0x104   : > { %1182 = vst [vmem:[%s1993_s20 + $0x50] sm:$0xff] %v1019_v44 }
 0x107   : > { %v2044_v49 = vpop.f32.mrf.mxu3 }
 0x108   : > { %v972_v44 = vadd.f32 %v2044_v49, %v2018_v45 }
 0x109   : > { %v1020_v50 = vpop.f32.mrf.mxu2  ;;  %v845_v52 = vpop.f32.mrf.mxu0 }
 0x10a   : > { %v1021_v51 = vadd.f32 %v1020_v50, %v932_v48  ;;  %v934_v53 = vpop.f32.mrf.mxu1 }
 0x10b   : > { %v935_v54 = vadd.f32 %v934_v53, %v845_v52 }
 0x10c   : > { %1183 = vst [vmem:[%s1993_s20 + $0x58] sm:$0xff] %v1021_v51 }
 0x10f   : > { %v2047_v56 = vpop.f32.mrf.mxu3 }
 0x110   : > { %v975_v53 = vadd.f32 %v2047_v56, %v2021_v55 }
 0x111   : > { %v1023_v57 = vpop.f32.mrf.mxu2  ;;  %v847_v59 = vpop.f32.mrf.mxu0 }
 0x112   : > { %v1024_v58 = vadd.f32 %v1023_v57, %v935_v54  ;;  %v936_v60 = vpop.f32.mrf.mxu1 }
 0x113   : > { %v937_v61 = vadd.f32 %v936_v60, %v847_v59 }
 0x114   : > { %1184 = vst [vmem:[%s1993_s20 + $0x60] sm:$0xff] %v1024_v58 }
 0x117   : > { %v2050_v62 = vpop.f32.mrf.mxu3 }
 0x118   : > { %v977_v60 = vadd.f32 %v2050_v62, %v2032_v5 }
 0x119   : > { %v1025_v63 = vpop.f32.mrf.mxu2  ;;  %v850_v1 = vpop.f32.mrf.mxu0 }
 0x11a   : > { %v1026_v0 = vadd.f32 %v1025_v63, %v937_v61  ;;  %v939_v2 = vpop.f32.mrf.mxu1 }
 0x11b   : > { %v940_v3 = vadd.f32 %v939_v2, %v850_v1 }
 0x11c   : > { %1185 = vst [vmem:[%s1993_s20 + $0x68] sm:$0xff] %v1026_v0 }
 0x11f   : > { %v2053_v4 = vpop.f32.mrf.mxu3 }
 0x121   : > { %v1028_v6 = vpop.f32.mrf.mxu2  ;;  %v852_v9 = vpop.f32.mrf.mxu0 }
 0x122   : > { %v1029_v8 = vadd.f32 %v1028_v6, %v940_v3  ;;  %v941_v10 = vpop.f32.mrf.mxu1  ;;  %v980_v6 = vadd.f32 %v2053_v4, %v2035_v16 }
 0x123   : > { %v942_v11 = vadd.f32 %v941_v10, %v852_v9 }
 0x124   : > { %1186 = vst [vmem:[%s1993_s20 + $0x70] sm:$0xff] %v1029_v8 }
 0x127   : > { %v2056_v12 = vpop.f32.mrf.mxu3 }
 0x129   : > { %v1030_v13 = vpop.f32.mrf.mxu2  ;;  %v855_v15 = vpop.f32.mrf.mxu0 }
 0x12a   : > { %v1031_v14 = vadd.f32 %v1030_v13, %v942_v11  ;;  %v944_v17 = vpop.f32.mrf.mxu1  ;;  %v982_v13 = vadd.f32 %v2056_v12, %v2038_v24 }
 0x12b   : > { %v945_v18 = vadd.f32 %v944_v17, %v855_v15 }
 0x12c   : > { %1187 = vst [vmem:[%s1993_s20 + $0x78] sm:$0xff] %v1031_v14 }
 0x12f   : > { %v1053_v20 = vpop.f32.mrf.mxu3 }
 0x130   : > { %v1054_v25 = vadd.f32 %v1053_v20, %v965_v19 }
 0x131   : > { %v1033_v22 = vpop.f32.mrf.mxu2  ;;  %v857_v26 = vpop.f32.mrf.mxu0 }
 0x132   : > { %v1034_v23 = vadd.f32 %v1033_v22, %v945_v18  ;;  %1196 = vst [vmem:[%s1993_s20 + $0xc0] sm:$0xff] %v1054_v25  ;;  %v946_v27 = vpop.f32.mrf.mxu1 }
 0x133   : > { %v947_v30 = vadd.f32 %v946_v27, %v857_v26 }
 0x134   : > { %1188 = vst [vmem:[%s1993_s20 + $0x80] sm:$0xff] %v1034_v23 }
 0x137   : > { %v1055_v32 = vpop.f32.mrf.mxu3 }
 0x138   : > { %v1056_v34 = vadd.f32 %v1055_v32, %v967_v28 }
 0x139   : > { %v1035_v33 = vpop.f32.mrf.mxu2  ;;  %v860_v7 = vpop.f32.mrf.mxu0 }
 0x13a   : > { %v1036_v35 = vadd.f32 %v1035_v33, %v947_v30  ;;  %1197 = vst [vmem:[%s1993_s20 + $0xc8] sm:$0xff] %v1056_v34  ;;  %v949_v29 = vpop.f32.mrf.mxu1 }
 0x13b   : > { %v950_v37 = vadd.f32 %v949_v29, %v860_v7 }
 0x13c   : > { %1189 = vst [vmem:[%s1993_s20 + $0x88] sm:$0xff] %v1036_v35 }
 0x13f   : > { %v1058_v39 = vpop.f32.mrf.mxu3 }
 0x140   : > { %v1059_v41 = vadd.f32 %v1058_v39, %v970_v38 }
 0x141   : > { %v1038_v40 = vpop.f32.mrf.mxu2  ;;  %v862_v36 = vpop.f32.mrf.mxu0 }
 0x142   : > { %v1039_v21 = vadd.f32 %v1038_v40, %v950_v37  ;;  %1198 = vst [vmem:[%s1993_s20 + $0xd0] sm:$0xff] %v1059_v41  ;;  %v951_v43 = vpop.f32.mrf.mxu1 }
 0x143   : > { %v952_v46 = vadd.f32 %v951_v43, %v862_v36 }
 0x144   : > { %1190 = vst [vmem:[%s1993_s20 + $0x90] sm:$0xff] %v1039_v21 }
 0x147   : > { %v1060_v47 = vpop.f32.mrf.mxu3 }
 0x148   : > { %v1061_v50 = vadd.f32 %v1060_v47, %v972_v44 }
 0x149   : > { %v1040_v48 = vpop.f32.mrf.mxu2  ;;  %v865_v42 = vpop.f32.mrf.mxu0 }
 0x14a   : > { %v1041_v31 = vadd.f32 %v1040_v48, %v952_v46  ;;  %1199 = vst [vmem:[%s1993_s20 + $0xd8] sm:$0xff] %v1061_v50  ;;  %v954_v51 = vpop.f32.mrf.mxu1 }
 0x14b   : > { %v955_v52 = vadd.f32 %v954_v51, %v865_v42 }
 0x14c   : > { %1191 = vst [vmem:[%s1993_s20 + $0x98] sm:$0xff] %v1041_v31 }
 0x14f   : > { %v1063_v54 = vpop.f32.mrf.mxu3 }
 0x150   : > { %v1064_v45 = vadd.f32 %v1063_v54, %v975_v53 }
 0x151   : > { %v1043_v57 = vpop.f32.mrf.mxu2  ;;  %v867_v58 = vpop.f32.mrf.mxu0 }
 0x152   : > { %v1044_v49 = vadd.f32 %v1043_v57, %v955_v52  ;;  %1200 = vst [vmem:[%s1993_s20 + $0xe0] sm:$0xff] %v1064_v45  ;;  %v956_v59 = vpop.f32.mrf.mxu1 }
 0x153   : > { %v957_v61 = vadd.f32 %v956_v59, %v867_v58 }
 0x154   : > { %1192 = vst [vmem:[%s1993_s20 + $0xa0] sm:$0xff] %v1044_v49 }
 0x157   : > { %v1065_v63 = vpop.f32.mrf.mxu3 }
 0x158   : > { %v1066_v1 = vadd.f32 %v1065_v63, %v977_v60 }
 0x159   : > { %v1045_v0 = vpop.f32.mrf.mxu2  ;;  %v870_v55 = vpop.f32.mrf.mxu0 }
 0x15a   : > { %v1046_v2 = vadd.f32 %v1045_v0, %v957_v61  ;;  %1201 = vst [vmem:[%s1993_s20 + $0xe8] sm:$0xff] %v1066_v1  ;;  %v959_v56 = vpop.f32.mrf.mxu1 }
 0x15b   : > { %v960_v3 = vadd.f32 %v959_v56, %v870_v55 }
 0x15c   : > { %1193 = vst [vmem:[%s1993_s20 + $0xa8] sm:$0xff] %v1046_v2 }
 0x15f   : > { %v1068_v8 = vpop.f32.mrf.mxu3 }
 0x160   : > { %v1069_v5 = vadd.f32 %v1068_v8, %v980_v6 }
 0x161   : > { %v1048_v9 = vpop.f32.mrf.mxu2  ;;  %v872_v10 = vpop.f32.mrf.mxu0 }
 0x162   : > { %v1049_v62 = vadd.f32 %v1048_v9, %v960_v3  ;;  %1202 = vst [vmem:[%s1993_s20 + $0xf0] sm:$0xff] %v1069_v5  ;;  %v961_v11 = vpop.f32.mrf.mxu1 }
 0x163   : > { %v962_v14 = vadd.f32 %v961_v11, %v872_v10 }
 0x164   : > { %1194 = vst [vmem:[%s1993_s20 + $0xb0] sm:$0xff] %v1049_v62 }
 0x167   : > { %v1070_v15 = vpop.f32.mrf.mxu3 }
 0x168   : > { %v1071_v18 = vadd.f32 %v1070_v15, %v982_v13 }
 0x169   : > { %v1050_v17 = vpop.f32.mrf.mxu2 }
 0x16a   : > { %v1051_v19 = vadd.f32 %v1050_v17, %v962_v14  ;;  %1203 = vst [vmem:[%s1993_s20 + $0xf8] sm:$0xff] %v1071_v18 }
 0x16c   : > { %1195 = vst [vmem:[%s1993_s20 + $0xb8] sm:$0xff] %v1051_v19 }
 0x16d PF: > { %s12_s11 = sadd.s32 1, %s1749_s11   ;;  %s2100_s9 = smov %s1745_s10 }
 0x16e   : > { %p9_p5 = scmp.ge.s32.totalorder %s12_s11, 6   ;;  %s2101_s10 = smov %s2103_s12 }
 0x170   :  { %11 = sbr.rel (!%p9_p5) target bundleno = 2 (0x2), region = 69 }

// kernel: _lambda_.18
= control target key start
LH: loop header
LB: loop body
LE: loop exit
PB: predicated region body
PF: predicated region fallthrough
CT: control target
= control target key end

     0   :  { %v810_v0 = vmov 0   ;;  %vm103_vm0 = vcmask 1041408   ;;  %s1252_s1 = inlined_call_operand.vmem [shape: f32[8,2,1], index: 1, kind: input, shape index: {}]   ;;  %s1253_s0 = inlined_call_operand.vmem [shape: f32[8,2,512], index: 0, kind: input, shape index: {}]   ;;  %s1254_s2 = inlined_call_operand.vmem [shape: f32[8,2,1], index: 2, kind: input, shape index: {}]   ;;  %s1255_s3 = inlined_call_operand.vmem [shape: f32[8,2,512], index: 3, kind: output, shape index: {}]  }
   0x1   :  { %792 = vset.pattern.permute.xlu2 %v810_v0  ;;  %v578_v1 = vld [vmem:[%s1252_s1 + $0x2] sm:$0x3]  ;;  %791 = vset.pattern.permute.xlu1 %v810_v0  ;;  %v844_v3 = vld [vmem:[%s1253_s0 + $0x8] sm:$0xff]  ;;  %v850_v4 = vld [vmem:[%s1253_s0 + $0x10] sm:$0xff] }
   0x2   :  { %v838_v2 = vld [vmem:[%s1253_s0] sm:$0xff]  ;;  %615 = vperm.xlu2 %792, %v578_v1   ;;  %793 = vset.pattern.permute.xlu0 %v810_v0  ;;  %36 = vst [vmem:[#allocation1 + $0x20] ss:$4 sm:$0xff] %v844_v3  ;;  %v855_v7 = vld [vmem:[%s1253_s0 + $0x18] sm:$0xff]  ;;  %v875_v30 = vld [vmem:[%s1253_s0 + $0x28] sm:$0xff] }
   0x3   :  { %30 = vst [vmem:[#allocation1] ss:$4 sm:$0xff] %v838_v2  ;;  %v869_v25 = vld [vmem:[%s1253_s0 + $0x20] sm:$0xff]  ;;  %v889_v49 = vld [vmem:[%s1253_s0 + $0x30] sm:$0xff]  ;;  %v895_v56 = vld [vmem:[%s1253_s0 + $0x38] sm:$0xff] }
   0x9   :  { %v37_v15 = vld.sshfl [vmem:[#allocation1 + $0x20] sm:$0xff pattern:$0x73625140]  ;;  %v38_v16 = vld.sshfl [vmem:[#allocation1 + $0x28] sm:$0xff pattern:$0x73625140] }
   0xa   :  { %v31_v5 = vld.sshfl [vmem:[#allocation1] sm:$0xff pattern:$0x73625140]  ;;  %v32_v6 = vld.sshfl [vmem:[#allocation1 + $0x8] sm:$0xff pattern:$0x73625140] }
   0xb   :  { %v33_v8 = vld.sshfl [vmem:[#allocation1 + $0x10] sm:$0xff pattern:$0x73625140]  ;;  %v34_v9 = vld.sshfl [vmem:[#allocation1 + $0x18] sm:$0xff pattern:$0x73625140] }
   0xc   :  { %v104_v10 = vsel %vm103_vm0, %v31_v5, 0.0  ;;  %v105_v11 = vsel %vm103_vm0, %v32_v6, 0.0  ;;  %v107_v12 = vsel %vm103_vm0, %v33_v8, 0.0  ;;  %v109_v13 = vsel %vm103_vm0, %v34_v9, 0.0  ;;  %41 = vst [vmem:[#allocation1] ss:$4 sm:$0xff] %v850_v4 }
   0xd   :  { %v106_v14 = vadd.f32 %v105_v11, %v104_v10  ;;  %v39_v17 = vld.sshfl [vmem:[#allocation1 + $0x30] sm:$0xff pattern:$0x73625140]  ;;  %v40_v18 = vld.sshfl [vmem:[#allocation1 + $0x38] sm:$0xff pattern:$0x73625140]  ;;  %v232_v5 = vmul.f32 %v838_v2, %v838_v2 }
   0xe   :  { %46 = vst [vmem:[#allocation1 + $0x20] ss:$4 sm:$0xff] %v855_v7  ;;  %v113_v20 = vsel %vm103_vm0, %v37_v15, 0.0  ;;  %v114_v21 = vsel %vm103_vm0, %v38_v16, 0.0  ;;  %v116_v23 = vsel %vm103_vm0, %v39_v17, 0.0  ;;  %v118_v26 = vsel %vm103_vm0, %v40_v18, 0.0 }
   0xf   :  { %v108_v19 = vadd.f32 %v107_v12, %v106_v14  ;;  %v115_v22 = vadd.f32 %v114_v21, %v113_v20  ;;  %v233_v14 = vmul.f32 %v844_v3, %v844_v3 }
  0x11   :  { %v110_v24 = vadd.f32 %v109_v13, %v108_v19  ;;  %v117_v29 = vadd.f32 %v116_v23, %v115_v22 }
  0x13   :  { %111 = vadd.xlane.f32.xlu0 %v110_v24  ;;  %v42_v27 = vld.sshfl [vmem:[#allocation1] sm:$0xff pattern:$0x73625140]  ;;  %v43_v28 = vld.sshfl [vmem:[#allocation1 + $0x8] sm:$0xff pattern:$0x73625140]  ;;  %v119_v40 = vadd.f32 %v118_v26, %v117_v29 }
  0x14   :  { %v44_v31 = vld.sshfl [vmem:[#allocation1 + $0x10] sm:$0xff pattern:$0x73625140]  ;;  %v45_v32 = vld.sshfl [vmem:[#allocation1 + $0x18] sm:$0xff pattern:$0x73625140] }
  0x15   :  { %v122_v33 = vsel %vm103_vm0, %v42_v27, 0.0  ;;  %v123_v34 = vsel %vm103_vm0, %v43_v28, 0.0  ;;  %v125_v35 = vsel %vm103_vm0, %v44_v31, 0.0  ;;  %v127_v36 = vsel %vm103_vm0, %v45_v32, 0.0  ;;  %51 = vst [vmem:[#allocation1] ss:$4 sm:$0xff] %v869_v25 }
  0x16   :  { %v124_v37 = vadd.f32 %v123_v34, %v122_v33  ;;  %v47_v38 = vld.sshfl [vmem:[#allocation1 + $0x20] sm:$0xff pattern:$0x73625140]  ;;  %v48_v39 = vld.sshfl [vmem:[#allocation1 + $0x28] sm:$0xff pattern:$0x73625140]  ;;  %v234_v31 = vmul.f32 %v850_v4, %v850_v4 }
  0x17   :  { %v49_v41 = vld.sshfl [vmem:[#allocation1 + $0x30] sm:$0xff pattern:$0x73625140]  ;;  %v50_v42 = vld.sshfl [vmem:[#allocation1 + $0x38] sm:$0xff pattern:$0x73625140] }
  0x18   :  { %v126_v43 = vadd.f32 %v125_v35, %v124_v37  ;;  %56 = vst [vmem:[#allocation1 + $0x20] ss:$4 sm:$0xff] %v875_v30  ;;  %v131_v44 = vsel %vm103_vm0, %v47_v38, 0.0  ;;  %v132_v45 = vsel %vm103_vm0, %v48_v39, 0.0  ;;  %v134_v47 = vsel %vm103_vm0, %v49_v41, 0.0 }
  0x19   :  { %v133_v46 = vadd.f32 %v132_v45, %v131_v44  ;;  %v136_v50 = vsel %vm103_vm0, %v50_v42, 0.0  ;;  %v235_v37 = vmul.f32 %v855_v7, %v855_v7 }
  0x1a   :  { %v128_v48 = vadd.f32 %v127_v36, %v126_v43 }
  0x1b   :  { %120 = vadd.xlane.f32.xlu0 %v119_v40  ;;  %v135_v53 = vadd.f32 %v134_v47, %v133_v46 }
  0x1c   :  { %129 = vadd.xlane.f32.xlu1 %v128_v48  ;;  %v52_v51 = vld.sshfl [vmem:[#allocation1] sm:$0xff pattern:$0x73625140]  ;;  %v53_v52 = vld.sshfl [vmem:[#allocation1 + $0x8] sm:$0xff pattern:$0x73625140] }
  0x1d   :  { %v54_v54 = vld.sshfl [vmem:[#allocation1 + $0x10] sm:$0xff pattern:$0x73625140]  ;;  %v55_v55 = vld.sshfl [vmem:[#allocation1 + $0x18] sm:$0xff pattern:$0x73625140]  ;;  %v137_v63 = vadd.f32 %v136_v50, %v135_v53 }
  0x1e   :  { %61 = vst [vmem:[#allocation1] ss:$4 sm:$0xff] %v889_v49  ;;  %v140_v57 = vsel %vm103_vm0, %v52_v51, 0.0  ;;  %v141_v58 = vsel %vm103_vm0, %v53_v52, 0.0  ;;  %v143_v1 = vsel %vm103_vm0, %v54_v54, 0.0  ;;  %v145_v6 = vsel %vm103_vm0, %v55_v55, 0.0 }
  0x1f   :  { %v57_v59 = vld.sshfl [vmem:[#allocation1 + $0x20] sm:$0xff pattern:$0x73625140]  ;;  %v58_v60 = vld.sshfl [vmem:[#allocation1 + $0x28] sm:$0xff pattern:$0x73625140]  ;;  %v142_v0 = vadd.f32 %v141_v58, %v140_v57  ;;  %v236_v55 = vmul.f32 %v869_v25, %v869_v25 }
  0x20   :  { %v59_v61 = vld.sshfl [vmem:[#allocation1 + $0x30] sm:$0xff pattern:$0x73625140]  ;;  %v60_v62 = vld.sshfl [vmem:[#allocation1 + $0x38] sm:$0xff pattern:$0x73625140] }
  0x21   :  { %66 = vst [vmem:[#allocation1 + $0x20] ss:$4 sm:$0xff] %v895_v56  ;;  %v144_v8 = vadd.f32 %v143_v1, %v142_v0  ;;  %v149_v9 = vsel %vm103_vm0, %v57_v59, 0.0  ;;  %v150_v10 = vsel %vm103_vm0, %v58_v60, 0.0  ;;  %v152_v11 = vsel %vm103_vm0, %v59_v61, 0.0 }
  0x22   :  { %v151_v26 = vadd.f32 %v150_v10, %v149_v9  ;;  %v154_v34 = vsel %vm103_vm0, %v60_v62, 0.0  ;;  %v237_v62 = vmul.f32 %v875_v30, %v875_v30 }
  0x23   :  { %v146_v24 = vadd.f32 %v145_v6, %v144_v8  ;;  %v577_v6 = vld [vmem:[%s1252_s1] sm:$0x3] }
  0x24   :  { %138 = vadd.xlane.f32.xlu1 %v137_v63  ;;  %v153_v33 = vadd.f32 %v152_v11, %v151_v26 }
  0x25   :  { %v62_v12 = vld.sshfl [vmem:[#allocation1] sm:$0xff pattern:$0x73625140]  ;;  %v63_v13 = vld.sshfl [vmem:[#allocation1 + $0x8] sm:$0xff pattern:$0x73625140] }
  0x26   :  { %v64_v15 = vld.sshfl [vmem:[#allocation1 + $0x10] sm:$0xff pattern:$0x73625140]  ;;  %v65_v16 = vld.sshfl [vmem:[#allocation1 + $0x18] sm:$0xff pattern:$0x73625140]  ;;  %v155_v40 = vadd.f32 %v154_v34, %v153_v33 }
  0x27   :  { %v158_v17 = vsel %vm103_vm0, %v62_v12, 0.0  ;;  %v159_v18 = vsel %vm103_vm0, %v63_v13, 0.0  ;;  %v161_v19 = vsel %vm103_vm0, %v64_v15, 0.0  ;;  %v163_v20 = vsel %vm103_vm0, %v65_v16, 0.0  ;;  %248 = vst [vmem:[#allocation1] ss:$4 sm:$0xff] %v232_v5 }
  0x28   :  { %v914_v21 = vld.sshfl [vmem:[#allocation1 + $0x20] sm:$0xff pattern:$0x73625140]  ;;  %v916_v22 = vld.sshfl [vmem:[#allocation1 + $0x28] sm:$0xff pattern:$0x73625140]  ;;  %v160_v23 = vadd.f32 %v159_v18, %v158_v17  ;;  %v238_v16 = vmul.f32 %v889_v49, %v889_v49 }
  0x29   :  { %v918_v27 = vld.sshfl [vmem:[#allocation1 + $0x30] sm:$0xff pattern:$0x73625140]  ;;  %v920_v28 = vld.sshfl [vmem:[#allocation1 + $0x38] sm:$0xff pattern:$0x73625140] }
  0x2a   :  { %254 = vst [vmem:[#allocation1 + $0x20] ss:$4 sm:$0xff] %v233_v14  ;;  %v162_v29 = vadd.f32 %v161_v19, %v160_v23  ;;  %v239_v23 = vmul.f32 %v895_v56, %v895_v56 }
  0x2b   :  { %147 = vadd.xlane.f32.xlu2 %v146_v24 }
  0x2c   :  { %v164_v32 = vadd.f32 %v163_v20, %v162_v29 }
  0x2e   :  { %165 = vadd.xlane.f32.xlu0 %v164_v32  ;;  %v249_v35 = vld.sshfl [vmem:[#allocation1] sm:$0xff pattern:$0x73625140]  ;;  %v250_v36 = vld.sshfl [vmem:[#allocation1 + $0x8] sm:$0xff pattern:$0x73625140] }
  0x2f   :  { %v251_v38 = vld.sshfl [vmem:[#allocation1 + $0x10] sm:$0xff pattern:$0x73625140]  ;;  %v252_v39 = vld.sshfl [vmem:[#allocation1 + $0x18] sm:$0xff pattern:$0x73625140] }
  0x30   :  { %v321_v41 = vsel %vm103_vm0, %v249_v35, 0.0  ;;  %v322_v42 = vsel %vm103_vm0, %v250_v36, 0.0  ;;  %v324_v43 = vsel %vm103_vm0, %v251_v38, 0.0  ;;  %259 = vst [vmem:[#allocation1] ss:$4 sm:$0xff] %v234_v31  ;;  %v326_v58 = vsel %vm103_vm0, %v252_v39, 0.0 }
  0x31   :  { %v255_v44 = vld.sshfl [vmem:[#allocation1 + $0x20] sm:$0xff pattern:$0x73625140]  ;;  %v256_v45 = vld.sshfl [vmem:[#allocation1 + $0x28] sm:$0xff pattern:$0x73625140]  ;;  %v323_v46 = vadd.f32 %v322_v42, %v321_v41 }
  0x32   :  { %v257_v47 = vld.sshfl [vmem:[#allocation1 + $0x30] sm:$0xff pattern:$0x73625140]  ;;  %v258_v48 = vld.sshfl [vmem:[#allocation1 + $0x38] sm:$0xff pattern:$0x73625140] }
  0x33   :  { %v330_v50 = vsel %vm103_vm0, %v255_v44, 0.0  ;;  %v331_v51 = vsel %vm103_vm0, %v256_v45, 0.0  ;;  %v333_v52 = vsel %vm103_vm0, %v257_v47, 0.0  ;;  %264 = vst [vmem:[#allocation1 + $0x20] ss:$4 sm:$0xff] %v235_v37  ;;  %156 = vadd.xlane.f32.xlu2 %v155_v40  ;;  %v325_v54 = vadd.f32 %v324_v43, %v323_v46 }
  0x34   :  { %v332_v53 = vadd.f32 %v331_v51, %v330_v50  ;;  %v335_v57 = vsel %vm103_vm0, %v258_v48, 0.0 }
  0x35   :  { %v327_v0 = vadd.f32 %v326_v58, %v325_v54 }
  0x36   :  { %v334_v59 = vadd.f32 %v333_v52, %v332_v53 }
  0x37   :  { %v937_v60 = vld.sshfl [vmem:[#allocation1] sm:$0xff pattern:$0x73625140]  ;;  %v939_v61 = vld.sshfl [vmem:[#allocation1 + $0x8] sm:$0xff pattern:$0x73625140] }
  0x38   :  { %v336_v63 = vadd.f32 %v335_v57, %v334_v59  ;;  %v943_v1 = vld.sshfl [vmem:[#allocation1 + $0x10] sm:$0xff pattern:$0x73625140]  ;;  %v945_v5 = vld.sshfl [vmem:[#allocation1 + $0x18] sm:$0xff pattern:$0x73625140] }
  0x39   :  { %269 = vst [vmem:[#allocation1] ss:$4 sm:$0xff] %v236_v55 }
  0x3a   :  { %337 = vadd.xlane.f32.xlu0 %v336_v63  ;;  %v265_v8 = vld.sshfl [vmem:[#allocation1 + $0x20] sm:$0xff pattern:$0x73625140]  ;;  %v266_v9 = vld.sshfl [vmem:[#allocation1 + $0x28] sm:$0xff pattern:$0x73625140] }
  0x3b   :  { %v267_v10 = vld.sshfl [vmem:[#allocation1 + $0x30] sm:$0xff pattern:$0x73625140]  ;;  %v268_v11 = vld.sshfl [vmem:[#allocation1 + $0x38] sm:$0xff pattern:$0x73625140]  ;;  %328 = vadd.xlane.f32.xlu2 %v327_v0 }
  0x3c   :  { %274 = vst [vmem:[#allocation1 + $0x20] ss:$4 sm:$0xff] %v237_v62  ;;  %v348_v12 = vsel %vm103_vm0, %v265_v8, 0.0  ;;  %v349_v13 = vsel %vm103_vm0, %v266_v9, 0.0  ;;  %v351_v14 = vsel %vm103_vm0, %v267_v10, 0.0  ;;  %v353_v17 = vsel %vm103_vm0, %v268_v11, 0.0 }
  0x3d   :  { %611 = vperm.xlu1 %791, %v577_v6   ;;  %v350_v15 = vadd.f32 %v349_v13, %v348_v12  ;;  %v167_v10 = vsel %vm103_vm0, %v914_v21, 0.0  ;;  %v168_v11 = vsel %vm103_vm0, %v916_v22, 0.0  ;;  %v170_v13 = vsel %vm103_vm0, %v918_v27, 0.0  ;;  %v579_v22 = vld [vmem:[%s1252_s1 + $0x4] sm:$0x3] }
  0x3e   :  { %v169_v12 = vadd.f32 %v168_v11, %v167_v10  ;;  %v342_v21 = vsel %vm103_vm0, %v943_v1, 0.0 }
  0x3f   :  { %v352_v18 = vadd.f32 %v351_v14, %v350_v15  ;;  %v172_v15 = vsel %vm103_vm0, %v920_v28, 0.0  ;;  %v580_v28 = vld [vmem:[%s1252_s1 + $0x6] sm:$0x3] }
  0x40   :  { %v270_v19 = vld.sshfl [vmem:[#allocation1] sm:$0xff pattern:$0x73625140]  ;;  %v271_v20 = vld.sshfl [vmem:[#allocation1 + $0x8] sm:$0xff pattern:$0x73625140]  ;;  %v171_v14 = vadd.f32 %v170_v13, %v169_v12 }
  0x41   :  { %v272_v24 = vld.sshfl [vmem:[#allocation1 + $0x10] sm:$0xff pattern:$0x73625140]  ;;  %v273_v26 = vld.sshfl [vmem:[#allocation1 + $0x18] sm:$0xff pattern:$0x73625140]  ;;  %v354_v29 = vadd.f32 %v353_v17, %v352_v18 }
  0x42   :  { %v357_v31 = vsel %vm103_vm0, %v270_v19, 0.0  ;;  %v358_v32 = vsel %vm103_vm0, %v271_v20, 0.0  ;;  %v360_v33 = vsel %vm103_vm0, %v272_v24, 0.0  ;;  %v362_v34 = vsel %vm103_vm0, %v273_v26, 0.0  ;;  %279 = vst [vmem:[#allocation1] ss:$4 sm:$0xff] %v238_v16 }
  0x43   :  { %v359_v35 = vadd.f32 %v358_v32, %v357_v31  ;;  %v275_v36 = vld.sshfl [vmem:[#allocation1 + $0x20] sm:$0xff pattern:$0x73625140]  ;;  %v276_v37 = vld.sshfl [vmem:[#allocation1 + $0x28] sm:$0xff pattern:$0x73625140]  ;;  %355 = vadd.xlane.f32.xlu2 %v354_v29  ;;  %v173_v18 = vadd.f32 %v172_v15, %v171_v14 }
  0x44   :  { %v277_v38 = vld.sshfl [vmem:[#allocation1 + $0x30] sm:$0xff pattern:$0x73625140]  ;;  %v278_v39 = vld.sshfl [vmem:[#allocation1 + $0x38] sm:$0xff pattern:$0x73625140] }
  0x45   :  { %v361_v40 = vadd.f32 %v360_v33, %v359_v35  ;;  %284 = vst [vmem:[#allocation1 + $0x20] ss:$4 sm:$0xff] %v239_v23  ;;  %v339_v16 = vsel %vm103_vm0, %v937_v60, 0.0  ;;  %v340_v17 = vsel %vm103_vm0, %v939_v61, 0.0  ;;  %v344_v60 = vsel %vm103_vm0, %v945_v5, 0.0 }
  0x46   :  { %v341_v19 = vadd.f32 %v340_v17, %v339_v16  ;;  %v366_v61 = vsel %vm103_vm0, %v275_v36, 0.0  ;;  %v367_v20 = vsel %vm103_vm0, %v276_v37, 0.0  ;;  %v369_v24 = vsel %vm103_vm0, %v277_v38, 0.0  ;;  %v586_v26 = vld [vmem:[%s1254_s2 + $0x2] sm:$0x3] }
  0x47   :  { %v363_v41 = vadd.f32 %v362_v34, %v361_v40  ;;  %v368_v23 = vadd.f32 %v367_v20, %v366_v61  ;;  %v582_v5 = vld [vmem:[%s1252_s1 + $0xa] sm:$0x3]  ;;  %v371_v31 = vsel %vm103_vm0, %v278_v39, 0.0  ;;  %v589_v33 = vld [vmem:[%s1254_s2 + $0x8] sm:$0x3] }
  0x48   :  { %v343_v27 = vadd.f32 %v342_v21, %v341_v19  ;;  %v584_v34 = vld [vmem:[%s1252_s1 + $0xe] sm:$0x3]  ;;  %v587_v36 = vld [vmem:[%s1254_s2 + $0x4] sm:$0x3]  ;;  %v590_v37 = vld [vmem:[%s1254_s2 + $0xa] sm:$0x3] }
  0x49   :  { %364 = vadd.xlane.f32.xlu0 %v363_v41  ;;  %v280_v42 = vld.sshfl [vmem:[#allocation1] sm:$0xff pattern:$0x73625140]  ;;  %v281_v43 = vld.sshfl [vmem:[#allocation1 + $0x8] sm:$0xff pattern:$0x73625140]  ;;  %v370_v29 = vadd.f32 %v369_v24, %v368_v23 }
  0x4a   :  { %v282_v44 = vld.sshfl [vmem:[#allocation1 + $0x10] sm:$0xff pattern:$0x73625140]  ;;  %v283_v45 = vld.sshfl [vmem:[#allocation1 + $0x18] sm:$0xff pattern:$0x73625140]  ;;  %v345_v1 = vadd.f32 %v344_v60, %v343_v27 }
  0x4b   :  { %v375_v46 = vsel %vm103_vm0, %v280_v42, 0.0  ;;  %v376_v47 = vsel %vm103_vm0, %v281_v43, 0.0  ;;  %v378_v48 = vsel %vm103_vm0, %v282_v44, 0.0  ;;  %v380_v59 = vsel %vm103_vm0, %v283_v45, 0.0  ;;  %v592_v35 = vld [vmem:[%s1254_s2 + $0xe] sm:$0x3] }
  0x4c   :  { %v285_v50 = vld.sshfl [vmem:[#allocation1 + $0x20] sm:$0xff pattern:$0x73625140]  ;;  %v286_v51 = vld.sshfl [vmem:[#allocation1 + $0x28] sm:$0xff pattern:$0x73625140]  ;;  %v377_v52 = vadd.f32 %v376_v47, %v375_v46  ;;  %v372_v32 = vadd.f32 %v371_v31, %v370_v29 }
  0x4d   :  { %v287_v53 = vld.sshfl [vmem:[#allocation1 + $0x30] sm:$0xff pattern:$0x73625140]  ;;  %v288_v54 = vld.sshfl [vmem:[#allocation1 + $0x38] sm:$0xff pattern:$0x73625140] }
  0x4e   :  { %v384_v55 = vsel %vm103_vm0, %v285_v50, 0.0  ;;  %v385_v57 = vsel %vm103_vm0, %v286_v51, 0.0  ;;  %v387_v58 = vsel %vm103_vm0, %v287_v53, 0.0  ;;  %v379_v63 = vadd.f32 %v378_v48, %v377_v52  ;;  %v581_v38 = vld [vmem:[%s1252_s1 + $0x8] sm:$0x3] }
  0x4f   :  { %v386_v62 = vadd.f32 %v385_v57, %v384_v55  ;;  %v389_v0 = vsel %vm103_vm0, %v288_v54, 0.0  ;;  %v583_v40 = vld [vmem:[%s1252_s1 + $0xc] sm:$0x3]  ;;  %v585_v44 = vld [vmem:[%s1254_s2] sm:$0x3] }
  0x50   :  { %v381_v8 = vadd.f32 %v380_v59, %v379_v63  ;;  %v588_v50 = vld [vmem:[%s1254_s2 + $0x6] sm:$0x3]  ;;  %v591_v55 = vld [vmem:[%s1254_s2 + $0xc] sm:$0x3] }
  0x51   :  { %v388_v6 = vadd.f32 %v387_v58, %v386_v62 }
  0x52   :  { %382 = vadd.xlane.f32.xlu2 %v381_v8 }
  0x53   :  { %v390_v9 = vadd.f32 %v389_v0, %v388_v6 }
  0x55   :  { %391 = vadd.xlane.f32.xlu0 %v390_v9 }
  0x5c   :  { %v1027_v46 = vpop.permute.xlu2 %615 }
  0x67   :  { %174 = vadd.xlane.f32.xlu1 %v173_v18 }
  0x69   :  { %619 = vperm.xlu0 %793, %v579_v22  }
  0x6a   :  { %623 = vperm.xlu2 %792, %v580_v28  }
  0x6f   :  { %346 = vadd.xlane.f32.xlu1 %v345_v1 }
  0x71   :  { %695 = vperm.xlu0 %793, %v586_v26  }
  0x72   :  { %631 = vperm.xlu2 %792, %v582_v5  }
  0x77   :  { %373 = vadd.xlane.f32.xlu1 %v372_v32 }
  0x79   :  { %707 = vperm.xlu0 %793, %v589_v33  }
  0x7a   :  { %639 = vperm.xlu2 %792, %v584_v34  }
  0x81   :  { %719 = vperm.xlu0 %793, %v592_v35  }
  0x82   :  { %699 = vperm.xlu2 %792, %v587_v36  }
  0x86   :  { %v112_v39 = vpop.xlane.xlu0 %111 }
  0x87   :  { %v176_v18 = vsel %vm103_vm0, %v112_v39, 0.0 }
  0x88   :  { %v177_v61 = vrot.slane %v176_v18, 4 }
  0x8a   :  { %711 = vperm.xlu2 %792, %v590_v37   ;;  %v178_v29 = vadd.f32 %v177_v61, %v176_v18 }
  0x8c   :  { %v179_v34 = vrot.slane %v178_v29, 2 }
  0x8e   :  { %v121_v41 = vpop.xlane.xlu0 %120 }
  0x8f   :  { %v183_v42 = vsel %vm103_vm0, %v121_v41, 0.0  ;;  %v130_v16 = vpop.xlane.xlu1 %129 }
  0x90   :  { %627 = vperm.xlu1 %791, %v581_v38   ;;  %v184_v43 = vrot.slane %v183_v42, 4 }
  0x92   :  { %v185_v45 = vadd.f32 %v184_v43, %v183_v42  ;;  %v180_v43 = vadd.f32 %v179_v34, %v178_v29 }
  0x94   :  { %v186_v48 = vrot.slane %v185_v45, 2 }
  0x96   :  { %v187_v51 = vadd.f32 %v186_v48, %v185_v45 }
  0x97   :  { %v139_v31 = vpop.xlane.xlu1 %138 }
  0x98   :  { %635 = vperm.xlu1 %791, %v583_v40   ;;  %v188_v53 = vrot.slane %v187_v51, 1  ;;  %v197_v36 = vsel %vm103_vm0, %v139_v31, 0.0 }
  0x9a   :  { %v189_v59 = vadd.f32 %v188_v53, %v187_v51 }
  0x9c   :  { %v1039_v6 = vmul.f32 0.0009765625, %v189_v59 }
  0x9e   :  { %v148_v52 = vpop.xlane.xlu2 %147  ;;  %v466_v12 = vmul.f32 %v1039_v6, %v1039_v6 }
  0x9f   :  { %v204_v63 = vsel %vm103_vm0, %v148_v52, 0.0 }
  0xa0   :  { %691 = vperm.xlu1 %791, %v585_v44   ;;  %v205_v10 = vrot.slane %v204_v63, 4  ;;  %v198_v44 = vrot.slane %v197_v36, 4 }
  0xa1   :  { %v1029_v47 = vpop.xlane.xlu0 %165 }
  0xa2   :  { %v206_v14 = vadd.f32 %v205_v10, %v204_v63  ;;  %v199_v59 = vadd.f32 %v198_v44, %v197_v36 }
  0xa4   :  { %v207_v22 = vrot.slane %v206_v14, 2 }
  0xa6   :  { %v1041_v9 = vpop.xlane.xlu2 %156  ;;  %v208_v23 = vadd.f32 %v207_v22, %v206_v14 }
  0xa8   :  { %703 = vperm.xlu1 %791, %v588_v50   ;;  %v209_v32 = vrot.slane %v208_v23, 1 }
  0xaa   :  { %v210_v39 = vadd.f32 %v209_v32, %v208_v23  ;;  %v211_v23 = vsel %vm103_vm0, %v1041_v9, 0.0  ;;  %v811_v32 = vmov 269488144  }
  0xac   :  { %v1059_v52 = vmul.f32 0.0009765625, %v210_v39 }
  0xad   :  { %v338_v54 = vpop.xlane.xlu0 %337 }
  0xae   :  { %v400_v57 = vsel %vm103_vm0, %v338_v54, 0.0  ;;  %v329_v60 = vpop.xlane.xlu2 %328  ;;  %v190_v54 = vsel %vm103_vm0, %v130_v16, 0.0  ;;  %v469_v10 = vmul.f32 %v1059_v52, %v1059_v52  ;;  %v200_v16 = vrot.slane %v199_v59, 2 }
  0xaf   :  { %v401_v58 = vrot.slane %v400_v57, 4  ;;  %v393_v24 = vsel %vm103_vm0, %v329_v60, 0.0 }
  0xb0   :  { %715 = vperm.xlu1 %791, %v591_v55   ;;  %v394_v5 = vrot.slane %v393_v24, 4 }
  0xb1   :  { %v402_v62 = vadd.f32 %v401_v58, %v400_v57  ;;  %v181_v58 = vrot.slane %v180_v43, 1 }
  0xb2   :  { %v395_v37 = vadd.f32 %v394_v5, %v393_v24 }
  0xb3   :  { %v403_v0 = vrot.slane %v402_v62, 2 }
  0xb4   :  { %v396_v50 = vrot.slane %v395_v37, 2 }
  0xb5   :  { %v404_v8 = vadd.f32 %v403_v0, %v402_v62  ;;  %v191_v0 = vrot.slane %v190_v54, 4 }
  0xb6   :  { %v356_v38 = vpop.xlane.xlu2 %355  ;;  %v397_v62 = vadd.f32 %v396_v50, %v395_v37  ;;  %v212_v37 = vrot.slane %v211_v23, 4 }
  0xb7   :  { %v405_v11 = vrot.slane %v404_v8, 1  ;;  %v414_v45 = vsel %vm103_vm0, %v356_v38, 0.0  ;;  %v192_v22 = vadd.f32 %v191_v0, %v190_v54 }
  0xb8   :  { %v415_v55 = vrot.slane %v414_v45, 4  ;;  %v398_v18 = vrot.slane %v397_v62, 1 }
  0xb9   :  { %v406_v13 = vadd.f32 %v405_v11, %v404_v8  ;;  %v218_v8 = vsel %vm103_vm0, %v1029_v47, 0.0  ;;  %v1066_v11 = vpop.permute.xlu1 %611  ;;  %v193_v31 = vrot.slane %v192_v22, 2 }
  0xbb   :  { %v458_v15 = vmul.f32 0.0009765625, %v406_v13  ;;  %v416_v13 = vadd.f32 %v415_v55, %v414_v45 }
  0xbc   :  { %v365_v17 = vpop.xlane.xlu0 %364 }
  0xbd   :  { %v474_v19 = vsub.f32 %v458_v15, %v466_v12  ;;  %v421_v21 = vsel %vm103_vm0, %v365_v17, 0.0  ;;  %v182_v15 = vadd.f32 %v181_v58, %v180_v43  ;;  %v219_v17 = vrot.slane %v218_v8, 4 }
  0xbe   :  { %v422_v27 = vrot.slane %v421_v21, 4  ;;  %v417_v60 = vrot.slane %v416_v13, 2  ;;  %v213_v58 = vadd.f32 %v212_v37, %v211_v23 }
  0xbf   :  { %v482_v28 = vmax.f32 %v474_v19, 0.0  ;;  %v1071_v61 = vmul.f32 0.0009765625, %v182_v15  ;;  %v220_v24 = vadd.f32 %v219_v17, %v218_v8 }
  0xc0   :  { %v423_v20 = vadd.f32 %v422_v27, %v421_v21  ;;  %v418_v38 = vadd.f32 %v417_v60, %v416_v13  ;;  %v214_v15 = vrot.slane %v213_v58, 2 }
  0xc1   :  { %v1047_v1 = vadd.f32 1e-05, %v482_v28  ;;  %v221_v45 = vrot.slane %v220_v24, 2 }
  0xc2   :  { %v424_v26 = vrot.slane %v423_v20, 2 }
  0xc3   :  { %794 = vrsqrt.f32 %v1047_v1  ;;  %vm513_vm1 = vweird.f32 %v1047_v1  ;;  %v222_v0 = vadd.f32 %v221_v45, %v220_v24 }
  0xc4   :  { %v425_v33 = vadd.f32 %v424_v26, %v423_v20  ;;  %v201_v20 = vadd.f32 %v200_v16, %v199_v59  ;;  %v399_v26 = vadd.f32 %v398_v18, %v397_v62  ;;  %v419_v59 = vrot.slane %v418_v38, 1 }
  0xc5   :  { %v383_v19 = vpop.xlane.xlu2 %382 }
  0xc6   :  { %v426_v41 = vrot.slane %v425_v33, 1  ;;  %v435_v28 = vsel %vm103_vm0, %v383_v19, 0.0  ;;  %v202_v43 = vrot.slane %v201_v20, 1  ;;  %v420_v16 = vadd.f32 %v419_v59, %v418_v38 }
  0xc7   :  { %v436_v29 = vrot.slane %v435_v28, 4 }
  0xc8   :  { %v392_v42 = vpop.xlane.xlu0 %391  ;;  %v427_v53 = vadd.f32 %v426_v41, %v425_v33  ;;  %v642_v33 = vunpack.c.l.s4 %v811_v32  ;;  %v465_v41 = vmul.f32 %v1071_v61, %v1071_v61 }
  0xc9   :  { %v1051_v35 = vpop.eup %794  ;;  %v442_v48 = vsel %vm103_vm0, %v392_v42, 0.0  ;;  %v594_v42 = vsub.f32 %v844_v3, %v1039_v6  ;;  %v437_v50 = vadd.f32 %v436_v29, %v435_v28  ;;  %v203_v6 = vadd.f32 %v202_v43, %v201_v20 }
  0xca   :  { %v508_v40 = vmul.f32 %v1051_v35, %v1047_v1  ;;  %v443_v57 = vrot.slane %v442_v48, 4  ;;  %v461_v12 = vmul.f32 0.0009765625, %v427_v53  ;;  %vm514_vm2 = vweird.f32 %v1051_v35 }
  0xcb   :  { %vm1076_vm3 = vmor %vm513_vm1, %vm514_vm2  ;;  %v194_v53 = vadd.f32 %v193_v31, %v192_v22  ;;  %v1090_v54 = vunpack.c.0.s8 %v642_v33  ;;  %v1099_v60 = vmul.f32 0.0009765625, %v203_v6  ;;  %v460_v31 = vmul.f32 0.0009765625, %v420_v16 }
  0xcc   :  { %v509_v51 = vmul.f32 %v1051_v35, %v508_v40  ;;  %v444_v14 = vadd.f32 %v443_v57, %v442_v48  ;;  %v477_v27 = vsub.f32 %v461_v12, %v469_v10  ;;  %v457_v48 = vmul.f32 0.0009765625, %v399_v26 }
  0xcd   :  { %v438_v10 = vrot.slane %v437_v50, 2  ;;  %v195_v12 = vrot.slane %v194_v53, 1  ;;  %v648_v13 = vperm.slane %v1027_v46, %v1090_v54  ;;  %v468_v37 = vmul.f32 %v1099_v60, %v1099_v60 }
  0xce   :  { %v510_v63 = vmul.f32 0.5, %v509_v51  ;;  %v445_v47 = vrot.slane %v444_v14, 2  ;;  %v485_v34 = vmax.f32 %v477_v27, 0.0  ;;  %v473_v8 = vsub.f32 %v457_v48, %v465_v41  ;;  %v1109_v41 = vpop.permute.xlu2 %623 }
  0xcf   :  { %v439_v46 = vadd.f32 %v438_v10, %v437_v50  ;;  %v196_v29 = vadd.f32 %v195_v12, %v194_v53  ;;  %v476_v48 = vsub.f32 %v460_v31, %v468_v37 }
  0xd0   :  { %v511_v21 = vsub.f32 1.5, %v510_v63  ;;  %v446_v39 = vadd.f32 %v445_v47, %v444_v14  ;;  %v1092_v55 = vadd.f32 1e-05, %v485_v34  ;;  %v223_v47 = vrot.slane %v222_v0, 1 }
  0xd1   :  { %v481_v20 = vmax.f32 %v473_v8, 0.0  ;;  %v1116_v45 = vmul.f32 0.0009765625, %v196_v29  ;;  %v484_v10 = vmax.f32 %v476_v48, 0.0 }
  0xd2   :  { %v512_v5 = vmul.f32 %v1051_v35, %v511_v21  ;;  %v447_v62 = vrot.slane %v446_v39, 1  ;;  %796 = vrsqrt.f32 %v1092_v55  ;;  %v224_v38 = vadd.f32 %v223_v47, %v222_v0 }
  0xd3   :  { %v467_v8 = vmul.f32 %v1116_v45, %v1116_v45  ;;  %vm543_vm4 = vweird.f32 %v1092_v55 }
  0xd4   :  { %v516_v51 = vsel %vm1076_vm3, %v1051_v35, %v512_v5  ;;  %v448_v17 = vadd.f32 %v447_v62, %v446_v39  ;;  %v215_v5 = vadd.f32 %v214_v15, %v213_v58  ;;  %v1107_v39 = vadd.f32 1e-05, %v481_v20 }
  0xd5   :  { %v602_v3 = vmul.f32 %v594_v42, %v516_v51  ;;  %v1121_v62 = vmul.f32 0.0009765625, %v224_v38 }
  0xd6   :  { %v464_v33 = vmul.f32 0.0009765625, %v448_v17  ;;  %v216_v53 = vrot.slane %v215_v5, 1  ;;  %798 = vrsqrt.f32 %v1107_v39  ;;  %vm503_vm11 = vweird.f32 %v1107_v39 }
  0xd7   :  { %v682_v22 = vmul.f32 %v648_v13, %v602_v3  ;;  %v471_v16 = vmul.f32 %v1121_v62, %v1121_v62 }
  0xd8   :  { %v1101_v32 = vpop.eup %796  ;;  %v217_v13 = vadd.f32 %v216_v53, %v215_v5 }
  0xd9   :  { %v538_v50 = vmul.f32 %v1101_v32, %v1092_v55  ;;  %vm544_vm5 = vweird.f32 %v1101_v32 }
  0xda   :  { %v175_v36 = vpop.xlane.xlu1 %174  ;;  %v1135_v47 = vmul.f32 0.0009765625, %v217_v13  ;;  %vm1149_vm6 = vmor %vm543_vm4, %vm544_vm5 }
  0xdb   :  { %v1080_v40 = vpop.permute.xlu0 %619  ;;  %v225_v9 = vsel %vm103_vm0, %v175_v36, 0.0  ;;  %v539_v12 = vmul.f32 %v1101_v32, %v538_v50 }
  0xdc   :  { %v226_v44 = vrot.slane %v225_v9, 4 }
  0xde   :  { %v227_v57 = vadd.f32 %v226_v44, %v225_v9  ;;  %v440_v9 = vrot.slane %v439_v46, 1 }
  0xe0   :  { %v228_v63 = vrot.slane %v227_v57, 2 }
  0xe2   :  { %v229_v35 = vadd.f32 %v228_v63, %v227_v57  ;;  %v347_v14 = vpop.xlane.xlu1 %346  ;;  %v441_v63 = vadd.f32 %v440_v9, %v439_v46 }
  0xe3   :  { %v696_v18 = vpop.permute.xlu0 %695  ;;  %v407_v19 = vsel %vm103_vm0, %v347_v14, 0.0 }
  0xe4   :  { %v230_v21 = vrot.slane %v229_v35, 1  ;;  %v728_v27 = vperm.slane %v696_v18, %v1090_v54  ;;  %v408_v28 = vrot.slane %v407_v19, 4  ;;  %v463_v17 = vmul.f32 0.0009765625, %v441_v63 }
  0xe5   :  { %v597_v63 = vsub.f32 %v869_v25, %v1059_v52 }
  0xe6   :  { %v231_v23 = vadd.f32 %v230_v21, %v229_v35  ;;  %v762_v24 = vadd.f32 %v728_v27, %v682_v22  ;;  %v409_v26 = vadd.f32 %v408_v28, %v407_v19  ;;  %v1129_v21 = vpop.eup %798  ;;  %v1131_v22 = vadd.f32 1e-05, %v484_v10  ;;  %v1133_v27 = vpop.permute.xlu2 %631 }
  0xe7   :  { %v540_v28 = vmul.f32 0.5, %v539_v12  ;;  %vm504_vm12 = vweird.f32 %v1129_v21 }
  0xe8   :  { %v1103_v34 = vmul.f32 0.0009765625, %v231_v23  ;;  %v770_v36 = vmax.f32 %v762_v24, 0.0  ;;  %v410_v1 = vrot.slane %v409_v26, 2  ;;  %v479_v23 = vsub.f32 %v463_v17, %v471_v16  ;;  %vm1192_vm15 = vmor %vm503_vm11, %vm504_vm12 }
  0xe9   :  { %v498_v24 = vmul.f32 %v1129_v21, %v1107_v39  ;;  %v541_v31 = vsub.f32 1.5, %v540_v28  ;;  %vm533_vm4 = vweird.f32 %v1131_v22 }
  0xea   :  { %v472_v42 = vmul.f32 %v1103_v34, %v1103_v34  ;;  %778 = vst [vmem:[%s1255_s3 + $0x8] sm:$0xff] %v770_v36  ;;  %v411_v43 = vadd.f32 %v410_v1, %v409_v26  ;;  %v374_v44 = vpop.xlane.xlu1 %373  ;;  %v470_v36 = vmul.f32 %v1135_v47, %v1135_v47  ;;  %v487_v37 = vmax.f32 %v479_v23, 0.0 }
  0xeb   :  { %v428_v51 = vsel %vm103_vm0, %v374_v44, 0.0  ;;  %v708_v5 = vpop.permute.xlu0 %707  ;;  %v600_v52 = vsub.f32 %v895_v56, %v1103_v34 }
  0xec   :  { %v480_v57 = vsub.f32 %v464_v33, %v472_v42  ;;  %v412_v58 = vrot.slane %v411_v43, 1  ;;  %v429_v59 = vrot.slane %v428_v51, 4  ;;  %v499_v42 = vmul.f32 %v1129_v21, %v498_v24 }
  0xed   :  { %v1155_v53 = vadd.f32 1e-05, %v487_v37  ;;  %v740_v17 = vperm.slane %v708_v5, %v1090_v54  ;;  %v595_v24 = vsub.f32 %v850_v4, %v1116_v45 }
  0xee   :  { %v488_v3 = vmax.f32 %v480_v57, 0.0  ;;  %v413_v6 = vadd.f32 %v412_v58, %v411_v43  ;;  %v430_v0 = vadd.f32 %v429_v59, %v428_v51  ;;  %v542_v43 = vmul.f32 %v1101_v32, %v541_v31  ;;  %v640_v57 = vpop.permute.xlu2 %639 }
  0xf0   :  { %v496_v35 = vadd.f32 1e-05, %v488_v3  ;;  %v459_v14 = vmul.f32 0.0009765625, %v413_v6  ;;  %v431_v15 = vrot.slane %v430_v0, 2  ;;  %v500_v3 = vmul.f32 0.5, %v499_v42 }
  0xf2   :  { %800 = vrsqrt.f32 %v496_v35  ;;  %v475_v18 = vsub.f32 %v459_v14, %v467_v8  ;;  %v432_v19 = vadd.f32 %v431_v15, %v430_v0  ;;  %v546_v0 = vsel %vm1149_vm6, %v1101_v32, %v542_v43 }
  0xf3   :  { %802 = vrsqrt.f32 %v1131_v22  ;;  %vm573_vm8 = vweird.f32 %v496_v35  ;;  %v720_v25 = vpop.permute.xlu0 %719  ;;  %v605_v15 = vmul.f32 %v597_v63, %v546_v0  ;;  %v501_v32 = vsub.f32 1.5, %v500_v3 }
  0xf4   :  { %v483_v20 = vmax.f32 %v475_v18, 0.0  ;;  %v433_v46 = vrot.slane %v432_v19, 1  ;;  %vm563_vm6 = vweird.f32 %v1155_v53 }
  0xf5   :  { %v502_v45 = vmul.f32 %v1129_v21, %v501_v32 }
  0xf6   :  { %v1139_v26 = vadd.f32 1e-05, %v483_v20  ;;  %v434_v29 = vadd.f32 %v433_v46, %v432_v19  ;;  %v672_v20 = vperm.slane %v640_v57, %v1090_v54  ;;  %v700_v31 = vpop.permute.xlu2 %699  ;;  %v593_v57 = vsub.f32 %v838_v2, %v1071_v61 }
  0xf7   :  { %v732_v39 = vperm.slane %v700_v31, %v1090_v54  ;;  %v506_v3 = vsel %vm1192_vm15, %v1129_v21, %v502_v45  ;;  %v644_v21 = vperm.slane %v1066_v11, %v1090_v54 }
  0xf8   :  { %v801_v33 = vpop.eup %800  ;;  %804 = vrsqrt.f32 %v1139_v26  ;;  %v462_v1 = vmul.f32 0.0009765625, %v434_v29  ;;  %vm523_vm13 = vweird.f32 %v1139_v26 }
  0xf9   :  { %v568_v38 = vmul.f32 %v801_v33, %v496_v35  ;;  %v1153_v51 = vpop.eup %802  ;;  %vm574_vm7 = vweird.f32 %v801_v33  ;;  %v752_v35 = vperm.slane %v720_v25, %v1090_v54 }
  0xfa   :  { %v478_v9 = vsub.f32 %v462_v1, %v470_v36  ;;  %v528_v10 = vmul.f32 %v1153_v51, %v1131_v22  ;;  %vm575_vm9 = vmor %vm573_vm8, %vm574_vm7  ;;  %vm534_vm2 = vweird.f32 %v1153_v51  ;;  %v596_v22 = vsub.f32 %v855_v7, %v1099_v60 }
  0xfb   :  { %v569_v44 = vmul.f32 %v801_v33, %v568_v38  ;;  %v652_v38 = vperm.slane %v1080_v40, %v1090_v54  ;;  %vm535_vm5 = vmor %vm533_vm4, %vm534_vm2 }
  0xfc   :  { %v486_v48 = vmax.f32 %v478_v9, 0.0  ;;  %v529_v28 = vmul.f32 %v1153_v51, %v528_v10  ;;  %v598_v10 = vsub.f32 %v875_v30, %v1135_v47 }
  0xfd   :  { %v570_v58 = vmul.f32 0.5, %v569_v44 }
  0xfe   :  { %v805_v55 = vpop.eup %804  ;;  %v1157_v59 = vadd.f32 1e-05, %v486_v48  ;;  %v530_v37 = vmul.f32 0.5, %v529_v28  ;;  %v712_v25 = vpop.permute.xlu2 %711 }
  0xff   :  { %v518_v6 = vmul.f32 %v805_v55, %v1139_v26  ;;  %v571_v8 = vsub.f32 1.5, %v570_v58  ;;  %vm524_vm10 = vweird.f32 %v805_v55 }
 0x100   :  { %806 = vrsqrt.f32 %v1157_v59  ;;  %vm525_vm14 = vmor %vm523_vm13, %vm524_vm10  ;;  %vm553_vm1 = vweird.f32 %v1157_v59 }
 0x101   :  { %808 = vrsqrt.f32 %v1155_v53  ;;  %v519_v12 = vmul.f32 %v805_v55, %v518_v6  ;;  %v572_v13 = vmul.f32 %v801_v33, %v571_v8  ;;  %v601_v8 = vmul.f32 %v593_v57, %v506_v3 }
 0x102   :  { %v628_v14 = vpop.permute.xlu1 %627 }
 0x103   :  { %v520_v16 = vmul.f32 0.5, %v519_v12  ;;  %v660_v18 = vperm.slane %v628_v14, %v1090_v54  ;;  %v576_v19 = vsel %vm575_vm9, %v801_v33, %v572_v13 }
 0x104   :  { %v608_v46 = vmul.f32 %v600_v52, %v576_v19 }
 0x105   :  { %v521_v23 = vsub.f32 1.5, %v520_v16  ;;  %v685_v56 = vmul.f32 %v660_v18, %v605_v15  ;;  %v681_v15 = vmul.f32 %v644_v21, %v601_v8  ;;  %v744_v16 = vperm.slane %v712_v25, %v1090_v54 }
 0x106   :  { %v807_v34 = vpop.eup %806  ;;  %v688_v29 = vmul.f32 %v672_v20, %v608_v46 }
 0x107   :  { %v1180_v5 = vpop.eup %808  ;;  %v522_v33 = vmul.f32 %v805_v55, %v521_v23  ;;  %v548_v36 = vmul.f32 %v807_v34, %v1157_v59  ;;  %v765_v1 = vadd.f32 %v740_v17, %v685_v56  ;;  %vm554_vm0 = vweird.f32 %v807_v34 }
 0x108   :  { %v768_v4 = vadd.f32 %v752_v35, %v688_v29  ;;  %v558_v44 = vmul.f32 %v1180_v5, %v1155_v53  ;;  %vm555_vm3 = vmor %vm553_vm1, %vm554_vm0  ;;  %v664_v59 = vperm.slane %v1133_v27, %v1090_v54  ;;  %vm564_vm7 = vweird.f32 %v1180_v5 }
 0x109   :  { %v526_v9 = vsel %vm525_vm14, %v805_v55, %v522_v33  ;;  %v549_v42 = vmul.f32 %v807_v34, %v548_v36  ;;  %v773_v43 = vmax.f32 %v765_v1, 0.0  ;;  %v531_v55 = vsub.f32 1.5, %v530_v37  ;;  %vm565_vm8 = vmor %vm563_vm6, %vm564_vm7 }
 0x10a   :  { %v603_v40 = vmul.f32 %v595_v24, %v526_v9  ;;  %v776_v48 = vmax.f32 %v768_v4, 0.0  ;;  %v636_v50 = vpop.permute.xlu1 %635  ;;  %v559_v61 = vmul.f32 %v1180_v5, %v558_v44  ;;  %v656_v35 = vperm.slane %v1109_v41, %v1090_v54 }
 0x10b   :  { %v550_v58 = vmul.f32 0.5, %v549_v42  ;;  %781 = vst [vmem:[%s1255_s3 + $0x20] sm:$0xff] %v773_v43  ;;  %v532_v12 = vmul.f32 %v1153_v51, %v531_v55  ;;  %v599_v23 = vsub.f32 %v889_v49, %v1121_v62 }
 0x10c   :  { %v683_v63 = vmul.f32 %v652_v38, %v603_v40  ;;  %784 = vst [vmem:[%s1255_s3 + $0x38] sm:$0xff] %v776_v48  ;;  %v560_v47 = vmul.f32 0.5, %v559_v61 }
 0x10d   :  { %v551_v6 = vsub.f32 1.5, %v550_v58  ;;  %v536_v11 = vsel %vm535_vm5, %v1153_v51, %v532_v12 }
 0x10e   :  { %v763_v2 = vadd.f32 %v732_v39, %v683_v63  ;;  %v561_v19 = vsub.f32 1.5, %v560_v47  ;;  %v604_v28 = vmul.f32 %v596_v22, %v536_v11 }
 0x10f   :  { %v552_v0 = vmul.f32 %v807_v34, %v551_v6 }
 0x110   :  { %v771_v13 = vmax.f32 %v763_v2, 0.0  ;;  %v562_v7 = vmul.f32 %v1180_v5, %v561_v19  ;;  %v684_v51 = vmul.f32 %v656_v35, %v604_v28 }
 0x111   :  { %v556_v52 = vsel %vm555_vm3, %v807_v34, %v552_v0  ;;  %v668_v34 = vperm.slane %v636_v50, %v1090_v54 }
 0x112   :  { %779 = vst [vmem:[%s1255_s3 + $0x10] sm:$0xff] %v771_v13  ;;  %v606_v30 = vmul.f32 %v598_v10, %v556_v52  ;;  %v692_v14 = vpop.permute.xlu1 %691  ;;  %v566_v41 = vsel %vm565_vm8, %v1180_v5, %v562_v7 }
 0x113   :  { %v724_v32 = vperm.slane %v692_v14, %v1090_v54  ;;  %v607_v29 = vmul.f32 %v599_v23, %v566_v41 }
 0x114   :  { %v686_v17 = vmul.f32 %v664_v59, %v606_v30 }
 0x115   :  { %v761_v27 = vadd.f32 %v724_v32, %v681_v15  ;;  %v687_v33 = vmul.f32 %v668_v34, %v607_v29 }
 0x116   :  { %v766_v18 = vadd.f32 %v744_v16, %v686_v17 }
 0x117   :  { %v769_v20 = vmax.f32 %v761_v27, 0.0 }
 0x118   :  { %v774_v46 = vmax.f32 %v766_v18, 0.0 }
 0x119   :  { %777 = vst [vmem:[%s1255_s3] sm:$0xff] %v769_v20 }
 0x11a   :  { %782 = vst [vmem:[%s1255_s3 + $0x28] sm:$0xff] %v774_v46  ;;  %v704_v60 = vpop.permute.xlu1 %703 }
 0x11b   :  { %v736_v53 = vperm.slane %v704_v60, %v1090_v54 }
 0x11d   :  { %v764_v56 = vadd.f32 %v736_v53, %v684_v51 }
 0x11f   :  { %v772_v24 = vmax.f32 %v764_v56, 0.0 }
 0x121   :  { %780 = vst [vmem:[%s1255_s3 + $0x18] sm:$0xff] %v772_v24 }
 0x122   :  { %v716_v31 = vpop.permute.xlu1 %715 }
 0x123   :  { %v748_v36 = vperm.slane %v716_v31, %v1090_v54 }
 0x125   :  { %v767_v1 = vadd.f32 %v748_v36, %v687_v33 }
 0x127   :  { %v775_v37 = vmax.f32 %v767_v1, 0.0 }
 0x129   :  { %783 = vst [vmem:[%s1255_s3 + $0x30] sm:$0xff] %v775_v37 }

// kernel: _lambda_.23
= control target key start
LH: loop header
LB: loop body
LE: loop exit
PB: predicated region body
PF: predicated region fallthrough
CT: control target
= control target key end

     0   :  { %s1162_s12 = smov 0   ;;  %s1164_s13 = smov 0   ;;  %s1315_s0 = inlined_call_operand.vmem [shape: bf16[1024,128], index: 0, kind: input, shape index: {}]   ;;  %s1316_s1 = inlined_call_operand.vmem [shape: bf16[128,128], index: 1, kind: input, shape index: {}]   ;;  %s1317_s2 = inlined_call_operand.vmem [shape: f32[1024,128], index: 2, kind: input, shape index: {}]   ;;  %s1318_s3 = inlined_call_operand.vmem [shape: f32[1024,128], index: 3, kind: output, shape index: {}]  }
   0x1   :  { %s1166_s14 = smov 0  }
   0x2 LB: > { %s32_s15 = sadd.s32 1, %s1136_s13  ;;  %p941_p0 = scmp.ge.s32.totalorder %s1140_s14, 1  ;;  %s1140_s14 = sphi %s1166_s14, %s13_s14   ;;  %s1136_s13 = sphi %s1164_s13, %s1320_s13   ;;  %s1132_s12 = sphi %s1162_s12, %s1319_s12  }
   0x3   : > { %p34_p1 = scmp.ge.s32.totalorder %s32_s15, 4  ;;  %p196_p2 = scmp.lt.s32.totalorder %s1140_s14, 5 }
   0x5   : > { %s1322_s15 = smov (%p34_p1, %s32_s15), 0  ;;  %p197_p3 = pnand %p941_p0, %p196_p2 }
   0x6   : > { %s942_s24 = sshll.u32 (!%p197_p3), %s1132_s12, 5 }
   0x7   : > { %200 = sbr.rel (%p197_p3) target bundleno = 237 (0xed), region = 32  ;;  %p243_p4 = scmp.lt.s32.totalorder (!%p197_p3), %s942_s24, 127 }
   0xc   : > { %v1069_v0 = vld [vmem:[%s1316_s1 + $0x38] sm:$0xff]  ;;  %v1068_v1 = vld [vmem:[%s1316_s1 + $0x30] sm:$0xff]  ;;  %v1067_v2 = vld [vmem:[%s1316_s1 + $0x28] sm:$0xff]  ;;  %s1324_s24 = smov (!%p243_p4, %s942_s24), 127 }
   0xd   : > { %538 = vmatpush.bf16.msra.mxu0 %v1069_v0  ;;  %1070 = vmatpush.bf16.msra.mxu1 %v1069_v0  ;;  %v1066_v3 = vld [vmem:[%s1316_s1 + $0x20] sm:$0xff]  ;;  %v1065_v4 = vld [vmem:[%s1316_s1 + $0x18] sm:$0xff]  ;;  %v1064_v5 = vld [vmem:[%s1316_s1 + $0x10] sm:$0xff]  ;;  %s943_s4 = sshll.u32 %s1324_s24, 2  ;;  %s945_s10 = sshll.u32 %s1324_s24, 3 }
   0xe   : > { %1071 = vmatpush.bf16.msra.mxu2 %v1069_v0  ;;  %1072 = vmatpush.bf16.msra.mxu3 %v1069_v0  ;;  %v1063_v6 = vld [vmem:[%s1316_s1 + $0x8] sm:$0xff]  ;;  %v1062_v7 = vld [vmem:[%s1316_s1] sm:$0xff]  ;;  %s1213_s9 = scalar_lea.vmem %s1315_s0, %s943_s4  ;;  %s1235_s16 = scalar_lea.vmem %s1317_s2, %s945_s10 }
   0xf   : > { %v1046_v8 = vld [vmem:[%s1213_s9] sm:$0xff]  ;;  %v1047_v12 = vld [vmem:[%s1213_s9 + $0x8] sm:$0xff]  ;;  %v1048_v16 = vld [vmem:[%s1213_s9 + $0x10] sm:$0xff]  ;;  %s1242_s19 = scalar_lea.vmem %s1318_s3, %s945_s10 }
  0x10   : > { %v1050_v9 = vld [vmem:[%s1213_s9 + $0x20] sm:$0xff]  ;;  %v1051_v13 = vld [vmem:[%s1213_s9 + $0x28] sm:$0xff]  ;;  %v1052_v17 = vld [vmem:[%s1213_s9 + $0x30] sm:$0xff] }
  0x11   : > { %539 = vmatpush.bf16.msra.mxu0 %v1068_v1  ;;  %1073 = vmatpush.bf16.msra.mxu1 %v1068_v1  ;;  %v1054_v10 = vld [vmem:[%s1213_s9 + $0x40] sm:$0xff]  ;;  %v1055_v14 = vld [vmem:[%s1213_s9 + $0x48] sm:$0xff]  ;;  %v1056_v18 = vld [vmem:[%s1213_s9 + $0x50] sm:$0xff] }
  0x12   : > { %1074 = vmatpush.bf16.msra.mxu2 %v1068_v1  ;;  %1075 = vmatpush.bf16.msra.mxu3 %v1068_v1  ;;  %v1058_v11 = vld [vmem:[%s1213_s9 + $0x60] sm:$0xff]  ;;  %v1059_v15 = vld [vmem:[%s1213_s9 + $0x68] sm:$0xff]  ;;  %v1060_v19 = vld [vmem:[%s1213_s9 + $0x70] sm:$0xff] }
  0x13   : > { %v1049_v20 = vld [vmem:[%s1213_s9 + $0x18] sm:$0xff]  ;;  %v726_v24 = vld [vmem:[%s1235_s16] sm:$0xff]  ;;  %v727_v32 = vld [vmem:[%s1235_s16 + $0x8] sm:$0xff] }
  0x14   : > { %v1053_v21 = vld [vmem:[%s1213_s9 + $0x38] sm:$0xff]  ;;  %v734_v25 = vld [vmem:[%s1235_s16 + $0x40] sm:$0xff]  ;;  %v735_v33 = vld [vmem:[%s1235_s16 + $0x48] sm:$0xff] }
  0x15   : > { %540 = vmatpush.bf16.msra.mxu0 %v1067_v2  ;;  %1076 = vmatpush.bf16.msra.mxu1 %v1067_v2  ;;  %v1057_v22 = vld [vmem:[%s1213_s9 + $0x58] sm:$0xff]  ;;  %v742_v30 = vld [vmem:[%s1235_s16 + $0x80] sm:$0xff]  ;;  %v743_v42 = vld [vmem:[%s1235_s16 + $0x88] sm:$0xff] }
  0x16   : > { %1077 = vmatpush.bf16.msra.mxu2 %v1067_v2  ;;  %1078 = vmatpush.bf16.msra.mxu3 %v1067_v2  ;;  %v1061_v23 = vld [vmem:[%s1213_s9 + $0x78] sm:$0xff]  ;;  %v750_v31 = vld [vmem:[%s1235_s16 + $0xc0] sm:$0xff]  ;;  %v751_v43 = vld [vmem:[%s1235_s16 + $0xc8] sm:$0xff] }
  0x17   : > { %v728_v44 = vld [vmem:[%s1235_s16 + $0x10] sm:$0xff]  ;;  %v729_v56 = vld [vmem:[%s1235_s16 + $0x18] sm:$0xff] }
  0x18   : > { %v736_v45 = vld [vmem:[%s1235_s16 + $0x50] sm:$0xff]  ;;  %v737_v57 = vld [vmem:[%s1235_s16 + $0x58] sm:$0xff] }
  0x19   : > { %541 = vmatpush.bf16.msra.mxu0 %v1066_v3  ;;  %1079 = vmatpush.bf16.msra.mxu1 %v1066_v3  ;;  %v744_v54 = vld [vmem:[%s1235_s16 + $0x90] sm:$0xff]  ;;  %v745_v2 = vld [vmem:[%s1235_s16 + $0x98] sm:$0xff] }
  0x1a   : > { %1080 = vmatpush.bf16.msra.mxu2 %v1066_v3  ;;  %1081 = vmatpush.bf16.msra.mxu3 %v1066_v3  ;;  %v752_v55 = vld [vmem:[%s1235_s16 + $0xd0] sm:$0xff]  ;;  %v753_v3 = vld [vmem:[%s1235_s16 + $0xd8] sm:$0xff] }
  0x1d   : > { %542 = vmatpush.bf16.msra.mxu0 %v1065_v4  ;;  %1082 = vmatpush.bf16.msra.mxu1 %v1065_v4 }
  0x1e   : > { %1083 = vmatpush.bf16.msra.mxu2 %v1065_v4  ;;  %1084 = vmatpush.bf16.msra.mxu3 %v1065_v4  ;;  %v730_v4 = vld [vmem:[%s1235_s16 + $0x20] sm:$0xff] }
  0x21   : > { %543 = vmatpush.bf16.msra.mxu0 %v1064_v5  ;;  %1085 = vmatpush.bf16.msra.mxu1 %v1064_v5 }
  0x22   : > { %1086 = vmatpush.bf16.msra.mxu2 %v1064_v5  ;;  %1087 = vmatpush.bf16.msra.mxu3 %v1064_v5  ;;  %v738_v5 = vld [vmem:[%s1235_s16 + $0x60] sm:$0xff] }
  0x25   : > { %544 = vmatpush.bf16.msra.mxu0 %v1063_v6  ;;  %1088 = vmatpush.bf16.msra.mxu1 %v1063_v6 }
  0x26   : > { %1089 = vmatpush.bf16.msra.mxu2 %v1063_v6  ;;  %1090 = vmatpush.bf16.msra.mxu3 %v1063_v6 }
  0x29   : > { %545 = vmatpush.bf16.msra.mxu0 %v1062_v7  ;;  %1091 = vmatpush.bf16.msra.mxu1 %v1062_v7 }
  0x2a   : > { %1092 = vmatpush.bf16.msra.mxu2 %v1062_v7  ;;  %1093 = vmatpush.bf16.msra.mxu3 %v1062_v7 }
  0x2c   : > { %546 = vmatmul.bf16.vlgmr.msra.gmra.mxu0 %v1046_v8  ;;  %566 = vmatmul.bf16.vlgmr.msra.gmra.mxu1 %v1050_v9 }
  0x2d   : > { %586 = vmatmul.bf16.vlgmr.msra.gmra.mxu2 %v1054_v10  ;;  %606 = vmatmul.bf16.vlgmr.msra.gmra.mxu3 %v1058_v11 }
  0x3c   : > { %551 = vmatmul.bf16.gmra.mxu0 %v1047_v12  ;;  %571 = vmatmul.bf16.gmra.mxu1 %v1051_v13 }
  0x3d   : > { %591 = vmatmul.bf16.gmra.mxu2 %v1055_v14  ;;  %611 = vmatmul.bf16.gmra.mxu3 %v1059_v15  ;;  %v746_v14 = vld [vmem:[%s1235_s16 + $0xa0] sm:$0xff] }
  0x3e   : > { %v754_v15 = vld [vmem:[%s1235_s16 + $0xe0] sm:$0xff] }
  0x4c   : > { %556 = vmatmul.bf16.gmra.mxu0 %v1048_v16  ;;  %576 = vmatmul.bf16.gmra.mxu1 %v1052_v17  ;;  %v731_v16 = vld [vmem:[%s1235_s16 + $0x28] sm:$0xff] }
  0x4d   : > { %596 = vmatmul.bf16.gmra.mxu2 %v1056_v18  ;;  %616 = vmatmul.bf16.gmra.mxu3 %v1060_v19  ;;  %v739_v17 = vld [vmem:[%s1235_s16 + $0x68] sm:$0xff] }
  0x5c   : > { %561 = vmatmul.bf16.gmra.mxu0 %v1049_v20  ;;  %581 = vmatmul.bf16.gmra.mxu1 %v1053_v21 }
  0x5d   : > { %601 = vmatmul.bf16.gmra.mxu2 %v1057_v22  ;;  %621 = vmatmul.bf16.gmra.mxu3 %v1061_v23 }
  0xa9   : > { %v547_v26 = vpop.f32.mrf.mxu0  ;;  %v567_v27 = vpop.f32.mrf.mxu1 }
  0xaa   : > { %v758_v28 = vadd.f32 %v726_v24, %v547_v26  ;;  %v766_v29 = vadd.f32 %v734_v25, %v567_v27  ;;  %v747_v26 = vld [vmem:[%s1235_s16 + $0xa8] sm:$0xff] }
  0xab   : > { %v755_v27 = vld [vmem:[%s1235_s16 + $0xe8] sm:$0xff] }
  0xac   : > { %790 = vst [vmem:[%s1242_s19] sm:$0xff] %v758_v28  ;;  %v732_v28 = vld [vmem:[%s1235_s16 + $0x30] sm:$0xff] }
  0xad   : > { %798 = vst [vmem:[%s1242_s19 + $0x40] sm:$0xff] %v766_v29  ;;  %v740_v29 = vld [vmem:[%s1235_s16 + $0x70] sm:$0xff] }
  0xb0   : > { %v587_v34 = vpop.f32.mrf.mxu2  ;;  %v607_v35 = vpop.f32.mrf.mxu3 }
  0xb1   : > { %v774_v36 = vadd.f32 %v742_v30, %v587_v34  ;;  %v782_v37 = vadd.f32 %v750_v31, %v607_v35  ;;  %v549_v38 = vpop.f32.mrf.mxu0  ;;  %v569_v39 = vpop.f32.mrf.mxu1 }
  0xb2   : > { %v759_v40 = vadd.f32 %v727_v32, %v549_v38  ;;  %v767_v41 = vadd.f32 %v735_v33, %v569_v39  ;;  %v748_v38 = vld [vmem:[%s1235_s16 + $0xb0] sm:$0xff] }
  0xb3   : > { %806 = vst [vmem:[%s1242_s19 + $0x80] sm:$0xff] %v774_v36  ;;  %v756_v39 = vld [vmem:[%s1235_s16 + $0xf0] sm:$0xff] }
  0xb4   : > { %814 = vst [vmem:[%s1242_s19 + $0xc0] sm:$0xff] %v782_v37 }
  0xb5   : > { %791 = vst [vmem:[%s1242_s19 + $0x8] sm:$0xff] %v759_v40  ;;  %v733_v40 = vld [vmem:[%s1235_s16 + $0x38] sm:$0xff] }
  0xb6   : > { %799 = vst [vmem:[%s1242_s19 + $0x48] sm:$0xff] %v767_v41  ;;  %v741_v41 = vld [vmem:[%s1235_s16 + $0x78] sm:$0xff] }
  0xb8   : > { %v589_v46 = vpop.f32.mrf.mxu2  ;;  %v609_v47 = vpop.f32.mrf.mxu3 }
  0xb9   : > { %v775_v48 = vadd.f32 %v743_v42, %v589_v46  ;;  %v783_v49 = vadd.f32 %v751_v43, %v609_v47  ;;  %v552_v50 = vpop.f32.mrf.mxu0  ;;  %v572_v51 = vpop.f32.mrf.mxu1 }
  0xba   : > { %v760_v52 = vadd.f32 %v728_v44, %v552_v50  ;;  %v768_v53 = vadd.f32 %v736_v45, %v572_v51  ;;  %v749_v50 = vld [vmem:[%s1235_s16 + $0xb8] sm:$0xff] }
  0xbb   : > { %807 = vst [vmem:[%s1242_s19 + $0x88] sm:$0xff] %v775_v48  ;;  %v757_v51 = vld [vmem:[%s1235_s16 + $0xf8] sm:$0xff] }
  0xbc   : > { %815 = vst [vmem:[%s1242_s19 + $0xc8] sm:$0xff] %v783_v49 }
  0xbd   : > { %792 = vst [vmem:[%s1242_s19 + $0x10] sm:$0xff] %v760_v52 }
  0xbe   : > { %800 = vst [vmem:[%s1242_s19 + $0x50] sm:$0xff] %v768_v53 }
  0xc0   : > { %v592_v58 = vpop.f32.mrf.mxu2  ;;  %v612_v59 = vpop.f32.mrf.mxu3 }
  0xc1   : > { %v776_v60 = vadd.f32 %v744_v54, %v592_v58  ;;  %v784_v61 = vadd.f32 %v752_v55, %v612_v59  ;;  %v554_v62 = vpop.f32.mrf.mxu0  ;;  %v574_v63 = vpop.f32.mrf.mxu1 }
  0xc2   : > { %v761_v0 = vadd.f32 %v729_v56, %v554_v62  ;;  %v769_v1 = vadd.f32 %v737_v57, %v574_v63 }
  0xc3   : > { %808 = vst [vmem:[%s1242_s19 + $0x90] sm:$0xff] %v776_v60 }
  0xc4   : > { %816 = vst [vmem:[%s1242_s19 + $0xd0] sm:$0xff] %v784_v61 }
  0xc5   : > { %793 = vst [vmem:[%s1242_s19 + $0x18] sm:$0xff] %v761_v0 }
  0xc6   : > { %801 = vst [vmem:[%s1242_s19 + $0x58] sm:$0xff] %v769_v1 }
  0xc8   : > { %v594_v6 = vpop.f32.mrf.mxu2  ;;  %v614_v7 = vpop.f32.mrf.mxu3 }
  0xc9   : > { %v777_v8 = vadd.f32 %v745_v2, %v594_v6  ;;  %v785_v9 = vadd.f32 %v753_v3, %v614_v7  ;;  %v557_v10 = vpop.f32.mrf.mxu0  ;;  %v577_v11 = vpop.f32.mrf.mxu1 }
  0xca   : > { %v762_v12 = vadd.f32 %v730_v4, %v557_v10  ;;  %v770_v13 = vadd.f32 %v738_v5, %v577_v11 }
  0xcb   : > { %809 = vst [vmem:[%s1242_s19 + $0x98] sm:$0xff] %v777_v8 }
  0xcc   : > { %817 = vst [vmem:[%s1242_s19 + $0xd8] sm:$0xff] %v785_v9 }
  0xcd   : > { %794 = vst [vmem:[%s1242_s19 + $0x20] sm:$0xff] %v762_v12 }
  0xce   : > { %802 = vst [vmem:[%s1242_s19 + $0x60] sm:$0xff] %v770_v13 }
  0xd0   : > { %v597_v18 = vpop.f32.mrf.mxu2  ;;  %v617_v19 = vpop.f32.mrf.mxu3 }
  0xd1   : > { %v778_v20 = vadd.f32 %v746_v14, %v597_v18  ;;  %v786_v21 = vadd.f32 %v754_v15, %v617_v19  ;;  %v559_v22 = vpop.f32.mrf.mxu0  ;;  %v579_v23 = vpop.f32.mrf.mxu1 }
  0xd2   : > { %v763_v24 = vadd.f32 %v731_v16, %v559_v22  ;;  %v771_v25 = vadd.f32 %v739_v17, %v579_v23 }
  0xd3   : > { %810 = vst [vmem:[%s1242_s19 + $0xa0] sm:$0xff] %v778_v20 }
  0xd4   : > { %818 = vst [vmem:[%s1242_s19 + $0xe0] sm:$0xff] %v786_v21 }
  0xd5   : > { %795 = vst [vmem:[%s1242_s19 + $0x28] sm:$0xff] %v763_v24 }
  0xd6   : > { %803 = vst [vmem:[%s1242_s19 + $0x68] sm:$0xff] %v771_v25 }
  0xd8   : > { %v599_v30 = vpop.f32.mrf.mxu2  ;;  %v619_v31 = vpop.f32.mrf.mxu3 }
  0xd9   : > { %v779_v32 = vadd.f32 %v747_v26, %v599_v30  ;;  %v787_v33 = vadd.f32 %v755_v27, %v619_v31  ;;  %v562_v34 = vpop.f32.mrf.mxu0  ;;  %v582_v35 = vpop.f32.mrf.mxu1 }
  0xda   : > { %v764_v36 = vadd.f32 %v732_v28, %v562_v34  ;;  %v772_v37 = vadd.f32 %v740_v29, %v582_v35 }
  0xdb   : > { %811 = vst [vmem:[%s1242_s19 + $0xa8] sm:$0xff] %v779_v32 }
  0xdc   : > { %819 = vst [vmem:[%s1242_s19 + $0xe8] sm:$0xff] %v787_v33 }
  0xdd   : > { %796 = vst [vmem:[%s1242_s19 + $0x30] sm:$0xff] %v764_v36 }
  0xde   : > { %804 = vst [vmem:[%s1242_s19 + $0x70] sm:$0xff] %v772_v37 }
  0xe0   : > { %v602_v42 = vpop.f32.mrf.mxu2  ;;  %v622_v43 = vpop.f32.mrf.mxu3 }
  0xe1   : > { %v780_v44 = vadd.f32 %v748_v38, %v602_v42  ;;  %v788_v45 = vadd.f32 %v756_v39, %v622_v43  ;;  %v564_v46 = vpop.f32.mrf.mxu0  ;;  %v584_v47 = vpop.f32.mrf.mxu1 }
  0xe2   : > { %v765_v48 = vadd.f32 %v733_v40, %v564_v46  ;;  %v773_v49 = vadd.f32 %v741_v41, %v584_v47 }
  0xe3   : > { %812 = vst [vmem:[%s1242_s19 + $0xb0] sm:$0xff] %v780_v44 }
  0xe4   : > { %820 = vst [vmem:[%s1242_s19 + $0xf0] sm:$0xff] %v788_v45 }
  0xe5   : > { %797 = vst [vmem:[%s1242_s19 + $0x38] sm:$0xff] %v765_v48 }
  0xe6   : > { %805 = vst [vmem:[%s1242_s19 + $0x78] sm:$0xff] %v773_v49 }
  0xe8   : > { %v604_v52 = vpop.f32.mrf.mxu2  ;;  %v624_v53 = vpop.f32.mrf.mxu3 }
  0xe9   : > { %v781_v54 = vadd.f32 %v749_v50, %v604_v52  ;;  %v789_v55 = vadd.f32 %v757_v51, %v624_v53 }
  0xeb   : > { %813 = vst [vmem:[%s1242_s19 + $0xb8] sm:$0xff] %v781_v54 }
  0xec   : > { %821 = vst [vmem:[%s1242_s19 + $0xf8] sm:$0xff] %v789_v55 }
  0xed PF: > { %s13_s14 = sadd.s32 1, %s1140_s14   ;;  %s1319_s12 = smov %s1136_s13 }
  0xee   : > { %p10_p5 = scmp.ge.s32.totalorder %s13_s14, 6   ;;  %s1320_s13 = smov %s1322_s15 }
  0xf0   :  { %12 = sbr.rel (!%p10_p5) target bundleno = 2 (0x2), region = 76 }

</bundles_post_ra>
